<compile_context>
chip_gen: v6e
topology: v6e:2x2x1
jax: 0.10.0
libtpu: 0.0.40
codegen_flags: <defaults>
</compile_context>

<pallas_src>
import functools
import math

import numpy as np
import jax
import jax.numpy as jnp
from jax.experimental import pallas as pl
from jax.experimental.pallas import tpu as pltpu

_HIGHEST = jax.lax.Precision.HIGHEST


def _mm(a, b):
    """a (m,k) @ b (k,n) -> (m,n), exact f32 on the MXU."""
    return jax.lax.dot_general(a, b, (((1,), (0,)), ((), ())),
                               precision=_HIGHEST,
                               preferred_element_type=jnp.float32)


def _mm_nt(a, b):
    """a (m,k) @ b (n,k)^T -> (m,n) without an explicit transpose."""
    return jax.lax.dot_general(a, b, (((1,), (1,)), ((), ())),
                               precision=_HIGHEST,
                               preferred_element_type=jnp.float32)


def _layernorm(x, w, b, eps):
    mu = jnp.mean(x, axis=-1, keepdims=True)
    xc = x - mu
    var = jnp.mean(xc * xc, axis=-1, keepdims=True)
    return xc * jax.lax.rsqrt(var + eps) * w + b


# ---------------------------------------------------------------------------
# Fused kernel.  Grid = (batch, pass, head_chunk).
#   pass 0 : first self-attention (edge0-biased softmax), per head chunk.
#   pass 1 : finish the x path once (out_proj/residual/mha_norm/FFN and the
#            second-attention projections), then write e_out per head chunk.
# ---------------------------------------------------------------------------
def discriminator_layer_kernel(
    n0_ref, n1_ref, e0_ref,
    norm1_w_ref, norm1_b_ref, in_w_ref, in_b_ref, out_w_ref, out_b_ref,
    mhn_w_ref, mhn_b_ref, q2_w_ref, q2_b_ref, kvk_w_ref, kvk_b_ref,
    norm2_w_ref, norm2_b_ref, l1_w_ref, l1_b_ref, l2_w_ref, l2_b_ref,
    x_out_ref, e_out_ref,
    q_s, k_s, v_s, proj_s, q2_s, k2_s, o_s,
    *, head_dim, head_chunk, num_chunks, eps):
    Dh, TH, C = head_dim, head_chunk, num_chunks
    CW = TH * Dh                      # model-dim columns covered by one chunk
    D = C * CW
    scale = jnp.float32(1.0 / math.sqrt(Dh))

    p = pl.program_id(1)              # 0: attention pass, 1: edge-output pass
    c = pl.program_id(2)              # head-chunk index

    # ---------------- pass 0: first self-attention ---------------------------
    @pl.when(p == 0)
    def _attention_pass():
        @pl.when(c == 0)
        def _project_qkv():
            # norm1 + in_proj once per batch element; scatter q/k/v into
            # per-chunk scratch (static loop, static slices).
            x = _layernorm(n0_ref[0], norm1_w_ref[...], norm1_b_ref[...], eps)
            qkv = _mm(x, in_w_ref[...]) + in_b_ref[...]          # (L, 3D)
            for cc in range(C):
                lo = cc * CW
                q_s[cc] = qkv[:, lo:lo + CW]
                k_s[cc] = qkv[:, D + lo:D + lo + CW]
                v_s[cc] = qkv[:, 2 * D + lo:2 * D + lo + CW]
            proj_s[...] = jnp.zeros_like(proj_s)

        qc = q_s[c]                                              # (L, CW)
        kc = k_s[c]
        vc = v_s[c]
        for hl in range(TH):          # static unroll, bounded by chunk size
            sl = slice(hl * Dh, (hl + 1) * Dh)
            t = _mm_nt(qc[:, sl], kc[:, sl]) * scale + e0_ref[0, hl]   # (L, L)
            m = jnp.max(t, axis=-1, keepdims=True)
            pr = jnp.exp(t - m)
            inv = pl.reciprocal(jnp.sum(pr, axis=-1, keepdims=True),
                                approx=False)
            o_s[:, sl] = _mm(pr * inv, vc[:, sl])                # (L, Dh)
        # Fold out_proj once per chunk: (L, CW) @ (CW, D), accumulated in VMEM.
        proj_s[...] += _mm(o_s[...], out_w_ref[c])

    # ---------------- pass 1: finish x path, write e_out chunks --------------
    @pl.when(p == 1)
    def _edge_pass():
        @pl.when(c == 0)
        def _finish_x():
            n0 = n0_ref[0]
            y = n0 + proj_s[...] + out_b_ref[...]                # residual + attn
            y2 = _layernorm(y, mhn_w_ref[...], mhn_b_ref[...], eps)
            # Second attention: only the raw scores reach the outputs, so only
            # the Q / K(half) projections are computed.
            q2 = _mm(y2, q2_w_ref[...]) + q2_b_ref[...]
            k2 = _mm(n1_ref[0], kvk_w_ref[...]) + kvk_b_ref[...]
            for cc in range(C):
                lo = cc * CW
                q2_s[cc] = q2[:, lo:lo + CW]
                k2_s[cc] = k2[:, lo:lo + CW]
            # FFN block (the module adds the FFN to the mha_norm output y2 and
            # never re-uses the pre-norm residual; this matches the PyTorch
            # code exactly).
            z = _layernorm(y2, norm2_w_ref[...], norm2_b_ref[...], eps)
            hdn = jax.nn.gelu(_mm(z, l1_w_ref[...]) + l1_b_ref[...],
                              approximate=True)
            x_out_ref[0] = y2 + _mm(hdn, l2_w_ref[...]) + l2_b_ref[...]

        qc, kc = q_s[c], k_s[c]
        q2c, k2c = q2_s[c], k2_s[c]
        for hl in range(TH):
            sl = slice(hl * Dh, (hl + 1) * Dh)
            s1 = _mm_nt(qc[:, sl], kc[:, sl]) * scale            # sa_t (recomputed)
            s2 = _mm_nt(q2c[:, sl], k2c[:, sl]) * scale          # mha_t
            e_out_ref[0, hl] = e0_ref[0, hl] + s1 + s2           # written once


# ---------------------------------------------------------------------------
# Wrapper
# ---------------------------------------------------------------------------
def unimol_discriminator_layer(node0, edge0, node1, edge1, params, *,
                               num_heads, head_chunk=None):
    L, B, D = node0.shape
    H = num_heads
    Dh = D // H
    assert Dh * H == D
    if head_chunk is None:
        head_chunk = min(H, 8)
    TH = head_chunk
    assert H % TH == 0
    C = H // TH
    CW = TH * Dh
    del edge1  # only feeds the discarded second-attention output -> unused

    f32 = jnp.float32
    # Glue: batch-major views for per-batch blocking (tiny, done once).
    n0 = jnp.transpose(node0, (1, 0, 2)).astype(f32)             # (B, L, D)
    n1 = jnp.transpose(node1, (1, 0, 2)).astype(f32)             # (B, L, D)
    e0 = edge0.reshape(B, H, L, L).astype(f32)                   # free reshape

    # Pre-shape weights for the kernel: out_proj rows grouped by head chunk,
    # kv_proj pre-sliced to its K half (V path is dead code for the outputs).
    out_w3 = params["out_w"].astype(f32).reshape(C, CW, D)
    kvk_w = params["kv_w"].astype(f32)[:, :D]
    kvk_b = params["kv_b"].astype(f32)[:, :D]

    weights = [
        params["norm1_w"].astype(f32), params["norm1_b"].astype(f32),
        params["in_w"].astype(f32), params["in_b"].astype(f32),
        out_w3, params["out_b"].astype(f32),
        params["mhn_w"].astype(f32), params["mhn_b"].astype(f32),
        params["q2_w"].astype(f32), params["q2_b"].astype(f32),
        kvk_w, kvk_b,
        params["norm2_w"].astype(f32), params["norm2_b"].astype(f32),
        params["l1_w"].astype(f32), params["l1_b"].astype(f32),
        params["l2_w"].astype(f32), params["l2_b"].astype(f32),
    ]

    data_specs = [
        pl.BlockSpec((1, L, D), lambda b, p, c: (b, 0, 0)),        # node0 (resident per b)
        pl.BlockSpec((1, L, D), lambda b, p, c: (b, 0, 0)),        # node1 (resident per b)
        pl.BlockSpec((1, TH, L, L), lambda b, p, c: (b, c, 0, 0)), # edge0, chunk-streamed per pass
    ]
    # Grid-invariant full blocks: DMA'd once, resident across the grid.
    # TODO(synk): add pipeline_mode=pl.Buffered(1) here at production scale.
    weight_specs = [
        pl.BlockSpec(w.shape, lambda b, p, c, _n=w.ndim: (0,) * _n)
        for w in weights
    ]

    out_specs = [
        pl.BlockSpec((1, L, D), lambda b, p, c: (b, 0, 0)),            # x
        pl.BlockSpec((1, TH, L, L), lambda b, p, c: (b, p * c, 0, 0)), # e_out (written in pass 1)
    ]

    scratch_shapes = [
        pltpu.VMEM((C, L, CW), f32),   # q per chunk
        pltpu.VMEM((C, L, CW), f32),   # k per chunk
        pltpu.VMEM((C, L, CW), f32),   # v per chunk
        pltpu.VMEM((L, D), f32),       # out_proj accumulator
        pltpu.VMEM((C, L, CW), f32),   # q2 per chunk
        pltpu.VMEM((C, L, CW), f32),   # k2 per chunk
        pltpu.VMEM((L, CW), f32),      # per-chunk attention-output staging
    ]

    kernel = functools.partial(discriminator_layer_kernel,
                               head_dim=Dh, head_chunk=TH, num_chunks=C,
                               eps=1e-5)

    x_bld, e_out = pl.pallas_call(
        kernel,
        out_shape=(jax.ShapeDtypeStruct((B, L, D), f32),
                   jax.ShapeDtypeStruct((B, H, L, L), f32)),
        grid_spec=pltpu.PrefetchScalarGridSpec(
            num_scalar_prefetch=0,
            grid=(B, 2, C),
            in_specs=data_specs + weight_specs,
            out_specs=out_specs,
            scratch_shapes=scratch_shapes,
        ),
        compiler_params=pltpu.CompilerParams(
            dimension_semantics=("parallel", "arbitrary", "arbitrary"),
            vmem_limit_bytes=40 * 1024 * 1024,
        ),
    )(n0, n1, e0, *weights)

    x_out = jnp.transpose(x_bld, (1, 0, 2))                       # (L, B, D)
    edge_out = e_out.reshape(B * H, L, L)
    return x_out, edge_out


# ---------------------------------------------------------------------------
# Pure-JAX reference mirroring the PyTorch forward (eval mode, dropout=0)
# ---------------------------------------------------------------------------
def ref_forward(node0, edge0, node1, edge1, params, *, num_heads):
    L, B, D = node0.shape
    H = num_heads
    Dh = D // H
    scale = 1.0 / math.sqrt(Dh)
    eps = 1e-5

    def ln(x, w, b):
        mu = jnp.mean(x, axis=-1, keepdims=True)
        xc = x - mu
        var = jnp.mean(xc * xc, axis=-1, keepdims=True)
        return xc * jax.lax.rsqrt(var + eps) * w + b

    def lin(x, w, b):
        return jnp.einsum("lbd,de->lbe", x, w, precision=_HIGHEST) + b

    def heads(t):   # (L, B, D) -> (B*H, L, Dh), as in the torch view/transpose
        return jnp.transpose(t.reshape(L, B * H, Dh), (1, 0, 2))

    x_res = node0
    x = ln(node0, params["norm1_w"], params["norm1_b"])
    qkv = lin(x, params["in_w"], params["in_b"])
    q, k, v = qkv[..., :D], qkv[..., D:2 * D], qkv[..., 2 * D:]
    qh, kh, vh = heads(q), heads(k), heads(v)
    t = jnp.einsum("nld,nmd->nlm", qh, kh, precision=_HIGHEST) * scale
    sa_t = t
    t = t + edge0
    m = jnp.max(t, axis=-1, keepdims=True)
    p = jnp.exp(t - m)
    attn = p / jnp.sum(p, axis=-1, keepdims=True)
    ao = jnp.einsum("nlm,nmd->nld", attn, vh, precision=_HIGHEST)
    ao = jnp.transpose(ao, (1, 0, 2)).reshape(L, B, D)
    ao = lin(ao, params["out_w"], params["out_b"])
    x = x_res + ao
    x = ln(x, params["mhn_w"], params["mhn_b"])
    q = lin(x, params["q2_w"], params["q2_b"])
    kvv = lin(node1, params["kv_w"], params["kv_b"])
    k = kvv[..., :D]
    qh, kh = heads(q), heads(k)
    mha_t = jnp.einsum("nld,nmd->nlm", qh, kh, precision=_HIGHEST) * scale
    # (torch also computes softmax(mha_t + edge1) @ V and out_proj here, but the
    #  result is discarded and does not affect the returned tensors.)
    z = ln(x, params["norm2_w"], params["norm2_b"])
    hdn = jax.nn.gelu(lin(z, params["l1_w"], params["l1_b"]), approximate=True)
    ffn = jnp.einsum("lbf,fd->lbd", hdn, params["l2_w"],
                     precision=_HIGHEST) + params["l2_b"]
    x = x + ffn
    edge_out = edge0 + sa_t + mha_t
    return x, edge_out


if __name__ == "__main__":
    L, B, D, H = 8, 2, 32, 4           # length, batch, d_model, num_heads
    Dff = 4 * D
    key = jax.random.PRNGKey(0)
    ks = jax.random.split(key, 24)

    def lin_w(k, i, o):
        return 0.1 * jax.random.normal(k, (i, o), jnp.float32)

    def lin_b(k, o):
        return 0.1 * jax.random.normal(k, (1, o), jnp.float32)

    params = {
        "norm1_w": 1.0 + 0.1 * jax.random.normal(ks[0], (1, D), jnp.float32),
        "norm1_b": 0.1 * jax.random.normal(ks[1], (1, D), jnp.float32),
        "in_w": lin_w(ks[2], D, 3 * D), "in_b": lin_b(ks[3], 3 * D),
        "out_w": lin_w(ks[4], D, D), "out_b": lin_b(ks[5], D),
        "mhn_w": 1.0 + 0.1 * jax.random.normal(ks[6], (1, D), jnp.float32),
        "mhn_b": 0.1 * jax.random.normal(ks[7], (1, D), jnp.float32),
        "q2_w": lin_w(ks[8], D, D), "q2_b": lin_b(ks[9], D),
        "kv_w": lin_w(ks[10], D, 2 * D), "kv_b": lin_b(ks[11], 2 * D),
        "norm2_w": 1.0 + 0.1 * jax.random.normal(ks[12], (1, D), jnp.float32),
        "norm2_b": 0.1 * jax.random.normal(ks[13], (1, D), jnp.float32),
        "l1_w": lin_w(ks[14], D, Dff), "l1_b": lin_b(ks[15], Dff),
        "l2_w": lin_w(ks[16], Dff, D), "l2_b": lin_b(ks[17], D),
    }

    node0 = jax.random.normal(ks[18], (L, B, D), jnp.float32)
    node1 = jax.random.normal(ks[19], (L, B, D), jnp.float32)
    edge0 = 0.1 * jax.random.normal(ks[20], (B * H, L, L), jnp.float32)
    edge1 = 0.1 * jax.random.normal(ks[21], (B * H, L, L), jnp.float32)

    # head_chunk=2 -> 2 head chunks, so the chunk-streaming path is exercised
    # even at this toy shape.
    x_out, edge_out = unimol_discriminator_layer(node0, edge0, node1, edge1,
                                                 params, num_heads=H,
                                                 head_chunk=2)
    jax.block_until_ready(x_out)
    jax.block_until_ready(edge_out)

    ref_x, ref_e = ref_forward(node0, edge0, node1, edge1, params, num_heads=H)

    assert x_out.shape == (L, B, D)
    assert edge_out.shape == (B * H, L, L)
    np.testing.assert_allclose(np.asarray(x_out), np.asarray(ref_x),
                               rtol=1e-4, atol=1e-4)
    np.testing.assert_allclose(np.asarray(edge_out), np.asarray(ref_e),
                               rtol=1e-4, atol=1e-4)

    print("KERNEL_OK")
</pallas_src>

<mosaic_0001>
module attributes {stable_mosaic.version = 11 : i64} {
  func.func @discriminator_layer_kernel(%arg0: i32, %arg1: i32, %arg2: i32, %arg3: memref<1x8x32xf32, #tpu.memory_space<vmem>>, %arg4: memref<1x8x32xf32, #tpu.memory_space<vmem>>, %arg5: memref<1x2x8x8xf32, #tpu.memory_space<vmem>>, %arg6: memref<1x32xf32, #tpu.memory_space<vmem>>, %arg7: memref<1x32xf32, #tpu.memory_space<vmem>>, %arg8: memref<32x96xf32, #tpu.memory_space<vmem>>, %arg9: memref<1x96xf32, #tpu.memory_space<vmem>>, %arg10: memref<2x16x32xf32, #tpu.memory_space<vmem>>, %arg11: memref<1x32xf32, #tpu.memory_space<vmem>>, %arg12: memref<1x32xf32, #tpu.memory_space<vmem>>, %arg13: memref<1x32xf32, #tpu.memory_space<vmem>>, %arg14: memref<32x32xf32, #tpu.memory_space<vmem>>, %arg15: memref<1x32xf32, #tpu.memory_space<vmem>>, %arg16: memref<32x32xf32, #tpu.memory_space<vmem>>, %arg17: memref<1x32xf32, #tpu.memory_space<vmem>>, %arg18: memref<1x32xf32, #tpu.memory_space<vmem>>, %arg19: memref<1x32xf32, #tpu.memory_space<vmem>>, %arg20: memref<32x128xf32, #tpu.memory_space<vmem>>, %arg21: memref<1x128xf32, #tpu.memory_space<vmem>>, %arg22: memref<128x32xf32, #tpu.memory_space<vmem>>, %arg23: memref<1x32xf32, #tpu.memory_space<vmem>>, %arg24: memref<1x8x32xf32, #tpu.memory_space<vmem>>, %arg25: memref<1x2x8x8xf32, #tpu.memory_space<vmem>>, %arg26: memref<2x8x16xf32, #tpu.memory_space<vmem>>, %arg27: memref<2x8x16xf32, #tpu.memory_space<vmem>>, %arg28: memref<2x8x16xf32, #tpu.memory_space<vmem>>, %arg29: memref<8x32xf32, #tpu.memory_space<vmem>>, %arg30: memref<2x8x16xf32, #tpu.memory_space<vmem>>, %arg31: memref<2x8x16xf32, #tpu.memory_space<vmem>>, %arg32: memref<8x16xf32, #tpu.memory_space<vmem>>) attributes {dimension_semantics = [#tpu.dimension_semantics<parallel>, #tpu.dimension_semantics<arbitrary>, #tpu.dimension_semantics<arbitrary>], iteration_bounds = array<i64: 2, 2, 2>, scalar_prefetch = 0 : i64, scratch_operands = 7 : i64, tpu.core_type = #tpu.core_type<tc>, window_params = [{transform_indices = @transform_0, window_bounds = array<i64: 1, 8, 32>}, {transform_indices = @transform_1, window_bounds = array<i64: 1, 8, 32>}, {transform_indices = @transform_2, window_bounds = array<i64: 1, 2, 8, 8>}, {pipeline_mode = #tpu.pipeline_mode<synchronous>, transform_indices = @transform_3, window_bounds = array<i64: 1, 32>}, {pipeline_mode = #tpu.pipeline_mode<synchronous>, transform_indices = @transform_4, window_bounds = array<i64: 1, 32>}, {pipeline_mode = #tpu.pipeline_mode<synchronous>, transform_indices = @transform_5, window_bounds = array<i64: 32, 96>}, {pipeline_mode = #tpu.pipeline_mode<synchronous>, transform_indices = @transform_6, window_bounds = array<i64: 1, 96>}, {pipeline_mode = #tpu.pipeline_mode<synchronous>, transform_indices = @transform_7, window_bounds = array<i64: 2, 16, 32>}, {pipeline_mode = #tpu.pipeline_mode<synchronous>, transform_indices = @transform_8, window_bounds = array<i64: 1, 32>}, {pipeline_mode = #tpu.pipeline_mode<synchronous>, transform_indices = @transform_9, window_bounds = array<i64: 1, 32>}, {pipeline_mode = #tpu.pipeline_mode<synchronous>, transform_indices = @transform_10, window_bounds = array<i64: 1, 32>}, {pipeline_mode = #tpu.pipeline_mode<synchronous>, transform_indices = @transform_11, window_bounds = array<i64: 32, 32>}, {pipeline_mode = #tpu.pipeline_mode<synchronous>, transform_indices = @transform_12, window_bounds = array<i64: 1, 32>}, {pipeline_mode = #tpu.pipeline_mode<synchronous>, transform_indices = @transform_13, window_bounds = array<i64: 32, 32>}, {pipeline_mode = #tpu.pipeline_mode<synchronous>, transform_indices = @transform_14, window_bounds = array<i64: 1, 32>}, {pipeline_mode = #tpu.pipeline_mode<synchronous>, transform_indices = @transform_15, window_bounds = array<i64: 1, 32>}, {pipeline_mode = #tpu.pipeline_mode<synchronous>, transform_indices = @transform_16, window_bounds = array<i64: 1, 32>}, {pipeline_mode = #tpu.pipeline_mode<synchronous>, transform_indices = @transform_17, window_bounds = array<i64: 32, 128>}, {pipeline_mode = #tpu.pipeline_mode<synchronous>, transform_indices = @transform_18, window_bounds = array<i64: 1, 128>}, {pipeline_mode = #tpu.pipeline_mode<synchronous>, transform_indices = @transform_19, window_bounds = array<i64: 128, 32>}, {pipeline_mode = #tpu.pipeline_mode<synchronous>, transform_indices = @transform_20, window_bounds = array<i64: 1, 32>}, {transform_indices = @transform_21, window_bounds = array<i64: 1, 8, 32>}, {transform_indices = @transform_22, window_bounds = array<i64: 1, 2, 8, 8>}]} {
    %c0_i32 = arith.constant 0 : i32
    %0 = arith.cmpi eq, %arg1, %c0_i32 : i32
    %1 = arith.extui %0 : i1 to i32
    %cst = arith.constant 0.353553385 : f32
    %c0_i32_0 = arith.constant 0 : i32
    %2 = arith.cmpi ne, %1, %c0_i32_0 : i32
    scf.if %2 {
      %c0_i32_3 = arith.constant 0 : i32
      %6 = arith.cmpi eq, %arg2, %c0_i32_3 : i32
      %7 = arith.extui %6 : i1 to i32
      %c0_i32_4 = arith.constant 0 : i32
      %8 = arith.cmpi ne, %7, %c0_i32_4 : i32
      scf.if %8 {
        %c0_37 = arith.constant 0 : index
        %c0_38 = arith.constant 0 : index
        %c0_39 = arith.constant 0 : index
        %68 = vector.load %arg3[%c0_37, %c0_38, %c0_39] : memref<1x8x32xf32, #tpu.memory_space<vmem>>, vector<1x8x32xf32>
        %69 = vector.shape_cast %68 : vector<1x8x32xf32> to vector<8x32xf32>
        %c0_40 = arith.constant 0 : index
        %c0_41 = arith.constant 0 : index
        %70 = vector.load %arg6[%c0_40, %c0_41] : memref<1x32xf32, #tpu.memory_space<vmem>>, vector<1x32xf32>
        %c0_42 = arith.constant 0 : index
        %c0_43 = arith.constant 0 : index
        %71 = vector.load %arg7[%c0_42, %c0_43] : memref<1x32xf32, #tpu.memory_space<vmem>>, vector<1x32xf32>
        %cst_44 = arith.constant dense<0.000000e+00> : vector<8xf32>
        %72 = vector.multi_reduction <add>, %69, %cst_44 [1] : vector<8x32xf32> to vector<8xf32>
        %73 = vector.shape_cast %72 : vector<8xf32> to vector<8x1xf32>
        %cst_45 = arith.constant 3.200000e+01 : f32
        %74 = vector.broadcast %cst_45 : f32 to vector<8x1xf32>
        %75 = arith.divf %73, %74 : vector<8x1xf32>
        %76 = vector.broadcast %75 : vector<8x1xf32> to vector<8x32xf32>
        %77 = arith.subf %69, %76 : vector<8x32xf32>
        %78 = arith.mulf %77, %77 : vector<8x32xf32>
        %cst_46 = arith.constant dense<0.000000e+00> : vector<8xf32>
        %79 = vector.multi_reduction <add>, %78, %cst_46 [1] : vector<8x32xf32> to vector<8xf32>
        %80 = vector.shape_cast %79 : vector<8xf32> to vector<8x1xf32>
        %cst_47 = arith.constant 3.200000e+01 : f32
        %81 = vector.broadcast %cst_47 : f32 to vector<8x1xf32>
        %82 = arith.divf %80, %81 : vector<8x1xf32>
        %cst_48 = arith.constant 9.99999974E-6 : f32
        %83 = vector.broadcast %cst_48 : f32 to vector<8x1xf32>
        %84 = arith.addf %82, %83 : vector<8x1xf32>
        %85 = math.rsqrt %84 : vector<8x1xf32>
        %86 = vector.broadcast %85 : vector<8x1xf32> to vector<8x32xf32>
        %87 = arith.mulf %77, %86 : vector<8x32xf32>
        %88 = vector.broadcast %70 : vector<1x32xf32> to vector<8x32xf32>
        %89 = arith.mulf %87, %88 : vector<8x32xf32>
        %90 = vector.broadcast %71 : vector<1x32xf32> to vector<8x32xf32>
        %91 = arith.addf %89, %90 : vector<8x32xf32>
        %c0_49 = arith.constant 0 : index
        %c0_50 = arith.constant 0 : index
        %92 = vector.load %arg8[%c0_49, %c0_50] : memref<32x96xf32, #tpu.memory_space<vmem>>, vector<32x96xf32>
        %cst_51 = arith.constant dense<0.000000e+00> : vector<8x96xf32>
        %93 = tpu.matmul %91, %92, %cst_51 {dimension_numbers = #tpu.dot_dimension_numbers<[1], [0], [0], [1], [0, 0, 1, 1], [], []>, precision = #tpu.contract_precision<fp32>} : vector<8x32xf32>, vector<32x96xf32>, vector<8x96xf32> -> vector<8x96xf32>
        %c0_52 = arith.constant 0 : index
        %c0_53 = arith.constant 0 : index
        %94 = vector.load %arg9[%c0_52, %c0_53] : memref<1x96xf32, #tpu.memory_space<vmem>>, vector<1x96xf32>
        %95 = vector.broadcast %94 : vector<1x96xf32> to vector<8x96xf32>
        %96 = arith.addf %93, %95 : vector<8x96xf32>
        %97 = vector.extract_strided_slice %96 {offsets = [0, 0], sizes = [8, 16], strides = [1, 1]} : vector<8x96xf32> to vector<8x16xf32>
        %c0_54 = arith.constant 0 : index
        %c0_55 = arith.constant 0 : index
        %c0_56 = arith.constant 0 : index
        %98 = vector.load %arg26[%c0_54, %c0_55, %c0_56] : memref<2x8x16xf32, #tpu.memory_space<vmem>>, vector<1x8x16xf32>
        %99 = vector.shape_cast %98 : vector<1x8x16xf32> to vector<8x16xf32>
        %100 = vector.shape_cast %97 : vector<8x16xf32> to vector<1x8x16xf32>
        tpu.vector_store %arg26[%c0_54, %c0_55, %c0_56], %100 {strides = array<i32>} : memref<2x8x16xf32, #tpu.memory_space<vmem>>, vector<1x8x16xf32>,
        %101 = vector.extract_strided_slice %96 {offsets = [0, 32], sizes = [8, 16], strides = [1, 1]} : vector<8x96xf32> to vector<8x16xf32>
        %c0_57 = arith.constant 0 : index
        %c0_58 = arith.constant 0 : index
        %c0_59 = arith.constant 0 : index
        %102 = vector.load %arg27[%c0_57, %c0_58, %c0_59] : memref<2x8x16xf32, #tpu.memory_space<vmem>>, vector<1x8x16xf32>
        %103 = vector.shape_cast %102 : vector<1x8x16xf32> to vector<8x16xf32>
        %104 = vector.shape_cast %101 : vector<8x16xf32> to vector<1x8x16xf32>
        tpu.vector_store %arg27[%c0_57, %c0_58, %c0_59], %104 {strides = array<i32>} : memref<2x8x16xf32, #tpu.memory_space<vmem>>, vector<1x8x16xf32>,
        %105 = vector.extract_strided_slice %96 {offsets = [0, 64], sizes = [8, 16], strides = [1, 1]} : vector<8x96xf32> to vector<8x16xf32>
        %c0_60 = arith.constant 0 : index
        %c0_61 = arith.constant 0 : index
        %c0_62 = arith.constant 0 : index
        %106 = vector.load %arg28[%c0_60, %c0_61, %c0_62] : memref<2x8x16xf32, #tpu.memory_space<vmem>>, vector<1x8x16xf32>
        %107 = vector.shape_cast %106 : vector<1x8x16xf32> to vector<8x16xf32>
        %108 = vector.shape_cast %105 : vector<8x16xf32> to vector<1x8x16xf32>
        tpu.vector_store %arg28[%c0_60, %c0_61, %c0_62], %108 {strides = array<i32>} : memref<2x8x16xf32, #tpu.memory_space<vmem>>, vector<1x8x16xf32>,
        %109 = vector.extract_strided_slice %96 {offsets = [0, 16], sizes = [8, 16], strides = [1, 1]} : vector<8x96xf32> to vector<8x16xf32>
        %c1_63 = arith.constant 1 : index
        %c0_64 = arith.constant 0 : index
        %c0_65 = arith.constant 0 : index
        %110 = vector.load %arg26[%c1_63, %c0_64, %c0_65] : memref<2x8x16xf32, #tpu.memory_space<vmem>>, vector<1x8x16xf32>
        %111 = vector.shape_cast %110 : vector<1x8x16xf32> to vector<8x16xf32>
        %112 = vector.shape_cast %109 : vector<8x16xf32> to vector<1x8x16xf32>
        tpu.vector_store %arg26[%c1_63, %c0_64, %c0_65], %112 {strides = array<i32>} : memref<2x8x16xf32, #tpu.memory_space<vmem>>, vector<1x8x16xf32>,
        %113 = vector.extract_strided_slice %96 {offsets = [0, 48], sizes = [8, 16], strides = [1, 1]} : vector<8x96xf32> to vector<8x16xf32>
        %c1_66 = arith.constant 1 : index
        %c0_67 = arith.constant 0 : index
        %c0_68 = arith.constant 0 : index
        %114 = vector.load %arg27[%c1_66, %c0_67, %c0_68] : memref<2x8x16xf32, #tpu.memory_space<vmem>>, vector<1x8x16xf32>
        %115 = vector.shape_cast %114 : vector<1x8x16xf32> to vector<8x16xf32>
        %116 = vector.shape_cast %113 : vector<8x16xf32> to vector<1x8x16xf32>
        tpu.vector_store %arg27[%c1_66, %c0_67, %c0_68], %116 {strides = array<i32>} : memref<2x8x16xf32, #tpu.memory_space<vmem>>, vector<1x8x16xf32>,
        %117 = vector.extract_strided_slice %96 {offsets = [0, 80], sizes = [8, 16], strides = [1, 1]} : vector<8x96xf32> to vector<8x16xf32>
        %c1_69 = arith.constant 1 : index
        %c0_70 = arith.constant 0 : index
        %c0_71 = arith.constant 0 : index
        %118 = vector.load %arg28[%c1_69, %c0_70, %c0_71] : memref<2x8x16xf32, #tpu.memory_space<vmem>>, vector<1x8x16xf32>
        %119 = vector.shape_cast %118 : vector<1x8x16xf32> to vector<8x16xf32>
        %120 = vector.shape_cast %117 : vector<8x16xf32> to vector<1x8x16xf32>
        tpu.vector_store %arg28[%c1_69, %c0_70, %c0_71], %120 {strides = array<i32>} : memref<2x8x16xf32, #tpu.memory_space<vmem>>, vector<1x8x16xf32>,
        %cst_72 = arith.constant 0.000000e+00 : f32
        %121 = vector.broadcast %cst_72 : f32 to vector<8x32xf32>
        %c0_73 = arith.constant 0 : index
        %c0_74 = arith.constant 0 : index
        %122 = vector.load %arg29[%c0_73, %c0_74] : memref<8x32xf32, #tpu.memory_space<vmem>>, vector<8x32xf32>
        tpu.vector_store %arg29[%c0_73, %c0_74], %121 {strides = array<i32>} : memref<8x32xf32, #tpu.memory_space<vmem>>, vector<8x32xf32>,
      } else {
      }
      %9 = arith.index_cast %arg2 : i32 to index
      %c0 = arith.constant 0 : index
      %c0_5 = arith.constant 0 : index
      %10 = vector.load %arg26[%9, %c0, %c0_5] : memref<2x8x16xf32, #tpu.memory_space<vmem>>, vector<1x8x16xf32>
      %11 = vector.shape_cast %10 : vector<1x8x16xf32> to vector<8x16xf32>
      %12 = arith.index_cast %arg2 : i32 to index
      %c0_6 = arith.constant 0 : index
      %c0_7 = arith.constant 0 : index
      %13 = vector.load %arg27[%12, %c0_6, %c0_7] : memref<2x8x16xf32, #tpu.memory_space<vmem>>, vector<1x8x16xf32>
      %14 = vector.shape_cast %13 : vector<1x8x16xf32> to vector<8x16xf32>
      %15 = arith.index_cast %arg2 : i32 to index
      %c0_8 = arith.constant 0 : index
      %c0_9 = arith.constant 0 : index
      %16 = vector.load %arg28[%15, %c0_8, %c0_9] : memref<2x8x16xf32, #tpu.memory_space<vmem>>, vector<1x8x16xf32>
      %17 = vector.shape_cast %16 : vector<1x8x16xf32> to vector<8x16xf32>
      %18 = vector.extract_strided_slice %11 {offsets = [0, 0], sizes = [8, 8], strides = [1, 1]} : vector<8x16xf32> to vector<8x8xf32>
      %19 = vector.extract_strided_slice %14 {offsets = [0, 0], sizes = [8, 8], strides = [1, 1]} : vector<8x16xf32> to vector<8x8xf32>
      %cst_10 = arith.constant dense<0.000000e+00> : vector<8x8xf32>
      %20 = tpu.matmul %18, %19, %cst_10 {dimension_numbers = #tpu.dot_dimension_numbers<[1], [1], [0], [0], [0, 0, 1, 0], [], []>, precision = #tpu.contract_precision<fp32>} : vector<8x8xf32>, vector<8x8xf32>, vector<8x8xf32> -> vector<8x8xf32>
      %21 = vector.broadcast %cst : f32 to vector<8x8xf32>
      %22 = arith.mulf %20, %21 : vector<8x8xf32>
      %c0_11 = arith.constant 0 : index
      %c0_12 = arith.constant 0 : index
      %c0_13 = arith.constant 0 : index
      %c0_14 = arith.constant 0 : index
      %23 = vector.load %arg5[%c0_11, %c0_12, %c0_13, %c0_14] : memref<1x2x8x8xf32, #tpu.memory_space<vmem>>, vector<1x1x8x8xf32>
      %24 = vector.shape_cast %23 : vector<1x1x8x8xf32> to vector<8x8xf32>
      %25 = arith.addf %22, %24 : vector<8x8xf32>
      %cst_15 = arith.constant dense<0xFF800000> : vector<8xf32>
      %26 = vector.multi_reduction <maximumf>, %25, %cst_15 [1] : vector<8x8xf32> to vector<8xf32>
      %27 = vector.shape_cast %26 : vector<8xf32> to vector<8x1xf32>
      %28 = vector.broadcast %27 : vector<8x1xf32> to vector<8x8xf32>
      %29 = arith.subf %25, %28 : vector<8x8xf32>
      %30 = math.exp %29 : vector<8x8xf32>
      %cst_16 = arith.constant dense<0.000000e+00> : vector<8xf32>
      %31 = vector.multi_reduction <add>, %30, %cst_16 [1] : vector<8x8xf32> to vector<8xf32>
      %32 = vector.shape_cast %31 : vector<8xf32> to vector<8x1xf32>
      %33 = tpu.reciprocal %32 : vector<8x1xf32> -> vector<8x1xf32>
      %34 = vector.broadcast %33 : vector<8x1xf32> to vector<8x8xf32>
      %35 = arith.mulf %30, %34 : vector<8x8xf32>
      %36 = vector.extract_strided_slice %17 {offsets = [0, 0], sizes = [8, 8], strides = [1, 1]} : vector<8x16xf32> to vector<8x8xf32>
      %cst_17 = arith.constant dense<0.000000e+00> : vector<8x8xf32>
      %37 = tpu.matmul %35, %36, %cst_17 {dimension_numbers = #tpu.dot_dimension_numbers<[1], [0], [0], [1], [0, 0, 1, 1], [], []>, precision = #tpu.contract_precision<fp32>} : vector<8x8xf32>, vector<8x8xf32>, vector<8x8xf32> -> vector<8x8xf32>
      %c0_18 = arith.constant 0 : index
      %c0_19 = arith.constant 0 : index
      %38 = vector.load %arg32[%c0_18, %c0_19] : memref<8x16xf32, #tpu.memory_space<vmem>>, vector<8x8xf32>
      tpu.vector_store %arg32[%c0_18, %c0_19], %37 {strides = array<i32>} : memref<8x16xf32, #tpu.memory_space<vmem>>, vector<8x8xf32>,
      %39 = vector.extract_strided_slice %11 {offsets = [0, 8], sizes = [8, 8], strides = [1, 1]} : vector<8x16xf32> to vector<8x8xf32>
      %40 = vector.extract_strided_slice %14 {offsets = [0, 8], sizes = [8, 8], strides = [1, 1]} : vector<8x16xf32> to vector<8x8xf32>
      %cst_20 = arith.constant dense<0.000000e+00> : vector<8x8xf32>
      %41 = tpu.matmul %39, %40, %cst_20 {dimension_numbers = #tpu.dot_dimension_numbers<[1], [1], [0], [0], [0, 0, 1, 0], [], []>, precision = #tpu.contract_precision<fp32>} : vector<8x8xf32>, vector<8x8xf32>, vector<8x8xf32> -> vector<8x8xf32>
      %42 = vector.broadcast %cst : f32 to vector<8x8xf32>
      %43 = arith.mulf %41, %42 : vector<8x8xf32>
      %c0_21 = arith.constant 0 : index
      %c1 = arith.constant 1 : index
      %c0_22 = arith.constant 0 : index
      %c0_23 = arith.constant 0 : index
      %44 = vector.load %arg5[%c0_21, %c1, %c0_22, %c0_23] : memref<1x2x8x8xf32, #tpu.memory_space<vmem>>, vector<1x1x8x8xf32>
      %45 = vector.shape_cast %44 : vector<1x1x8x8xf32> to vector<8x8xf32>
      %46 = arith.addf %43, %45 : vector<8x8xf32>
      %cst_24 = arith.constant dense<0xFF800000> : vector<8xf32>
      %47 = vector.multi_reduction <maximumf>, %46, %cst_24 [1] : vector<8x8xf32> to vector<8xf32>
      %48 = vector.shape_cast %47 : vector<8xf32> to vector<8x1xf32>
      %49 = vector.broadcast %48 : vector<8x1xf32> to vector<8x8xf32>
      %50 = arith.subf %46, %49 : vector<8x8xf32>
      %51 = math.exp %50 : vector<8x8xf32>
      %cst_25 = arith.constant dense<0.000000e+00> : vector<8xf32>
      %52 = vector.multi_reduction <add>, %51, %cst_25 [1] : vector<8x8xf32> to vector<8xf32>
      %53 = vector.shape_cast %52 : vector<8xf32> to vector<8x1xf32>
      %54 = tpu.reciprocal %53 : vector<8x1xf32> -> vector<8x1xf32>
      %55 = vector.broadcast %54 : vector<8x1xf32> to vector<8x8xf32>
      %56 = arith.mulf %51, %55 : vector<8x8xf32>
      %57 = vector.extract_strided_slice %17 {offsets = [0, 8], sizes = [8, 8], strides = [1, 1]} : vector<8x16xf32> to vector<8x8xf32>
      %cst_26 = arith.constant dense<0.000000e+00> : vector<8x8xf32>
      %58 = tpu.matmul %56, %57, %cst_26 {dimension_numbers = #tpu.dot_dimension_numbers<[1], [0], [0], [1], [0, 0, 1, 1], [], []>, precision = #tpu.contract_precision<fp32>} : vector<8x8xf32>, vector<8x8xf32>, vector<8x8xf32> -> vector<8x8xf32>
      %c0_27 = arith.constant 0 : index
      %c8 = arith.constant 8 : index
      %59 = vector.load %arg32[%c0_27, %c8] : memref<8x16xf32, #tpu.memory_space<vmem>>, vector<8x8xf32>
      tpu.vector_store %arg32[%c0_27, %c8], %58 {strides = array<i32>} : memref<8x16xf32, #tpu.memory_space<vmem>>, vector<8x8xf32>,
      %c0_28 = arith.constant 0 : index
      %c0_29 = arith.constant 0 : index
      %60 = vector.load %arg29[%c0_28, %c0_29] : memref<8x32xf32, #tpu.memory_space<vmem>>, vector<8x32xf32>
      %c0_30 = arith.constant 0 : index
      %c0_31 = arith.constant 0 : index
      %61 = vector.load %arg32[%c0_30, %c0_31] : memref<8x16xf32, #tpu.memory_space<vmem>>, vector<8x16xf32>
      %62 = arith.index_cast %arg2 : i32 to index
      %c0_32 = arith.constant 0 : index
      %c0_33 = arith.constant 0 : index
      %63 = vector.load %arg10[%62, %c0_32, %c0_33] : memref<2x16x32xf32, #tpu.memory_space<vmem>>, vector<1x16x32xf32>
      %64 = vector.shape_cast %63 : vector<1x16x32xf32> to vector<16x32xf32>
      %cst_34 = arith.constant dense<0.000000e+00> : vector<8x32xf32>
      %65 = tpu.matmul %61, %64, %cst_34 {dimension_numbers = #tpu.dot_dimension_numbers<[1], [0], [0], [1], [0, 0, 1, 1], [], []>, precision = #tpu.contract_precision<fp32>} : vector<8x16xf32>, vector<16x32xf32>, vector<8x32xf32> -> vector<8x32xf32>
      %66 = arith.addf %60, %65 : vector<8x32xf32>
      %c0_35 = arith.constant 0 : index
      %c0_36 = arith.constant 0 : index
      %67 = vector.load %arg29[%c0_35, %c0_36] : memref<8x32xf32, #tpu.memory_space<vmem>>, vector<8x32xf32>
      tpu.vector_store %arg29[%c0_35, %c0_36], %66 {strides = array<i32>} : memref<8x32xf32, #tpu.memory_space<vmem>>, vector<8x32xf32>,
    } else {
    }
    %c1_i32 = arith.constant 1 : i32
    %3 = arith.cmpi eq, %arg1, %c1_i32 : i32
    %4 = arith.extui %3 : i1 to i32
    %cst_1 = arith.constant 0.353553385 : f32
    %c0_i32_2 = arith.constant 0 : i32
    %5 = arith.cmpi ne, %4, %c0_i32_2 : i32
    scf.if %5 {
      %c0_i32_3 = arith.constant 0 : i32
      %6 = arith.cmpi eq, %arg2, %c0_i32_3 : i32
      %7 = arith.extui %6 : i1 to i32
      %c0_i32_4 = arith.constant 0 : i32
      %8 = arith.cmpi ne, %7, %c0_i32_4 : i32
      scf.if %8 {
        %c0_31 = arith.constant 0 : index
        %c0_32 = arith.constant 0 : index
        %c0_33 = arith.constant 0 : index
        %55 = vector.load %arg3[%c0_31, %c0_32, %c0_33] : memref<1x8x32xf32, #tpu.memory_space<vmem>>, vector<1x8x32xf32>
        %56 = vector.shape_cast %55 : vector<1x8x32xf32> to vector<8x32xf32>
        %c0_34 = arith.constant 0 : index
        %c0_35 = arith.constant 0 : index
        %57 = vector.load %arg29[%c0_34, %c0_35] : memref<8x32xf32, #tpu.memory_space<vmem>>, vector<8x32xf32>
        %58 = arith.addf %56, %57 : vector<8x32xf32>
        %c0_36 = arith.constant 0 : index
        %c0_37 = arith.constant 0 : index
        %59 = vector.load %arg11[%c0_36, %c0_37] : memref<1x32xf32, #tpu.memory_space<vmem>>, vector<1x32xf32>
        %60 = vector.broadcast %59 : vector<1x32xf32> to vector<8x32xf32>
        %61 = arith.addf %58, %60 : vector<8x32xf32>
        %c0_38 = arith.constant 0 : index
        %c0_39 = arith.constant 0 : index
        %62 = vector.load %arg12[%c0_38, %c0_39] : memref<1x32xf32, #tpu.memory_space<vmem>>, vector<1x32xf32>
        %c0_40 = arith.constant 0 : index
        %c0_41 = arith.constant 0 : index
        %63 = vector.load %arg13[%c0_40, %c0_41] : memref<1x32xf32, #tpu.memory_space<vmem>>, vector<1x32xf32>
        %cst_42 = arith.constant dense<0.000000e+00> : vector<8xf32>
        %64 = vector.multi_reduction <add>, %61, %cst_42 [1] : vector<8x32xf32> to vector<8xf32>
        %65 = vector.shape_cast %64 : vector<8xf32> to vector<8x1xf32>
        %cst_43 = arith.constant 3.200000e+01 : f32
        %66 = vector.broadcast %cst_43 : f32 to vector<8x1xf32>
        %67 = arith.divf %65, %66 : vector<8x1xf32>
        %68 = vector.broadcast %67 : vector<8x1xf32> to vector<8x32xf32>
        %69 = arith.subf %61, %68 : vector<8x32xf32>
        %70 = arith.mulf %69, %69 : vector<8x32xf32>
        %cst_44 = arith.constant dense<0.000000e+00> : vector<8xf32>
        %71 = vector.multi_reduction <add>, %70, %cst_44 [1] : vector<8x32xf32> to vector<8xf32>
        %72 = vector.shape_cast %71 : vector<8xf32> to vector<8x1xf32>
        %cst_45 = arith.constant 3.200000e+01 : f32
        %73 = vector.broadcast %cst_45 : f32 to vector<8x1xf32>
        %74 = arith.divf %72, %73 : vector<8x1xf32>
        %cst_46 = arith.constant 9.99999974E-6 : f32
        %75 = vector.broadcast %cst_46 : f32 to vector<8x1xf32>
        %76 = arith.addf %74, %75 : vector<8x1xf32>
        %77 = math.rsqrt %76 : vector<8x1xf32>
        %78 = vector.broadcast %77 : vector<8x1xf32> to vector<8x32xf32>
        %79 = arith.mulf %69, %78 : vector<8x32xf32>
        %80 = vector.broadcast %62 : vector<1x32xf32> to vector<8x32xf32>
        %81 = arith.mulf %79, %80 : vector<8x32xf32>
        %82 = vector.broadcast %63 : vector<1x32xf32> to vector<8x32xf32>
        %83 = arith.addf %81, %82 : vector<8x32xf32>
        %c0_47 = arith.constant 0 : index
        %c0_48 = arith.constant 0 : index
        %84 = vector.load %arg14[%c0_47, %c0_48] : memref<32x32xf32, #tpu.memory_space<vmem>>, vector<32x32xf32>
        %cst_49 = arith.constant dense<0.000000e+00> : vector<8x32xf32>
        %85 = tpu.matmul %83, %84, %cst_49 {dimension_numbers = #tpu.dot_dimension_numbers<[1], [0], [0], [1], [0, 0, 1, 1], [], []>, precision = #tpu.contract_precision<fp32>} : vector<8x32xf32>, vector<32x32xf32>, vector<8x32xf32> -> vector<8x32xf32>
        %c0_50 = arith.constant 0 : index
        %c0_51 = arith.constant 0 : index
        %86 = vector.load %arg15[%c0_50, %c0_51] : memref<1x32xf32, #tpu.memory_space<vmem>>, vector<1x32xf32>
        %87 = vector.broadcast %86 : vector<1x32xf32> to vector<8x32xf32>
        %88 = arith.addf %85, %87 : vector<8x32xf32>
        %c0_52 = arith.constant 0 : index
        %c0_53 = arith.constant 0 : index
        %c0_54 = arith.constant 0 : index
        %89 = vector.load %arg4[%c0_52, %c0_53, %c0_54] : memref<1x8x32xf32, #tpu.memory_space<vmem>>, vector<1x8x32xf32>
        %90 = vector.shape_cast %89 : vector<1x8x32xf32> to vector<8x32xf32>
        %c0_55 = arith.constant 0 : index
        %c0_56 = arith.constant 0 : index
        %91 = vector.load %arg16[%c0_55, %c0_56] : memref<32x32xf32, #tpu.memory_space<vmem>>, vector<32x32xf32>
        %cst_57 = arith.constant dense<0.000000e+00> : vector<8x32xf32>
        %92 = tpu.matmul %90, %91, %cst_57 {dimension_numbers = #tpu.dot_dimension_numbers<[1], [0], [0], [1], [0, 0, 1, 1], [], []>, precision = #tpu.contract_precision<fp32>} : vector<8x32xf32>, vector<32x32xf32>, vector<8x32xf32> -> vector<8x32xf32>
        %c0_58 = arith.constant 0 : index
        %c0_59 = arith.constant 0 : index
        %93 = vector.load %arg17[%c0_58, %c0_59] : memref<1x32xf32, #tpu.memory_space<vmem>>, vector<1x32xf32>
        %94 = vector.broadcast %93 : vector<1x32xf32> to vector<8x32xf32>
        %95 = arith.addf %92, %94 : vector<8x32xf32>
        %96 = vector.extract_strided_slice %88 {offsets = [0, 0], sizes = [8, 16], strides = [1, 1]} : vector<8x32xf32> to vector<8x16xf32>
        %c0_60 = arith.constant 0 : index
        %c0_61 = arith.constant 0 : index
        %c0_62 = arith.constant 0 : index
        %97 = vector.load %arg30[%c0_60, %c0_61, %c0_62] : memref<2x8x16xf32, #tpu.memory_space<vmem>>, vector<1x8x16xf32>
        %98 = vector.shape_cast %97 : vector<1x8x16xf32> to vector<8x16xf32>
        %99 = vector.shape_cast %96 : vector<8x16xf32> to vector<1x8x16xf32>
        tpu.vector_store %arg30[%c0_60, %c0_61, %c0_62], %99 {strides = array<i32>} : memref<2x8x16xf32, #tpu.memory_space<vmem>>, vector<1x8x16xf32>,
        %100 = vector.extract_strided_slice %95 {offsets = [0, 0], sizes = [8, 16], strides = [1, 1]} : vector<8x32xf32> to vector<8x16xf32>
        %c0_63 = arith.constant 0 : index
        %c0_64 = arith.constant 0 : index
        %c0_65 = arith.constant 0 : index
        %101 = vector.load %arg31[%c0_63, %c0_64, %c0_65] : memref<2x8x16xf32, #tpu.memory_space<vmem>>, vector<1x8x16xf32>
        %102 = vector.shape_cast %101 : vector<1x8x16xf32> to vector<8x16xf32>
        %103 = vector.shape_cast %100 : vector<8x16xf32> to vector<1x8x16xf32>
        tpu.vector_store %arg31[%c0_63, %c0_64, %c0_65], %103 {strides = array<i32>} : memref<2x8x16xf32, #tpu.memory_space<vmem>>, vector<1x8x16xf32>,
        %104 = vector.extract_strided_slice %88 {offsets = [0, 16], sizes = [8, 16], strides = [1, 1]} : vector<8x32xf32> to vector<8x16xf32>
        %c1_66 = arith.constant 1 : index
        %c0_67 = arith.constant 0 : index
        %c0_68 = arith.constant 0 : index
        %105 = vector.load %arg30[%c1_66, %c0_67, %c0_68] : memref<2x8x16xf32, #tpu.memory_space<vmem>>, vector<1x8x16xf32>
        %106 = vector.shape_cast %105 : vector<1x8x16xf32> to vector<8x16xf32>
        %107 = vector.shape_cast %104 : vector<8x16xf32> to vector<1x8x16xf32>
        tpu.vector_store %arg30[%c1_66, %c0_67, %c0_68], %107 {strides = array<i32>} : memref<2x8x16xf32, #tpu.memory_space<vmem>>, vector<1x8x16xf32>,
        %108 = vector.extract_strided_slice %95 {offsets = [0, 16], sizes = [8, 16], strides = [1, 1]} : vector<8x32xf32> to vector<8x16xf32>
        %c1_69 = arith.constant 1 : index
        %c0_70 = arith.constant 0 : index
        %c0_71 = arith.constant 0 : index
        %109 = vector.load %arg31[%c1_69, %c0_70, %c0_71] : memref<2x8x16xf32, #tpu.memory_space<vmem>>, vector<1x8x16xf32>
        %110 = vector.shape_cast %109 : vector<1x8x16xf32> to vector<8x16xf32>
        %111 = vector.shape_cast %108 : vector<8x16xf32> to vector<1x8x16xf32>
        tpu.vector_store %arg31[%c1_69, %c0_70, %c0_71], %111 {strides = array<i32>} : memref<2x8x16xf32, #tpu.memory_space<vmem>>, vector<1x8x16xf32>,
        %c0_72 = arith.constant 0 : index
        %c0_73 = arith.constant 0 : index
        %112 = vector.load %arg18[%c0_72, %c0_73] : memref<1x32xf32, #tpu.memory_space<vmem>>, vector<1x32xf32>
        %c0_74 = arith.constant 0 : index
        %c0_75 = arith.constant 0 : index
        %113 = vector.load %arg19[%c0_74, %c0_75] : memref<1x32xf32, #tpu.memory_space<vmem>>, vector<1x32xf32>
        %cst_76 = arith.constant dense<0.000000e+00> : vector<8xf32>
        %114 = vector.multi_reduction <add>, %83, %cst_76 [1] : vector<8x32xf32> to vector<8xf32>
        %115 = vector.shape_cast %114 : vector<8xf32> to vector<8x1xf32>
        %cst_77 = arith.constant 3.200000e+01 : f32
        %116 = vector.broadcast %cst_77 : f32 to vector<8x1xf32>
        %117 = arith.divf %115, %116 : vector<8x1xf32>
        %118 = vector.broadcast %117 : vector<8x1xf32> to vector<8x32xf32>
        %119 = arith.subf %83, %118 : vector<8x32xf32>
        %120 = arith.mulf %119, %119 : vector<8x32xf32>
        %cst_78 = arith.constant dense<0.000000e+00> : vector<8xf32>
        %121 = vector.multi_reduction <add>, %120, %cst_78 [1] : vector<8x32xf32> to vector<8xf32>
        %122 = vector.shape_cast %121 : vector<8xf32> to vector<8x1xf32>
        %cst_79 = arith.constant 3.200000e+01 : f32
        %123 = vector.broadcast %cst_79 : f32 to vector<8x1xf32>
        %124 = arith.divf %122, %123 : vector<8x1xf32>
        %cst_80 = arith.constant 9.99999974E-6 : f32
        %125 = vector.broadcast %cst_80 : f32 to vector<8x1xf32>
        %126 = arith.addf %124, %125 : vector<8x1xf32>
        %127 = math.rsqrt %126 : vector<8x1xf32>
        %128 = vector.broadcast %127 : vector<8x1xf32> to vector<8x32xf32>
        %129 = arith.mulf %119, %128 : vector<8x32xf32>
        %130 = vector.broadcast %112 : vector<1x32xf32> to vector<8x32xf32>
        %131 = arith.mulf %129, %130 : vector<8x32xf32>
        %132 = vector.broadcast %113 : vector<1x32xf32> to vector<8x32xf32>
        %133 = arith.addf %131, %132 : vector<8x32xf32>
        %c0_81 = arith.constant 0 : index
        %c0_82 = arith.constant 0 : index
        %134 = vector.load %arg20[%c0_81, %c0_82] : memref<32x128xf32, #tpu.memory_space<vmem>>, vector<32x128xf32>
        %cst_83 = arith.constant dense<0.000000e+00> : vector<8x128xf32>
        %135 = tpu.matmul %133, %134, %cst_83 {dimension_numbers = #tpu.dot_dimension_numbers<[1], [0], [0], [1], [0, 0, 1, 1], [], []>, precision = #tpu.contract_precision<fp32>} : vector<8x32xf32>, vector<32x128xf32>, vector<8x128xf32> -> vector<8x128xf32>
        %c0_84 = arith.constant 0 : index
        %c0_85 = arith.constant 0 : index
        %136 = vector.load %arg21[%c0_84, %c0_85] : memref<1x128xf32, #tpu.memory_space<vmem>>, vector<1x128xf32>
        %137 = vector.broadcast %136 : vector<1x128xf32> to vector<8x128xf32>
        %138 = arith.addf %135, %137 : vector<8x128xf32>
        %139 = arith.mulf %138, %138 : vector<8x128xf32>
        %140 = arith.mulf %138, %139 : vector<8x128xf32>
        %cst_86 = arith.constant 4.471500e-02 : f32
        %141 = vector.broadcast %cst_86 : f32 to vector<8x128xf32>
        %142 = arith.mulf %141, %140 : vector<8x128xf32>
        %143 = arith.addf %138, %142 : vector<8x128xf32>
        %cst_87 = arith.constant 0.797884583 : f32
        %144 = vector.broadcast %cst_87 : f32 to vector<8x128xf32>
        %145 = arith.mulf %144, %143 : vector<8x128xf32>
        %146 = math.tanh %145 : vector<8x128xf32>
        %cst_88 = arith.constant 1.000000e+00 : f32
        %147 = vector.broadcast %cst_88 : f32 to vector<8x128xf32>
        %148 = arith.addf %147, %146 : vector<8x128xf32>
        %cst_89 = arith.constant 5.000000e-01 : f32
        %149 = vector.broadcast %cst_89 : f32 to vector<8x128xf32>
        %150 = arith.mulf %149, %148 : vector<8x128xf32>
        %151 = arith.mulf %138, %150 : vector<8x128xf32>
        %c0_90 = arith.constant 0 : index
        %c0_91 = arith.constant 0 : index
        %152 = vector.load %arg22[%c0_90, %c0_91] : memref<128x32xf32, #tpu.memory_space<vmem>>, vector<128x32xf32>
        %cst_92 = arith.constant dense<0.000000e+00> : vector<8x32xf32>
        %153 = tpu.matmul %151, %152, %cst_92 {dimension_numbers = #tpu.dot_dimension_numbers<[1], [0], [0], [1], [0, 0, 1, 1], [], []>, precision = #tpu.contract_precision<fp32>} : vector<8x128xf32>, vector<128x32xf32>, vector<8x32xf32> -> vector<8x32xf32>
        %154 = arith.addf %83, %153 : vector<8x32xf32>
        %c0_93 = arith.constant 0 : index
        %c0_94 = arith.constant 0 : index
        %155 = vector.load %arg23[%c0_93, %c0_94] : memref<1x32xf32, #tpu.memory_space<vmem>>, vector<1x32xf32>
        %156 = vector.broadcast %155 : vector<1x32xf32> to vector<8x32xf32>
        %157 = arith.addf %154, %156 : vector<8x32xf32>
        %c0_95 = arith.constant 0 : index
        %c0_96 = arith.constant 0 : index
        %c0_97 = arith.constant 0 : index
        %158 = vector.load %arg24[%c0_95, %c0_96, %c0_97] : memref<1x8x32xf32, #tpu.memory_space<vmem>>, vector<1x8x32xf32>
        %159 = vector.shape_cast %158 : vector<1x8x32xf32> to vector<8x32xf32>
        %160 = vector.shape_cast %157 : vector<8x32xf32> to vector<1x8x32xf32>
        tpu.vector_store %arg24[%c0_95, %c0_96, %c0_97], %160 {strides = array<i32>} : memref<1x8x32xf32, #tpu.memory_space<vmem>>, vector<1x8x32xf32>,
      } else {
      }
      %9 = arith.index_cast %arg2 : i32 to index
      %c0 = arith.constant 0 : index
      %c0_5 = arith.constant 0 : index
      %10 = vector.load %arg26[%9, %c0, %c0_5] : memref<2x8x16xf32, #tpu.memory_space<vmem>>, vector<1x8x16xf32>
      %11 = vector.shape_cast %10 : vector<1x8x16xf32> to vector<8x16xf32>
      %12 = arith.index_cast %arg2 : i32 to index
      %c0_6 = arith.constant 0 : index
      %c0_7 = arith.constant 0 : index
      %13 = vector.load %arg27[%12, %c0_6, %c0_7] : memref<2x8x16xf32, #tpu.memory_space<vmem>>, vector<1x8x16xf32>
      %14 = vector.shape_cast %13 : vector<1x8x16xf32> to vector<8x16xf32>
      %15 = arith.index_cast %arg2 : i32 to index
      %c0_8 = arith.constant 0 : index
      %c0_9 = arith.constant 0 : index
      %16 = vector.load %arg30[%15, %c0_8, %c0_9] : memref<2x8x16xf32, #tpu.memory_space<vmem>>, vector<1x8x16xf32>
      %17 = vector.shape_cast %16 : vector<1x8x16xf32> to vector<8x16xf32>
      %18 = arith.index_cast %arg2 : i32 to index
      %c0_10 = arith.constant 0 : index
      %c0_11 = arith.constant 0 : index
      %19 = vector.load %arg31[%18, %c0_10, %c0_11] : memref<2x8x16xf32, #tpu.memory_space<vmem>>, vector<1x8x16xf32>
      %20 = vector.shape_cast %19 : vector<1x8x16xf32> to vector<8x16xf32>
      %21 = vector.extract_strided_slice %11 {offsets = [0, 0], sizes = [8, 8], strides = [1, 1]} : vector<8x16xf32> to vector<8x8xf32>
      %22 = vector.extract_strided_slice %14 {offsets = [0, 0], sizes = [8, 8], strides = [1, 1]} : vector<8x16xf32> to vector<8x8xf32>
      %cst_12 = arith.constant dense<0.000000e+00> : vector<8x8xf32>
      %23 = tpu.matmul %21, %22, %cst_12 {dimension_numbers = #tpu.dot_dimension_numbers<[1], [1], [0], [0], [0, 0, 1, 0], [], []>, precision = #tpu.contract_precision<fp32>} : vector<8x8xf32>, vector<8x8xf32>, vector<8x8xf32> -> vector<8x8xf32>
      %24 = vector.broadcast %cst_1 : f32 to vector<8x8xf32>
      %25 = arith.mulf %23, %24 : vector<8x8xf32>
      %26 = vector.extract_strided_slice %17 {offsets = [0, 0], sizes = [8, 8], strides = [1, 1]} : vector<8x16xf32> to vector<8x8xf32>
      %27 = vector.extract_strided_slice %20 {offsets = [0, 0], sizes = [8, 8], strides = [1, 1]} : vector<8x16xf32> to vector<8x8xf32>
      %cst_13 = arith.constant dense<0.000000e+00> : vector<8x8xf32>
      %28 = tpu.matmul %26, %27, %cst_13 {dimension_numbers = #tpu.dot_dimension_numbers<[1], [1], [0], [0], [0, 0, 1, 0], [], []>, precision = #tpu.contract_precision<fp32>} : vector<8x8xf32>, vector<8x8xf32>, vector<8x8xf32> -> vector<8x8xf32>
      %29 = vector.broadcast %cst_1 : f32 to vector<8x8xf32>
      %30 = arith.mulf %28, %29 : vector<8x8xf32>
      %c0_14 = arith.constant 0 : index
      %c0_15 = arith.constant 0 : index
      %c0_16 = arith.constant 0 : index
      %c0_17 = arith.constant 0 : index
      %31 = vector.load %arg5[%c0_14, %c0_15, %c0_16, %c0_17] : memref<1x2x8x8xf32, #tpu.memory_space<vmem>>, vector<1x1x8x8xf32>
      %32 = vector.shape_cast %31 : vector<1x1x8x8xf32> to vector<8x8xf32>
      %33 = arith.addf %32, %25 : vector<8x8xf32>
      %34 = arith.addf %33, %30 : vector<8x8xf32>
      %c0_18 = arith.constant 0 : index
      %c0_19 = arith.constant 0 : index
      %c0_20 = arith.constant 0 : index
      %c0_21 = arith.constant 0 : index
      %35 = vector.load %arg25[%c0_18, %c0_19, %c0_20, %c0_21] : memref<1x2x8x8xf32, #tpu.memory_space<vmem>>, vector<1x1x8x8xf32>
      %36 = vector.shape_cast %35 : vector<1x1x8x8xf32> to vector<8x8xf32>
      %37 = vector.shape_cast %34 : vector<8x8xf32> to vector<1x1x8x8xf32>
      tpu.vector_store %arg25[%c0_18, %c0_19, %c0_20, %c0_21], %37 {strides = array<i32>} : memref<1x2x8x8xf32, #tpu.memory_space<vmem>>, vector<1x1x8x8xf32>,
      %38 = vector.extract_strided_slice %11 {offsets = [0, 8], sizes = [8, 8], strides = [1, 1]} : vector<8x16xf32> to vector<8x8xf32>
      %39 = vector.extract_strided_slice %14 {offsets = [0, 8], sizes = [8, 8], strides = [1, 1]} : vector<8x16xf32> to vector<8x8xf32>
      %cst_22 = arith.constant dense<0.000000e+00> : vector<8x8xf32>
      %40 = tpu.matmul %38, %39, %cst_22 {dimension_numbers = #tpu.dot_dimension_numbers<[1], [1], [0], [0], [0, 0, 1, 0], [], []>, precision = #tpu.contract_precision<fp32>} : vector<8x8xf32>, vector<8x8xf32>, vector<8x8xf32> -> vector<8x8xf32>
      %41 = vector.broadcast %cst_1 : f32 to vector<8x8xf32>
      %42 = arith.mulf %40, %41 : vector<8x8xf32>
      %43 = vector.extract_strided_slice %17 {offsets = [0, 8], sizes = [8, 8], strides = [1, 1]} : vector<8x16xf32> to vector<8x8xf32>
      %44 = vector.extract_strided_slice %20 {offsets = [0, 8], sizes = [8, 8], strides = [1, 1]} : vector<8x16xf32> to vector<8x8xf32>
      %cst_23 = arith.constant dense<0.000000e+00> : vector<8x8xf32>
      %45 = tpu.matmul %43, %44, %cst_23 {dimension_numbers = #tpu.dot_dimension_numbers<[1], [1], [0], [0], [0, 0, 1, 0], [], []>, precision = #tpu.contract_precision<fp32>} : vector<8x8xf32>, vector<8x8xf32>, vector<8x8xf32> -> vector<8x8xf32>
      %46 = vector.broadcast %cst_1 : f32 to vector<8x8xf32>
      %47 = arith.mulf %45, %46 : vector<8x8xf32>
      %c0_24 = arith.constant 0 : index
      %c1 = arith.constant 1 : index
      %c0_25 = arith.constant 0 : index
      %c0_26 = arith.constant 0 : index
      %48 = vector.load %arg5[%c0_24, %c1, %c0_25, %c0_26] : memref<1x2x8x8xf32, #tpu.memory_space<vmem>>, vector<1x1x8x8xf32>
      %49 = vector.shape_cast %48 : vector<1x1x8x8xf32> to vector<8x8xf32>
      %50 = arith.addf %49, %42 : vector<8x8xf32>
      %51 = arith.addf %50, %47 : vector<8x8xf32>
      %c0_27 = arith.constant 0 : index
      %c1_28 = arith.constant 1 : index
      %c0_29 = arith.constant 0 : index
      %c0_30 = arith.constant 0 : index
      %52 = vector.load %arg25[%c0_27, %c1_28, %c0_29, %c0_30] : memref<1x2x8x8xf32, #tpu.memory_space<vmem>>, vector<1x1x8x8xf32>
      %53 = vector.shape_cast %52 : vector<1x1x8x8xf32> to vector<8x8xf32>
      %54 = vector.shape_cast %51 : vector<8x8xf32> to vector<1x1x8x8xf32>
      tpu.vector_store %arg25[%c0_27, %c1_28, %c0_29, %c0_30], %54 {strides = array<i32>} : memref<1x2x8x8xf32, #tpu.memory_space<vmem>>, vector<1x1x8x8xf32>,
    } else {
    }
    return
  }
  func.func @transform_0(%arg0: i32, %arg1: i32, %arg2: i32) -> (i32, i32, i32) {
    %c0_i32 = arith.constant 0 : i32
    %c0_i32_0 = arith.constant 0 : i32
    %c0_i32_1 = arith.constant 0 : i32
    return %arg0, %c0_i32, %c0_i32_0 : i32, i32, i32
  }
  func.func @transform_1(%arg0: i32, %arg1: i32, %arg2: i32) -> (i32, i32, i32) {
    %c0_i32 = arith.constant 0 : i32
    %c0_i32_0 = arith.constant 0 : i32
    %c0_i32_1 = arith.constant 0 : i32
    return %arg0, %c0_i32, %c0_i32_0 : i32, i32, i32
  }
  func.func @transform_2(%arg0: i32, %arg1: i32, %arg2: i32) -> (i32, i32, i32, i32) {
    %c0_i32 = arith.constant 0 : i32
    %c0_i32_0 = arith.constant 0 : i32
    %c0_i32_1 = arith.constant 0 : i32
    return %arg0, %arg2, %c0_i32, %c0_i32_0 : i32, i32, i32, i32
  }
  func.func @transform_3(%arg0: i32, %arg1: i32, %arg2: i32) -> (i32, i32) {
    %c0_i32 = arith.constant 0 : i32
    %c0_i32_0 = arith.constant 0 : i32
    %c0_i32_1 = arith.constant 0 : i32
    return %c0_i32, %c0_i32_0 : i32, i32
  }
  func.func @transform_4(%arg0: i32, %arg1: i32, %arg2: i32) -> (i32, i32) {
    %c0_i32 = arith.constant 0 : i32
    %c0_i32_0 = arith.constant 0 : i32
    %c0_i32_1 = arith.constant 0 : i32
    return %c0_i32, %c0_i32_0 : i32, i32
  }
  func.func @transform_5(%arg0: i32, %arg1: i32, %arg2: i32) -> (i32, i32) {
    %c0_i32 = arith.constant 0 : i32
    %c0_i32_0 = arith.constant 0 : i32
    %c0_i32_1 = arith.constant 0 : i32
    return %c0_i32, %c0_i32_0 : i32, i32
  }
  func.func @transform_6(%arg0: i32, %arg1: i32, %arg2: i32) -> (i32, i32) {
    %c0_i32 = arith.constant 0 : i32
    %c0_i32_0 = arith.constant 0 : i32
    %c0_i32_1 = arith.constant 0 : i32
    return %c0_i32, %c0_i32_0 : i32, i32
  }
  func.func @transform_7(%arg0: i32, %arg1: i32, %arg2: i32) -> (i32, i32, i32) {
    %c0_i32 = arith.constant 0 : i32
    %c0_i32_0 = arith.constant 0 : i32
    %c0_i32_1 = arith.constant 0 : i32
    %c0_i32_2 = arith.constant 0 : i32
    return %c0_i32, %c0_i32_0, %c0_i32_1 : i32, i32, i32
  }
  func.func @transform_8(%arg0: i32, %arg1: i32, %arg2: i32) -> (i32, i32) {
    %c0_i32 = arith.constant 0 : i32
    %c0_i32_0 = arith.constant 0 : i32
    %c0_i32_1 = arith.constant 0 : i32
    return %c0_i32, %c0_i32_0 : i32, i32
  }
  func.func @transform_9(%arg0: i32, %arg1: i32, %arg2: i32) -> (i32, i32) {
    %c0_i32 = arith.constant 0 : i32
    %c0_i32_0 = arith.constant 0 : i32
    %c0_i32_1 = arith.constant 0 : i32
    return %c0_i32, %c0_i32_0 : i32, i32
  }
  func.func @transform_10(%arg0: i32, %arg1: i32, %arg2: i32) -> (i32, i32) {
    %c0_i32 = arith.constant 0 : i32
    %c0_i32_0 = arith.constant 0 : i32
    %c0_i32_1 = arith.constant 0 : i32
    return %c0_i32, %c0_i32_0 : i32, i32
  }
  func.func @transform_11(%arg0: i32, %arg1: i32, %arg2: i32) -> (i32, i32) {
    %c0_i32 = arith.constant 0 : i32
    %c0_i32_0 = arith.constant 0 : i32
    %c0_i32_1 = arith.constant 0 : i32
    return %c0_i32, %c0_i32_0 : i32, i32
  }
  func.func @transform_12(%arg0: i32, %arg1: i32, %arg2: i32) -> (i32, i32) {
    %c0_i32 = arith.constant 0 : i32
    %c0_i32_0 = arith.constant 0 : i32
    %c0_i32_1 = arith.constant 0 : i32
    return %c0_i32, %c0_i32_0 : i32, i32
  }
  func.func @transform_13(%arg0: i32, %arg1: i32, %arg2: i32) -> (i32, i32) {
    %c0_i32 = arith.constant 0 : i32
    %c0_i32_0 = arith.constant 0 : i32
    %c0_i32_1 = arith.constant 0 : i32
    return %c0_i32, %c0_i32_0 : i32, i32
  }
  func.func @transform_14(%arg0: i32, %arg1: i32, %arg2: i32) -> (i32, i32) {
    %c0_i32 = arith.constant 0 : i32
    %c0_i32_0 = arith.constant 0 : i32
    %c0_i32_1 = arith.constant 0 : i32
    return %c0_i32, %c0_i32_0 : i32, i32
  }
  func.func @transform_15(%arg0: i32, %arg1: i32, %arg2: i32) -> (i32, i32) {
    %c0_i32 = arith.constant 0 : i32
    %c0_i32_0 = arith.constant 0 : i32
    %c0_i32_1 = arith.constant 0 : i32
    return %c0_i32, %c0_i32_0 : i32, i32
  }
  func.func @transform_16(%arg0: i32, %arg1: i32, %arg2: i32) -> (i32, i32) {
    %c0_i32 = arith.constant 0 : i32
    %c0_i32_0 = arith.constant 0 : i32
    %c0_i32_1 = arith.constant 0 : i32
    return %c0_i32, %c0_i32_0 : i32, i32
  }
  func.func @transform_17(%arg0: i32, %arg1: i32, %arg2: i32) -> (i32, i32) {
    %c0_i32 = arith.constant 0 : i32
    %c0_i32_0 = arith.constant 0 : i32
    %c0_i32_1 = arith.constant 0 : i32
    return %c0_i32, %c0_i32_0 : i32, i32
  }
  func.func @transform_18(%arg0: i32, %arg1: i32, %arg2: i32) -> (i32, i32) {
    %c0_i32 = arith.constant 0 : i32
    %c0_i32_0 = arith.constant 0 : i32
    %c0_i32_1 = arith.constant 0 : i32
    return %c0_i32, %c0_i32_0 : i32, i32
  }
  func.func @transform_19(%arg0: i32, %arg1: i32, %arg2: i32) -> (i32, i32) {
    %c0_i32 = arith.constant 0 : i32
    %c0_i32_0 = arith.constant 0 : i32
    %c0_i32_1 = arith.constant 0 : i32
    return %c0_i32, %c0_i32_0 : i32, i32
  }
  func.func @transform_20(%arg0: i32, %arg1: i32, %arg2: i32) -> (i32, i32) {
    %c0_i32 = arith.constant 0 : i32
    %c0_i32_0 = arith.constant 0 : i32
    %c0_i32_1 = arith.constant 0 : i32
    return %c0_i32, %c0_i32_0 : i32, i32
  }
  func.func @transform_21(%arg0: i32, %arg1: i32, %arg2: i32) -> (i32, i32, i32) {
    %c0_i32 = arith.constant 0 : i32
    %c0_i32_0 = arith.constant 0 : i32
    %c0_i32_1 = arith.constant 0 : i32
    return %arg0, %c0_i32, %c0_i32_0 : i32, i32, i32
  }
  func.func @transform_22(%arg0: i32, %arg1: i32, %arg2: i32) -> (i32, i32, i32, i32) {
    %0 = arith.muli %arg1, %arg2 : i32
    %c0_i32 = arith.constant 0 : i32
    %c0_i32_0 = arith.constant 0 : i32
    %c0_i32_1 = arith.constant 0 : i32
    return %arg0, %0, %c0_i32, %c0_i32_0 : i32, i32, i32, i32
  }
}

</mosaic_0001>

<bundles_post_ra>
// kernel: tpu_custom_call.1
= control target key start
LH: loop header
LB: loop body
LE: loop exit
PB: predicated region body
PF: predicated region fallthrough
CT: control target
= control target key end

     0   :  { %s11948_s0 = inlined_call_operand.hbm [shape: f32[2,8,32], index: 0, kind: input, shape index: {}]   ;;  %s11949_s1 = inlined_call_operand.hbm [shape: f32[2,8,32], index: 1, kind: input, shape index: {}]   ;;  %s11950_s2 = inlined_call_operand.vmem [shape: f32[2,4,8,8], index: 2, kind: input, shape index: {}]   ;;  %s11951_s3 = inlined_call_operand.vmem [shape: f32[1,32], index: 3, kind: input, shape index: {}]   ;;  %s11952_s4 = inlined_call_operand.vmem [shape: f32[1,32], index: 4, kind: input, shape index: {}]   ;;  %s11953_s5 = inlined_call_operand.vmem [shape: f32[32,96], index: 5, kind: input, shape index: {}]   ;;  %s11954_s6 = inlined_call_operand.hbm [shape: f32[1,96], index: 6, kind: input, shape index: {}]   ;;  %s11955_s7 = inlined_call_operand.vmem [shape: f32[2,16,32], index: 7, kind: input, shape index: {}]   ;;  %s11956_s8 = inlined_call_operand.hbm [shape: f32[1,32], index: 8, kind: input, shape index: {}]   ;;  %s11957_s9 = inlined_call_operand.hbm [shape: f32[1,32], index: 9, kind: input, shape index: {}]   ;;  %s11958_s10 = inlined_call_operand.hbm [shape: f32[1,32], index: 10, kind: input, shape index: {}]   ;;  %s11959_s11 = inlined_call_operand.vmem [shape: f32[32,32], index: 11, kind: input, shape index: {}]   ;;  %s11960_s12 = inlined_call_operand.hbm [shape: f32[1,32], index: 12, kind: input, shape index: {}]   ;;  %s11961_s13 = inlined_call_operand.hbm [shape: f32[32,32], index: 13, kind: input, shape index: {}]   ;;  %s11962_s14 = inlined_call_operand.hbm [shape: f32[1,32], index: 14, kind: input, shape index: {}]   ;;  %s11963_s15 = inlined_call_operand.hbm [shape: f32[1,32], index: 15, kind: input, shape index: {}]   ;;  %s11964_s16 = inlined_call_operand.hbm [shape: f32[1,32], index: 16, kind: input, shape index: {}]   ;;  %s11965_s17 = inlined_call_operand.hbm [shape: f32[32,128], index: 17, kind: input, shape index: {}]   ;;  %s11966_s18 = inlined_call_operand.hbm [shape: f32[1,128], index: 18, kind: input, shape index: {}]   ;;  %s11967_s19 = inlined_call_operand.vmem [shape: f32[128,32], index: 19, kind: input, shape index: {}]   ;;  %s11968_s20 = inlined_call_operand.vmem [shape: f32[1,32], index: 20, kind: input, shape index: {}]   ;;  %s11969_s21 = inlined_call_operand.hbm [shape: f32[2,8,32], index: 21, kind: output, shape index: {0}]   ;;  %s11970_s22 = inlined_call_operand.hbm [shape: f32[2,4,8,8], index: 22, kind: output, shape index: {1}]  }
   0x1   :  { %12005 = sst [smem:[#allocation55_spill]] %s11948_s0 }
   0x2   :  { %12006 = sst [smem:[#allocation56_spill]] %s11949_s1 }
   0x3   :  { %12007 = sst [smem:[#allocation57_spill]] %s11950_s2 }
   0x4   :  { %12008 = sst [smem:[#allocation58_spill]] %s11951_s3 }
   0x5   :  { %12009 = sst [smem:[#allocation59_spill]] %s11952_s4 }
   0x6   :  { %12010 = sst [smem:[#allocation60_spill]] %s11953_s5 }
   0x7   :  { %12011 = sst [smem:[#allocation61_spill]] %s11954_s6 }
   0x8   :  { %12012 = sst [smem:[#allocation62_spill]] %s11955_s7 }
   0x9   :  { %12013 = sst [smem:[#allocation63_spill]] %s11956_s8 }
   0xa   :  { %12014 = sst [smem:[#allocation64_spill]] %s11957_s9 }
   0xb   :  { %12015 = sst [smem:[#allocation65_spill]] %s11958_s10 }
   0xc   :  { %12016 = sst [smem:[#allocation66_spill]] %s11959_s11 }
   0xd   :  { %12017 = sst [smem:[#allocation67_spill]] %s11960_s12 }
   0xe   :  { %12018 = sst [smem:[#allocation68_spill]] %s11961_s13 }
   0xf   :  { %12019 = sst [smem:[#allocation69_spill]] %s11962_s14 }
  0x10   :  { %12020 = sst [smem:[#allocation70_spill]] %s11963_s15 }
  0x11   :  { %12021 = sst [smem:[#allocation71_spill]] %s11964_s16 }
  0x12   :  { %12022 = sst [smem:[#allocation72_spill]] %s11965_s17 }
  0x13   :  { %12023 = sst [smem:[#allocation73_spill]] %s11966_s18 }
  0x14   :  { %12024 = sst [smem:[#allocation74_spill]] %s11967_s19 }
  0x15   :  { %12025 = sst [smem:[#allocation75_spill]] %s11968_s20 }
  0x16   :  { %12026 = sst [smem:[#allocation76_spill]] %s11969_s21 }
  0x17   :  { %12027 = sst [smem:[#allocation77_spill]] %s11970_s22 }
  0x18   :  { %28 = vsyncpa [#allocation10], 0 }
  0x19   :  { %30 = vsyncpa [#allocation10 + $0x1], 0 }
  0x1a   :  { %31 = vsyncpa [#allocation13], 0 }
  0x1b   :  { %33 = vsyncpa [#allocation13 + $0x1], 0 }
  0x1c   :  { %34 = vsyncpa [#allocation16], 0 }
  0x1d   :  { %35 = vsyncpa [#allocation19], 0 }
  0x1e   :  { %36 = vsyncpa [#allocation22], 0 }
  0x1f   :  { %37 = vsyncpa [#allocation25], 0 }
  0x20   :  { %38 = vsyncpa [#allocation28], 0 }
  0x21   :  { %39 = vsyncpa [#allocation11], 0 }
  0x22   :  { %41 = vsyncpa [#allocation11 + $0x1], 0 }
  0x23   :  { %42 = vsyncpa [#allocation32], 0 }
  0x24   :  { %44 = vsyncpa [#allocation32 + $0x1], 0  ;;  %s10389_s3 = smov 0   ;;  %s10391_s28 = smov 0  }
  0x25   :  { %s10393_s29 = smov 0   ;;  %s10395_s30 = smov 0  }
  0x26   :  { %s10397_s4 = smov 0   ;;  %s10399_s0 = smov 0  }
  0x27   :  { %s10401_s23 = smov 0   ;;  %s10403_s1 = smov 0  }
  0x28   :  { %s10405_s5 = smov 0   ;;  %s10407_s24 = smov 0  }
  0x29   :  { %s10409_s6 = smov 0   ;;  %s10411_s25 = smov 0  }
  0x2a   :  { %s10413_s26 = smov 0  }
  0x2b LB: > { %12028 = sst [smem:[#allocation43_spill]] %s10188_s3  ;;  %s10455_s2 = sadd.s32 4294967295, %s10236_s26   ;;  %s10236_s26 = sphi %s10413_s26, %s50_s26   ;;  %s10232_s25 = sphi %s10411_s25, %s12129_s25   ;;  %s10228_s6 = sphi %s10409_s6, %s12128_s6   ;;  %s10224_s24 = sphi %s10407_s24, %s12127_s24   ;;  %s10220_s5 = sphi %s10405_s5, %s12126_s5   ;;  %s10216_s1 = sphi %s10403_s1, %s12125_s1   ;;  %s10212_s23 = sphi %s10401_s23, %s12124_s23   ;;  %s10208_s0 = sphi %s10399_s0, %s12134_s0   ;;  %s10204_s4 = sphi %s10397_s4, %s12133_s4   ;;  %s10200_s30 = sphi %s10395_s30, %s12132_s30   ;;  %s10196_s29 = sphi %s10393_s29, %s12131_s29   ;;  %s10192_s28 = sphi %s10391_s28, %s12130_s28   ;;  %s10188_s3 = sphi %s10389_s3, %s12123_s3  }
  0x2c   : > { %12029 = sst [smem:[#allocation44_spill]] %s10192_s28  ;;  %p8266_p0 = scmp.ge.s32.totalorder %s10236_s26, 1 }
  0x2d   : > { %12030 = sst [smem:[#allocation45_spill]] %s10212_s23  ;;  %p11982_p1 = scmp.eq.s32.totalorder %s10455_s2, 0 }
  0x2e   : > { %12031 = sst [smem:[#allocation46_spill]] %s10216_s1  ;;  %p588_p2 = scmp.lt.s32.totalorder %s10236_s26, 9 }
  0x2f   : > { %12032 = sst [smem:[#allocation47_spill]] %s10220_s5  ;;  %s10238_s22 = smov [#allocation14]  }
  0x30   : > { %12033 = sst [smem:[#allocation48_spill]] %s10224_s24  ;;  %p10460_p3 = pnand %p8266_p0, %p588_p2 }
  0x31   : > { %12034 = sst [smem:[#allocation49_spill]] %s10228_s6  ;;  %s610_s21 = sshll.u32 %s10238_s22, 4  ;;  %s611_s21 = int_to_ptr.vmem [resolvable:$true] %s610_s21 }
  0x32   : > { %12035 = sst [smem:[#allocation50_spill]] %s10232_s25  ;;  %p9476_p4 = pneg %p10460_p3 }
  0x33   : > { %s12036_s27 = scalar_select %p10460_p3, 1, 0 }
  0x34   : > { %s10239_s20 = smov [#allocation15]   ;;  %p10468_p5 = pnand %p9476_p4, %p11982_p1 }
  0x35   : > { %12037 = sst [smem:[#allocation51_spill]] %s12036_s27  ;;  %s624_s19 = sshll.u32 %s10239_s20, 4  ;;  %s625_s19 = int_to_ptr.vmem [resolvable:$true] %s624_s19 }
  0x36   : > { %s10240_s7 = smov [#allocation18]   ;;  %p10476_p6 = pneg %p10468_p5 }
  0x37   : > { %s646_s1 = sshll.u32 %s10240_s7, 4  ;;  %s9711_s22 = scalar_lea.vmem %s611_s21, 16  ;;  %s10472_s1 = int_to_ptr.vmem [resolvable:$true] %s646_s1 }
  0x38   : > { %p9712_p7 = scmp.ne.s32.totalorder %s611_s21, %s9711_s22  ;;  %s9718_s20 = scalar_lea.vmem %s611_s21, 32 }
  0x39   : > { %p9719_p10 = scmp.lt.s32.totalorder %s611_s21, %s611_s21  ;;  %p9720_p11 = scmp.lt.s32.totalorder %s9718_s20, %s9711_s22 }
  0x3a   : > { %p9714_p8 = pnand %p9712_p7, %p10476_p6 }
  0x3b   : > { %p9721_p12 = por %p9720_p11, %p9719_p10 }
  0x3c   : > { %p9715_p9 = pneg %p9714_p8 }
  0x3e   : > { %p9722_p13 = pnand %p9721_p12, %p9715_p9 }
  0x40   : > { %9725 = shalt.err (!%p9722_p13)
}
  0x41   : > { %s12040_s27 = sld [smem:[#allocation61_spill]]  ;;  %s9737_s3 = scalar_lea.vmem %s625_s19, 16 }
  0x42   : > { %p9738_p0 = scmp.ne.s32.totalorder %s625_s19, %s9737_s3  ;;  %s9744_s28 = scalar_lea.vmem %s625_s19, 32 }
  0x43   : > { %p9745_p7 = scmp.lt.s32.totalorder %s625_s19, %s625_s19  ;;  %p9746_p8 = scmp.lt.s32.totalorder %s9744_s28, %s9737_s3 }
  0x44   : > { %p9740_p2 = pnand %p9738_p0, %p10476_p6 }
  0x45   : > { %p9747_p1 = por %p9746_p8, %p9745_p7 }
  0x46   : > { %p9741_p4 = pneg %p9740_p2 }
  0x47   : > { %9479 = dma.hbm_to_vmem [thread:$0]  (!%p10468_p5), %s12040_s27, 16, %s611_s21, [#allocation13]  }
  0x48   : > { %p9748_p3 = pnand %p9747_p1, %p9741_p4 }
  0x4a   : > { %9751 = shalt.err (!%p9748_p3)
}
  0x4b   : > { %s12041_s8 = sld [smem:[#allocation63_spill]]  ;;  %s9763_s21 = scalar_lea.vmem %s10472_s1, 16 }
  0x4c   : > { %p9764_p9 = scmp.ne.s32.totalorder %s10472_s1, %s9763_s21  ;;  %s9770_s3 = scalar_lea.vmem %s10472_s1, 32 }
  0x4d   : > { %p9771_p1 = scmp.lt.s32.totalorder %s10472_s1, %s10472_s1  ;;  %p9772_p3 = scmp.lt.s32.totalorder %s9770_s3, %s9763_s21 }
  0x4e   : > { %p9766_p10 = pnand %p9764_p9, %p10476_p6 }
  0x4f   : > { %p9773_p12 = por %p9772_p3, %p9771_p1 }
  0x50   : > { %p9767_p11 = pneg %p9766_p10 }
  0x51   : > { %9482 = dma.hbm_to_vmem [thread:$0]  (!%p10468_p5), %s12041_s8, 16, %s625_s19, [#allocation16]  }
  0x52   : > { %p9774_p13 = pnand %p9773_p12, %p9767_p11 }
  0x54   : > { %9777 = shalt.err (!%p9774_p13)
}
  0x55   : > { %s12042_s10 = sld [smem:[#allocation65_spill]]  ;;  %s10241_s19 = smov [#allocation21]  }
  0x56   : > { %s670_s27 = sshll.u32 %s10241_s19, 4  ;;  %s671_s27 = int_to_ptr.vmem [resolvable:$true] %s670_s27 }
  0x57   : > { %s9789_s7 = scalar_lea.vmem %s671_s27, 512  ;;  %p9797_p7 = scmp.lt.s32.totalorder %s671_s27, %s671_s27 }
  0x58   : > { %p9790_p0 = scmp.ne.s32.totalorder %s671_s27, %s9789_s7  ;;  %p9798_p8 = scmp.lt.s32.totalorder %s9789_s7, %s9789_s7 }
  0x5a   : > { %p9792_p2 = pnand %p9790_p0, %p10476_p6  ;;  %p9799_p9 = por %p9798_p8, %p9797_p7 }
  0x5b   : > { %9488 = dma.hbm_to_vmem [thread:$0]  (!%p10468_p5), %s12042_s10, 16, %s10472_s1, [#allocation19]  }
  0x5c   : > { %p9793_p4 = pneg %p9792_p2 }
  0x5e   : > { %p9800_p10 = pnand %p9799_p9, %p9793_p4 }
  0x60   : > { %9803 = shalt.err (!%p9800_p10)
}
  0x61   : > { %s10242_s22 = smov 128   ;;  %s10243_s20 = smov 8  }
  0x62   : > { %s12043_s13 = sld [smem:[#allocation68_spill]]  ;;  %s10244_s3 = smov [#allocation24]  }
  0x63   : > { %s695_s28 = sshll.u32 %s10244_s3, 4  ;;  %s10245_s23 = smov [#allocation27]   ;;  %s696_s28 = int_to_ptr.vmem [resolvable:$true] %s695_s28 }
  0x64   : > { %s716_s19 = sshll.u32 %s10245_s23, 4  ;;  %s9815_s7 = scalar_lea.vmem %s696_s28, 16  ;;  %s717_s19 = int_to_ptr.vmem [resolvable:$true] %s716_s19 }
  0x65   : > { %p9816_p11 = scmp.ne.s32.totalorder %s696_s28, %s9815_s7  ;;  %s9822_s8 = scalar_lea.vmem %s696_s28, 32 }
  0x66   : > { %p9823_p12 = scmp.lt.s32.totalorder %s696_s28, %s696_s28  ;;  %p9824_p13 = scmp.lt.s32.totalorder %s9822_s8, %s9815_s7 }
  0x67   : > { %p9818_p1 = pnand %p9816_p11, %p10476_p6 }
  0x68   : > { %9494 = dma.hbm_to_vmem [thread:$0]  (!%p10468_p5), %s12043_s13, 512, %s671_s27, [#allocation22], %s10242_s22, %s10242_s22, %s10243_s20  }
  0x69   : > { %p9819_p3 = pneg %p9818_p1  ;;  %p9825_p0 = por %p9824_p13, %p9823_p12 }
  0x6b   : > { %p9826_p2 = pnand %p9825_p0, %p9819_p3 }
  0x6d   : > { %9829 = shalt.err (!%p9826_p2)
}
  0x6e   : > { %s12044_s15 = sld [smem:[#allocation70_spill]]  ;;  %s9841_s21 = scalar_lea.vmem %s717_s19, 512 }
  0x6f   : > { %p9842_p4 = scmp.ne.s32.totalorder %s717_s19, %s9841_s21  ;;  %p9849_p9 = scmp.lt.s32.totalorder %s717_s19, %s717_s19 }
  0x70   : > { %p9850_p10 = scmp.lt.s32.totalorder %s9841_s21, %s9841_s21 }
  0x71   : > { %p9844_p7 = pnand %p9842_p4, %p10476_p6 }
  0x72   : > { %p9851_p11 = por %p9850_p10, %p9849_p9 }
  0x73   : > { %p9845_p8 = pneg %p9844_p7 }
  0x74   : > { %9500 = dma.hbm_to_vmem [thread:$0]  (!%p10468_p5), %s12044_s15, 16, %s696_s28, [#allocation25]  }
  0x75   : > { %p9852_p1 = pnand %p9851_p11, %p9845_p8 }
  0x77   : > { %9855 = shalt.err (!%p9852_p1)
}
  0x78   : > { %s12045_s17 = sld [smem:[#allocation72_spill]]  ;;  %s10246_s28 = smov [#allocation17]  }
  0x79   : > { %s635_s23 = sshll.u32 %s10246_s28, 4  ;;  %s10247_s7 = smov [#allocation20]   ;;  %s636_s23 = int_to_ptr.vmem [resolvable:$true] %s635_s23 }
  0x7a   : > { %s660_s27 = sshll.u32 %s10247_s7, 4  ;;  %s9867_s1 = scalar_lea.vmem %s636_s23, 16  ;;  %s661_s27 = int_to_ptr.vmem [resolvable:$true] %s660_s27 }
  0x7b   : > { %p9868_p3 = scmp.ne.s32.totalorder %s636_s23, %s9867_s1  ;;  %s9874_s21 = scalar_lea.vmem %s636_s23, 32 }
  0x7c   : > { %p9875_p0 = scmp.lt.s32.totalorder %s636_s23, %s636_s23  ;;  %p9876_p2 = scmp.lt.s32.totalorder %s9874_s21, %s9867_s1 }
  0x7d   : > { %p9870_p12 = pnand %p9868_p3, %p10476_p6 }
  0x7e   : > { %9506 = dma.hbm_to_vmem [thread:$0]  (!%p10468_p5), %s12045_s17, 512, %s717_s19, [#allocation28], %s10242_s22, %s10242_s22, %s10243_s20  }
  0x7f   : > { %p9871_p13 = pneg %p9870_p12  ;;  %p9877_p4 = por %p9876_p2, %p9875_p0 }
  0x81   : > { %p9878_p7 = pnand %p9877_p4, %p9871_p13 }
  0x83   : > { %9881 = shalt.err (!%p9878_p7)
}
  0x84   : > { %s12046_s9 = sld [smem:[#allocation64_spill]]  ;;  %s9893_s19 = scalar_lea.vmem %s661_s27, 16 }
  0x85   : > { %p9894_p8 = scmp.ne.s32.totalorder %s661_s27, %s9893_s19  ;;  %s9900_s8 = scalar_lea.vmem %s661_s27, 32 }
  0x86   : > { %p9901_p11 = scmp.lt.s32.totalorder %s661_s27, %s661_s27  ;;  %p9902_p1 = scmp.lt.s32.totalorder %s9900_s8, %s9893_s19 }
  0x87   : > { %p9896_p9 = pnand %p9894_p8, %p10476_p6 }
  0x88   : > { %p9903_p3 = por %p9902_p1, %p9901_p11 }
  0x89   : > { %p9897_p10 = pneg %p9896_p9 }
  0x8a   : > { %9485 = dma.hbm_to_vmem [thread:$0]  (!%p10468_p5), %s12046_s9, 16, %s636_s23, [#allocation16]  }
  0x8b   : > { %p9904_p12 = pnand %p9903_p3, %p9897_p10 }
  0x8d   : > { %9907 = shalt.err (!%p9904_p12)
}
  0x8e   : > { %s12047_s12 = sld [smem:[#allocation67_spill]]  ;;  %s10248_s7 = smov [#allocation23]  }
  0x8f   : > { %s684_s23 = sshll.u32 %s10248_s7, 4  ;;  %s10249_s1 = smov [#allocation26]   ;;  %s685_s23 = int_to_ptr.vmem [resolvable:$true] %s684_s23 }
  0x90   : > { %s706_s21 = sshll.u32 %s10249_s1, 4  ;;  %s9919_s22 = scalar_lea.vmem %s685_s23, 16  ;;  %s707_s21 = int_to_ptr.vmem [resolvable:$true] %s706_s21 }
  0x91   : > { %p9920_p13 = scmp.ne.s32.totalorder %s685_s23, %s9919_s22  ;;  %s9926_s20 = scalar_lea.vmem %s685_s23, 32 }
  0x92   : > { %p9927_p4 = scmp.lt.s32.totalorder %s685_s23, %s685_s23  ;;  %p9928_p7 = scmp.lt.s32.totalorder %s9926_s20, %s9919_s22 }
  0x93   : > { %p9922_p0 = pnand %p9920_p13, %p10476_p6 }
  0x94   : > { %9491 = dma.hbm_to_vmem [thread:$0]  (!%p10468_p5), %s12047_s12, 16, %s661_s27, [#allocation19]  }
  0x95   : > { %p9923_p2 = pneg %p9922_p0  ;;  %p9929_p8 = por %p9928_p7, %p9927_p4 }
  0x97   : > { %p9930_p9 = pnand %p9929_p8, %p9923_p2 }
  0x99   : > { %9933 = shalt.err (!%p9930_p9)
}
  0x9a   : > { %s12048_s14 = sld [smem:[#allocation69_spill]]  ;;  %s9945_s8 = scalar_lea.vmem %s707_s21, 16 }
  0x9b   : > { %p9946_p10 = scmp.ne.s32.totalorder %s707_s21, %s9945_s8  ;;  %s9952_s3 = scalar_lea.vmem %s707_s21, 32 }
  0x9c   : > { %p9953_p3 = scmp.lt.s32.totalorder %s707_s21, %s707_s21  ;;  %p9954_p12 = scmp.lt.s32.totalorder %s9952_s3, %s9945_s8 }
  0x9d   : > { %p9948_p11 = pnand %p9946_p10, %p10476_p6 }
  0x9e   : > { %p9955_p13 = por %p9954_p12, %p9953_p3 }
  0x9f   : > { %p9949_p1 = pneg %p9948_p11 }
  0xa0   : > { %9497 = dma.hbm_to_vmem [thread:$0]  (!%p10468_p5), %s12048_s14, 16, %s685_s23, [#allocation22]  }
  0xa1   : > { %p9956_p0 = pnand %p9955_p13, %p9949_p1 }
  0xa3   : > { %9959 = shalt.err (!%p9956_p0)
}
  0xa4   : > { %s12049_s16 = sld [smem:[#allocation71_spill]]  ;;  %s10250_s1 = smov [#allocation29]  }
  0xa5   : > { %s730_s23 = sshll.u32 %s10250_s1, 4  ;;  %s731_s23 = int_to_ptr.vmem [resolvable:$true] %s730_s23 }
  0xa6   : > { %s9971_s22 = scalar_lea.vmem %s731_s23, 16  ;;  %s9978_s20 = scalar_lea.vmem %s731_s23, 32 }
  0xa7   : > { %p9972_p2 = scmp.ne.s32.totalorder %s731_s23, %s9971_s22  ;;  %p9979_p8 = scmp.lt.s32.totalorder %s731_s23, %s731_s23 }
  0xa8   : > { %p9980_p9 = scmp.lt.s32.totalorder %s9978_s20, %s9971_s22 }
  0xa9   : > { %p9974_p4 = pnand %p9972_p2, %p10476_p6 }
  0xaa   : > { %9503 = dma.hbm_to_vmem [thread:$0]  (!%p10468_p5), %s12049_s16, 16, %s707_s21, [#allocation25]  }
  0xab   : > { %p9975_p7 = pneg %p9974_p4  ;;  %p9981_p10 = por %p9980_p9, %p9979_p8 }
  0xad   : > { %p9982_p11 = pnand %p9981_p10, %p9975_p7 }
  0xaf   : > { %9985 = shalt.err (!%p9982_p11)
}
  0xb0   : > { %s12050_s18 = sld [smem:[#allocation73_spill]]  ;;  %s8265_s5 = sadd.s32 4294967294, %s10236_s26  }
  0xb1   : > { %s62_s11 = sadd.s32 1, %s10224_s24  ;;  %s65_s21 = sadd.s32 1, %s10228_s6 }
  0xb2   : > { %p63_p6 = scmp.ge.s32.totalorder %s62_s11, 2  ;;  %s69_s8 = sadd.s32 1, %s10232_s25 }
  0xb3   : > { %s76_s3 = sadd.s32 1, %s10208_s0  ;;  %p83_p1 = scmp.ne.s32.totalorder %s10208_s0, %s10204_s4 }
  0xb4   : > { %s12136_s11 = smov (%p63_p6, %s62_s11), 0  ;;  %s12138_s21 = smov (!%p63_p6, %s65_s21), %s10228_s6 }
  0xb5   : > { %12051 = sst [smem:[#allocation52_spill]] %s12136_s11  ;;  %p84_p3 = scmp.eq.s32.totalorder %s10236_s26, 0 }
  0xb6   : > { %9509 = dma.hbm_to_vmem [thread:$0]  (!%p10468_p5), %s12050_s18, 16, %s731_s23, [#allocation28]  }
  0xb7   : > { %p89_p12 = scmp.ne.s32.totalorder %s10204_s4, %s10200_s30  ;;  %p67_p5 = scmp.ge.s32.totalorder %s12138_s21, 2 }
  0xb8   : > { %s12052_s28 = sld [smem:[#allocation44_spill]]  ;;  %p545_p13 = scmp.eq.s32.totalorder %s10455_s2, 7 }
  0xb9   : > { %p10583_p0 = por %p84_p3, %p83_p1  ;;  %p12054_p2 = scmp.eq.s32.totalorder %s10455_s2, 0 }
  0xba   : > { %s12140_s21 = smov (%p67_p5, %s12138_s21), 0  ;;  %s12142_s8 = smov (!%p67_p5, %s69_s8), %s10232_s25 }
  0xbb   : > { %p10589_p4 = por %p12054_p2, %p89_p12  ;;  %12056 = sst [smem:[#allocation53_spill]] %s12140_s21 }
  0xbc   : > { %p10598_p7 = por %p545_p13, %p83_p1  ;;  %p10602_p8 = scmp.eq.s32.totalorder %s8265_s5, 7 }
  0xbd   : > { %s12059_s20 = sld [smem:[#allocation43_spill]]  ;;  %p71_p9 = scmp.ge.s32.totalorder %s12142_s8, 2 }
  0xbe   : > { %s557_s27 = smul.u32 %s10224_s24, %s10228_s6  ;;  %p10610_p10 = por %p10602_p8, %p89_p12 }
  0xbf   : > { %s558_s9 = smul.u32 %s12140_s21, %s12136_s11  ;;  %s12144_s8 = smov (%p71_p9, %s12142_s8), 0 }
  0xc0   : > { %s12060_s19 = scalar_select %p10610_p10, 1, 0 }
  0xc1   : > { %12061 = sst [smem:[#allocation54_spill]] %s12144_s8  ;;  %s560_s5 = ssub.s32 %s557_s27, %s558_s9 }
  0xc2   : > { %s564_s10 = sadd.s32 1, %s10196_s29  ;;  %s73_s12 = ssub.s32 %s10232_s25, %s12144_s8 }
  0xc3   : > { %p574_p11 = scmp.ne.s32.totalorder %s10196_s29, %s12052_s28  ;;  %p74_p6 = scmp.eq.s32.totalorder %s73_s12, 0 }
  0xc4   : > { %s561_s13 = sor.u32 %s560_s5, %s73_s12  ;;  %p580_p12 = scmp.ne.s32.totalorder %s12052_s28, %s12059_s20 }
  0xc5   : > { %p562_p1 = scmp.eq.s32.totalorder %s561_s13, 0  ;;  %p10625_p3 = por %p574_p11, %p545_p13 }
  0xc6   : > { %s10630_s15 = scalar_select %p74_p6, %s10208_s0, %s76_s3  }
  0xc7   : > { %s10633_s16 = scalar_select %p562_p1, %s10196_s29, %s564_s10  }
  0xc8   : > { %p9535_p5 = scmp.lt.s32.totalorder %s10236_s26, 8  ;;  %s747_s17 = sand.u32 1, %s10208_s0  }
  0xc9   : > { %s8280_s9 = sshll.u32 %s10232_s25, 7  ;;  %p10642_p2 = por %p580_p12, %p10602_p8 }
  0xca   : > { %s8279_s12 = sshll.u32 %s747_s17, 3  ;;  %s12064_s18 = sld [smem:[#allocation55_spill]] }
  0xcb   : > { %s12063_s27 = scalar_select %p10642_p2, 1, 0 }
  0xcc   : > { %p10651_p13 = pnand %p9535_p5, %p10583_p0  ;;  %s751_s10 = scalar_lea.vmem [#allocation9], %s8279_s12 }
  0xcd   : > { %s758_s28 = sshll.u32 %s751_s10, 4  ;;  %s748_s22 = scalar_lea.sflag [#allocation10], %s747_s17  ;;  %s759_s28 = int_to_ptr.vmem [resolvable:$true] %s758_s28 }
  0xce   : > { %p9988_p8 = pneg %p10651_p13  ;;  %s9999_s20 = scalar_lea.vmem %s759_s28, 128 }
  0xcf   : > { %p10000_p9 = scmp.ne.s32.totalorder %s759_s28, %s9999_s20 }
  0xd0   : > { %s756_s8 = scalar_lea.hbm %s12064_s18, %s8280_s9  ;;  %s10251_s18 = smov [#allocation9]  }
  0xd1   : > { %p10002_p11 = pnand %p10000_p9, %p9988_p8  ;;  %s10004_s7 = sshll.u32 %s10251_s18, 4  ;;  %s10005_s7 = int_to_ptr.vmem [resolvable:$false] %s10004_s7 }
  0xd2   : > { %s10006_s13 = scalar_lea.vmem %s10005_s7, 256  ;;  %p10007_p0 = scmp.lt.s32.totalorder %s759_s28, %s10005_s7 }
  0xd3   : > { %p10003_p6 = pneg %p10002_p11  ;;  %p10008_p1 = scmp.lt.s32.totalorder %s10006_s13, %s9999_s20 }
  0xd5   : > { %p10009_p12 = por %p10008_p1, %p10007_p0 }
  0xd7   : > { %p10010_p5 = pnand %p10009_p12, %p10003_p6 }
  0xd9   : > { %10013 = shalt.err (!%p10010_p5)
}
  0xda   : > { %9513 = dma.hbm_to_vmem [thread:$0]  (!%p10651_p13), %s756_s8, 128, %s759_s28, %s748_s22  }
  0xdb   : > { %s12066_s10 = sld [smem:[#allocation56_spill]]  ;;  %s765_s11 = sand.u32 1, %s10236_s26  }
  0xdc   : > { %s769_s25 = scalar_lea.vmem [#allocation12], %s8279_s12  ;;  %s766_s18 = scalar_lea.sflag [#allocation13], %s765_s11 }
  0xdd   : > { %s776_s6 = sshll.u32 %s769_s25, 4  ;;  %s10252_s20 = smov [#allocation12]   ;;  %s777_s6 = int_to_ptr.vmem [resolvable:$true] %s776_s6 }
  0xde   : > { %s10027_s24 = scalar_lea.vmem %s777_s6, 128  ;;  %s10032_s7 = sshll.u32 %s10252_s20, 4  ;;  %s10033_s7 = int_to_ptr.vmem [resolvable:$false] %s10032_s7 }
  0xdf   : > { %p10028_p9 = scmp.ne.s32.totalorder %s777_s6, %s10027_s24  ;;  %s10034_s13 = scalar_lea.vmem %s10033_s7, 256 }
  0xe0   : > { %p10035_p0 = scmp.lt.s32.totalorder %s777_s6, %s10033_s7  ;;  %p10036_p1 = scmp.lt.s32.totalorder %s10034_s13, %s10027_s24 }
  0xe1   : > { %s774_s21 = scalar_lea.hbm %s12066_s10, %s8280_s9  ;;  %p10030_p11 = pnand %p10028_p9, %p9988_p8 }
  0xe2   : > { %p10037_p12 = por %p10036_p1, %p10035_p0 }
  0xe3   : > { %p10031_p6 = pneg %p10030_p11 }
  0xe5   : > { %p10038_p5 = pnand %p10037_p12, %p10031_p6 }
  0xe7   : > { %10041 = shalt.err (!%p10038_p5)
}
  0xe8   : > { %9516 = dma.hbm_to_vmem [thread:$0]  (!%p10651_p13), %s774_s21, 128, %s777_s6, %s766_s18  }
  0xe9   : > { %s12067_s25 = sld [smem:[#allocation51_spill]] }
  0xef   : > { %p12068_p2 = scmp.ne.s32.totalorder %s12067_s25, 0 }
  0xf0   : > { %s10674_s11 = sand.u32 (!%p12068_p2), 1, %s10204_s4  }
  0xf1   : > { %798 = sbr.rel (%p12068_p2) target bundleno = 4189 (0x105d), region = 104  ;;  %s10677_s8 = sshll.u32 (!%p12068_p2), %s10674_s11, 3 }
  0xf2   : > { %s801_s9 = scalar_lea.sflag (!%p12068_p2), [#allocation10], %s10674_s11  ;;  %s804_s24 = scalar_lea.vmem (!%p12068_p2), [#allocation9], %s10677_s8 }
  0xf6   : > { %10147 = dma.done.wait (%p10589_p4), %s801_s9, 128  }
  0xf7   : > { %10149 = vsyncadd (%p10589_p4), %s801_s9, 4294967168  ;;  %s809_s6 = sand.u32 1, %s10455_s2   ;;  %s813_s12 = scalar_lea.vmem [#allocation12], %s10677_s8 }
  0xf8   : > { %s810_s21 = scalar_lea.sflag [#allocation13], %s809_s6 }
  0xf9   : > { %10151 = dma.done.wait (%p10589_p4), %s810_s21, 128  }
  0xfa   : > { %10153 = vsyncadd (%p10589_p4), %s810_s21, 4294967168  ;;  %p12069_p2 = scmp.eq.s32.totalorder %s10455_s2, 0 }
  0xfc   : > { %10155 = dma.done.wait (%p12069_p2), [#allocation13], 16   ;;  %p12070_p13 = pmov %p12069_p2 }
  0xfd   : > { %p12071_p8 = pmov %p12069_p2 }
  0xfe   : > { %10157 = vsyncadd (%p12070_p13), [#allocation13], 4294967280 }
  0xff   : > { %10159 = dma.done.wait (%p12071_p8), [#allocation16], 32   ;;  %p12072_p9 = pmov %p12069_p2 }
 0x100   : > { %p12073_p11 = pmov %p12069_p2 }
 0x101   : > { %10161 = vsyncadd (%p12072_p9), [#allocation16], 4294967264 }
 0x102   : > { %10163 = dma.done.wait (%p12073_p11), [#allocation19], 32   ;;  %p12074_p6 = pmov %p12069_p2 }
 0x103   : > { %p12075_p4 = pmov %p12069_p2 }
 0x104   : > { %10165 = vsyncadd (%p12074_p6), [#allocation19], 4294967264 }
 0x105   : > { %10167 = dma.done.wait (%p12075_p4), [#allocation22], 528   ;;  %p12076_p0 = pmov %p12069_p2 }
 0x107   : > { %10169 = vsyncadd (%p12076_p0), [#allocation22], 4294966768  ;;  %p12077_p1 = pmov %p12076_p0 }
 0x108   : > { %p12078_p12 = pmov %p12076_p0 }
 0x109   : > { %10171 = dma.done.wait (%p12077_p1), [#allocation25], 32  }
 0x10a   : > { %10173 = vsyncadd (%p12078_p12), [#allocation25], 4294967264  ;;  %p12079_p5 = pmov %p12076_p0 }
 0x10b   : > { %p12080_p2 = pmov %p12076_p0 }
 0x10c   : > { %10175 = dma.done.wait (%p12079_p5), [#allocation28], 528  }
 0x10d   : > { %10177 = vsyncadd (%p12080_p2), [#allocation28], 4294966768  ;;  %s12081_s1 = sld [smem:[#allocation44_spill]]  ;;  %s929_s9 = scalar_lea.vmem [#allocation30], %s10677_s8 }
 0x10e   : > { %s12082_s3 = sld [smem:[#allocation45_spill]] }
 0x10f   : > { %s12083_s28 = sld [smem:[#allocation47_spill]] }
 0x110   : > { %s12084_s13 = sld [smem:[#allocation57_spill]] }
 0x111   : > { %s12085_s21 = sld [smem:[#allocation46_spill]] }
 0x113   : > { %s12000_s22 = sand.u32 1, %s12081_s1  }
 0x114   : > { %s8298_s17 = sshll.u32 %s12000_s22, 4  ;;  %s8299_s5 = sshll.u32 %s12082_s3, 1 }
 0x115   : > { %p938_p13 = scmp.lt.s32.totalorder %s12083_s28, 1  ;;  %p940_p8 = scmp.lt.s32.totalorder %s8299_s5, 3 }
 0x116   : > { %s10727_s6 = scalar_lea.vmem [#allocation31], %s8298_s17 }
 0x117   : > { %s12146_s28 = smov (!%p938_p13, %s12083_s28), 1  ;;  %s12148_s5 = smov (!%p940_p8, %s8299_s5), 3 }
 0x118   : > { %s8300_s10 = sshll.u32 %s12146_s28, 2  ;;  %p8302_p9 = scmp.ne.s32.totalorder %s12085_s21, 0 }
 0x119   : > { %s943_s18 = sadd.s32 %s8300_s10, %s12148_s5  ;;  %s12086_s1 = sld [smem:[#allocation45_spill]] (!%p8302_p9) }
 0x11a   : > { %s8301_s20 = sshll.u32 %s943_s18, 3  ;;  %952 = sbr.rel (%p8302_p9) target bundleno = 2601 (0xa29), region = 160 }
 0x11b   : > { %s10724_s25 = scalar_lea.vmem %s12084_s13, %s8301_s20 }
 0x11f   : > { %p8303_p11 = scmp.ne.s32.totalorder %s12086_s1, 0 }
 0x120   : > { %s12087_s17 = sld [smem:[#allocation60_spill]] (!%p8303_p11)  ;;  %s10255_s10 = smov (!%p8303_p11), 112  }
 0x121   : > { %956 = sbr.rel (%p8303_p11) target bundleno = 957 (0x3bd), region = 164  ;;  %s12088_s1 = sld [smem:[#allocation58_spill]] (!%p8303_p11) }
 0x122   : > { %s12089_s5 = sld [smem:[#allocation59_spill]] (!%p8303_p11)  ;;  %s10256_s18 = smov (!%p8303_p11), 96  }
 0x123   : > { %s10257_s20 = smov (!%p8303_p11), 64   ;;  %s10258_s7 = smov (!%p8303_p11), 80  }
 0x124   : > { %s10259_s2 = smov (!%p8303_p11), 48  }
 0x126   : > { %v957_v0 = vld [vmem:[%s804_s24] sm:$0xff]  ;;  %vm960_vm0 = vcmask 261120   ;;  %v10253_v2 = vmov 0.0   ;;  %v992_v8 = vld [vmem:[%s12087_s17 + $0x18] sm:$0xff]  ;;  %v991_v9 = vld [vmem:[%s12087_s17 + $0x10] sm:$0xff]  ;;  %vm10254_vm1 = vmmov 0  }
 0x127   : > { %v961_v1 = vsel %vm960_vm0, %v957_v0, 0.0  ;;  %1514 = vst.msk [vmem:[#allocation5] sm:$0xff] %vm960_vm0, %v10253_v2  ;;  %8679 = vmatprep.subr.mxu1 %v10253_v2  ;;  %8668 = vmatprep.subr.mxu0 %v10253_v2  ;;  %v990_v10 = vld [vmem:[%s12087_s17 + $0x8] sm:$0xff]  ;;  %v10748_v11 = vand.u32 4294901760, %v992_v8  ;;  %v10750_v12 = vand.u32 4294901760, %v991_v9  ;;  %v989_v14 = vld [vmem:[%s12087_s17] sm:$0xff] }
 0x128   : > { %962 = vadd.xlane.f32.xlu0 %v961_v1  ;;  %v10752_v13 = vand.u32 4294901760, %v990_v10  ;;  %8687 = vmatprep.mubr.msk.f32.mxu1 %vm10254_vm1, %v10253_v2  ;;  %v10761_v15 = vand.u32 4294901760, %v989_v14  ;;  %v8304_v36 = vld [vmem:[%s12088_s1] ss:$0 sm:$0xff]  ;;  %vm1488_vm2 = vcmask 130048  }
 0x129   : > { %8676 = vmatprep.mubr.msk.f32.mxu0 %vm10254_vm1, %v10253_v2  ;;  %v10764_v16 = vsub.f32 %v992_v8, %v10748_v11  ;;  %v10767_v17 = vsub.f32 %v991_v9, %v10750_v12  ;;  %8669 = vmatpush3.msra.mxu0 %v10748_v11  ;;  %v8305_v38 = vld [vmem:[%s12089_s5] ss:$0 sm:$0xff] }
 0x12a   : > { %v10770_v18 = vsub.f32 %v990_v10, %v10752_v13  ;;  %v10774_v19 = vsub.f32 %v989_v14, %v10761_v15  ;;  %8670 = vmatprep.subr.mxu0 %v10253_v2  ;;  %v8306_v53 = vld [vmem:[#allocation14] ss:$0 sm:$0xff] }
 0x12b   : > { %v1109_v20 = vand.u32 4294901760, %v10764_v16  ;;  %v1116_v21 = vand.u32 4294901760, %v10767_v17  ;;  %8671 = vmatpush3.msra.mxu0 %v10750_v12 }
 0x12c   : > { %v1123_v22 = vand.u32 4294901760, %v10770_v18  ;;  %v1130_v23 = vand.u32 4294901760, %v10774_v19  ;;  %8672 = vmatprep.subr.mxu0 %v10253_v2 }
 0x12d   : > { %v1110_v24 = vsub.f32 %v10764_v16, %v1109_v20  ;;  %v1117_v25 = vsub.f32 %v10767_v17, %v1116_v21  ;;  %8673 = vmatpush3.msra.mxu0 %v10752_v13 }
 0x12e   : > { %v1124_v26 = vsub.f32 %v10770_v18, %v1123_v22  ;;  %8674 = vmatprep.subr.mxu0 %v10253_v2  ;;  %v1131_v29 = vsub.f32 %v10774_v19, %v1130_v23 }
 0x12f   : > { %v1111_v27 = vand.u32 4294901760, %v1110_v24  ;;  %v1118_v28 = vand.u32 4294901760, %v1117_v25  ;;  %8675 = vmatpush3.msra.mxu0 %v10761_v15 }
 0x130   : > { %8690 = vmatprep.subr.mxu0 %v10253_v2  ;;  %v1125_v30 = vand.u32 4294901760, %v1124_v26  ;;  %v1132_v31 = vand.u32 4294901760, %v1131_v29 }
 0x131   : > { %8680 = vmatpush3.msra.mxu1 %v1111_v27 }
 0x132   : > { %8681 = vmatprep.subr.mxu1 %v10253_v2 }
 0x133   : > { %8682 = vmatpush3.msra.mxu1 %v1118_v28 }
 0x134   : > { %8683 = vmatprep.subr.mxu1 %v10253_v2 }
 0x135   : > { %8684 = vmatpush3.msra.mxu1 %v1125_v30 }
 0x136   : > { %8685 = vmatprep.subr.mxu1 %v10253_v2 }
 0x137   : > { %8686 = vmatpush3.msra.mxu1 %v1132_v31 }
 0x138   : > { %8701 = vmatprep.subr.mxu1 %v10253_v2 }
 0x1b1   : > { %v963_v3 = vpop.xlane.xlu0 %962 }
 0x1b2   : > { %v965_v4 = vmul.f32 0.03125, %v963_v3 }
 0x1b4   : > { %v966_v5 = vsub.f32 %v957_v0, %v965_v4 }
 0x1b6   : > { %v967_v6 = vmul.f32 %v966_v5, %v966_v5 }
 0x1b8   : > { %v968_v7 = vsel %vm960_vm0, %v967_v6, 0.0 }
 0x1b9   : > { %969 = vadd.xlane.f32.xlu0 %v968_v7 }
 0x242   : > { %v970_v32 = vpop.xlane.xlu0 %969 }
 0x243   : > { %v971_v33 = vmul.f32 0.03125, %v970_v32 }
 0x245   : > { %v972_v34 = vadd.f32 1e-05, %v971_v33 }
 0x247   : > { %9684 = vrsqrt.f32 %v972_v34 }
 0x254   : > { %v9685_v35 = vpop.eup %9684 }
 0x255   : > { %v974_v37 = vmul.f32 %v9685_v35, %v966_v5 }
 0x257   : > { %v981_v39 = vmul.f32 %v8304_v36, %v974_v37 }
 0x259   : > { %v988_v40 = vadd.f32 %v8305_v38, %v981_v39 }
 0x25b   : > { %v1001_v41 = vsel %vm960_vm0, %v988_v40, 0 }
 0x25c   : > { %v1072_v42 = vand.u32 4294901760, %v1001_v41 }
 0x25e   : > { %v1073_v43 = vsub.f32 %v1001_v41, %v1072_v42  ;;  %8688 = vmatmul.mubr.f32.vlgmr.msra.gmra.mxu1 %v1072_v42 }
 0x25f   : > { %8702 = vmatpush3.msra.mxu1 %v10748_v11  ;;  %8709 = vmatprep.mubr.msk.f32.mxu1 %vm10254_vm1, %v10253_v2 }
 0x260   : > { %8703 = vmatprep.subr.mxu1 %v10253_v2  ;;  %v1074_v44 = vand.u32 4294901760, %v1073_v43 }
 0x261   : > { %8704 = vmatpush3.msra.mxu1 %v10750_v12 }
 0x262   : > { %8705 = vmatprep.subr.mxu1 %v10253_v2  ;;  %v1075_v45 = vsub.f32 %v1073_v43, %v1074_v44 }
 0x263   : > { %8706 = vmatpush3.msra.mxu1 %v10752_v13 }
 0x264   : > { %8707 = vmatprep.subr.mxu1 %v10253_v2  ;;  %v1076_v46 = vand.u32 4294901760, %v1075_v45 }
 0x265   : > { %8708 = vmatpush3.msra.mxu1 %v10761_v15 }
 0x266   : > { %8710 = vmatmul.mubr.f32.vlgmr.msra.gmra.mxu1 %v1074_v44  ;;  %8723 = vmatprep.subr.mxu1 %v10253_v2 }
 0x267   : > { %8677 = vmatmul.mubr.f32.vlgmr.msra.gmra.mxu0 %v1076_v46  ;;  %8724 = vmatpush3.msra.mxu1 %v10748_v11 }
 0x268   : > { %8691 = vmatpush3.msra.mxu0 %v10764_v16  ;;  %8725 = vmatprep.subr.mxu1 %v10253_v2 }
 0x269   : > { %8692 = vmatprep.subr.mxu0 %v10253_v2  ;;  %8726 = vmatpush3.msra.mxu1 %v10750_v12 }
 0x26a   : > { %8693 = vmatpush3.msra.mxu0 %v10767_v17  ;;  %8727 = vmatprep.subr.mxu1 %v10253_v2 }
 0x26b   : > { %8694 = vmatprep.subr.mxu0 %v10253_v2  ;;  %8728 = vmatpush3.msra.mxu1 %v10752_v13 }
 0x26c   : > { %8695 = vmatpush3.msra.mxu0 %v10770_v18  ;;  %8729 = vmatprep.subr.mxu1 %v10253_v2 }
 0x26d   : > { %8696 = vmatprep.subr.mxu0 %v10253_v2  ;;  %8698 = vmatprep.mubr.msk.f32.mxu0 %vm10254_vm1, %v10253_v2 }
 0x26e   : > { %8697 = vmatpush3.msra.mxu0 %v10774_v19  ;;  %8730 = vmatpush3.msra.mxu1 %v10761_v15 }
 0x26f   : > { %8731 = vmatprep.mubr.msk.f32.mxu1 %vm10254_vm1, %v10253_v2  ;;  %8699 = vmatmul.mubr.f32.vlgmr.msra.gmra.mxu0 %v1073_v43 }
 0x270   : > { %8712 = vmatprep.subr.mxu0 %v10253_v2  ;;  %8732 = vmatmul.mubr.f32.vlgmr.msra.gmra.mxu1 %v1072_v42 }
 0x271   : > { %8713 = vmatpush3.msra.mxu0 %v1109_v20  ;;  %8720 = vmatprep.mubr.msk.f32.mxu0 %vm10254_vm1, %v10253_v2 }
 0x272   : > { %8714 = vmatprep.subr.mxu0 %v10253_v2 }
 0x273   : > { %8715 = vmatpush3.msra.mxu0 %v1116_v21 }
 0x274   : > { %8716 = vmatprep.subr.mxu0 %v10253_v2 }
 0x275   : > { %8717 = vmatpush3.msra.mxu0 %v1123_v22 }
 0x276   : > { %8718 = vmatprep.subr.mxu0 %v10253_v2 }
 0x277   : > { %8719 = vmatpush3.msra.mxu0 %v1130_v23 }
 0x278   : > { %8721 = vmatmul.mubr.f32.vlgmr.msra.gmra.mxu0 %v1072_v42 }
 0x31e   : > { %v1169_v47 = vpop.f32.mrf.mxu1 }
 0x320   : > { %v8689_v48 = vpop.f32.mrf.mxu1 }
 0x326   : > { %v1326_v49 = vpop.f32.mrf.mxu1 }
 0x327   : > { %v1078_v50 = vpop.f32.mrf.mxu0 }
 0x328   : > { %v8711_v51 = vpop.f32.mrf.mxu1  ;;  %v1079_v54 = vadd.f32 %v8306_v53, %v1078_v50 }
 0x329   : > { %v8678_v52 = vpop.f32.mrf.mxu0 }
 0x32a   : > { %v1170_v57 = vadd.f32 %v1169_v47, %v1079_v54 }
 0x32f   : > { %v1249_v55 = vpop.f32.mrf.mxu0 }
 0x330   : > { %v1484_v56 = vpop.f32.mrf.mxu1  ;;  %v1250_v60 = vadd.f32 %v1249_v55, %v1170_v57 }
 0x331   : > { %v8700_v58 = vpop.f32.mrf.mxu0 }
 0x332   : > { %v8733_v59 = vpop.f32.mrf.mxu1  ;;  %v1327_v61 = vadd.f32 %v1326_v49, %v1250_v60 }
 0x338   : > { %v1409_v62 = vpop.f32.mrf.mxu0 }
 0x339   : > { %v1410_v63 = vadd.f32 %v1409_v62, %v1327_v61 }
 0x33a   : > { %v8722_v0 = vpop.f32.mrf.mxu0 }
 0x33b   : > { %v1485_v1 = vadd.f32 %v1484_v56, %v1410_v63 }
 0x33d   : > { %1499 = vrot.lane.b32.xlu0 %v1485_v1, %s10255_s10  ;;  %1491 = vrot.lane.b32.xlu1 %v1485_v1, %s10256_s18  ;;  %1489 = vst.msk [vmem:[#allocation2] sm:$0xff] %vm1488_vm2, %v1485_v1 }
 0x341   : > { %1495 = vrot.lane.b32.xlu1 %v1485_v1, %s10257_s20 }
 0x345   : > { %1504 = vrot.lane.b32.xlu1 %v1485_v1, %s10258_s7 }
 0x349   : > { %1509 = vrot.lane.b32.xlu1 %v1485_v1, %s10259_s2 }
 0x3af   : > { %v1500_v2 = vpop.permute.xlu0 %1499  ;;  %v1492_v3 = vpop.permute.xlu1 %1491 }
 0x3b0   : > { %1503 = vst.msk [vmem:[#allocation2 + $0x8] sm:$0xff] %vm1488_vm2, %v1500_v2  ;;  %1494 = vst.msk [vmem:[#allocation3] sm:$0xff] %vm1488_vm2, %v1492_v3 }
 0x3b3   : > { %v1496_v4 = vpop.permute.xlu1 %1495 }
 0x3b4   : > { %1498 = vst.msk [vmem:[#allocation4] sm:$0xff] %vm1488_vm2, %v1496_v4 }
 0x3b7   : > { %v1505_v5 = vpop.permute.xlu1 %1504 }
 0x3b8   : > { %1508 = vst.msk [vmem:[#allocation3 + $0x8] sm:$0xff] %vm1488_vm2, %v1505_v5 }
 0x3bb   : > { %v1510_v6 = vpop.permute.xlu1 %1509 }
 0x3bc   : > { %1513 = vst.msk [vmem:[#allocation4 + $0x8] sm:$0xff] %vm1488_vm2, %v1510_v6 }
 0x3bd PF: > { %s12090_s13 = sld [smem:[#allocation45_spill]]  ;;  %vm1522_vm3 = vcmask 64512   ;;  %v10260_v7 = vmov 0.0   ;;  %vm10261_vm4 = vmmov 0   ;;  %v1976_v41 = vld [vmem:[%s10724_s25] sm:$0xff]  ;;  %s10262_s5 = smov 120  }
 0x3be   : > { %8734 = vmatprep.subr.mxu0 %v10260_v7  ;;  %8736 = vmatprep.mubr.msk.f32.mxu0 %vm10261_vm4, %v10260_v7  ;;  %s12091_s7 = sld [smem:[#allocation62_spill]]  ;;  %vm3365_vm5 = vcmask 130112   ;;  %vm3373_vm6 = vcmask 130048   ;;  %vm3837_vm7 = vcmask 261120  }
 0x3bf   : > { %8739 = vmatprep.subr.mxu1 %v10260_v7  ;;  %8741 = vmatprep.mubr.msk.f32.mxu1 %vm10261_vm4, %v10260_v7 }
 0x3c3   : > { %s10859_s21 = sshll.u32 %s12090_s13, 3  ;;  %s8309_s10 = sshll.u32 %s12090_s13, 4 }
 0x3c4   : > { %s1518_s1 = scalar_lea.vmem [#allocation3], %s10859_s21  ;;  %s1516_s3 = scalar_lea.vmem [#allocation2], %s10859_s21 }
 0x3c5   : > { %v10865_v8 = vld [vmem:[%s1518_s1] sm:$0xff]  ;;  %s1520_s28 = scalar_lea.vmem [#allocation4], %s10859_s21  ;;  %s3370_s2 = scalar_lea.vmem %s12091_s7, %s8309_s10 }
 0x3c6   : > { %v1527_v9 = vsel %vm1522_vm3, %v10865_v8, 0  ;;  %v10873_v10 = vld [vmem:[%s1516_s3] sm:$0xff]  ;;  %2441 = vrot.lane.b32.xlu1 %v10865_v8, %s10262_s5  ;;  %s10263_s13 = smov 8  }
 0x3c7   : > { %v1560_v11 = vand.u32 4294901760, %v1527_v9  ;;  %v1524_v12 = vsel %vm1522_vm3, %v10873_v10, 0  ;;  %v10885_v22 = vld [vmem:[%s1520_s28] sm:$0xff] }
 0x3c8   : > { %v1595_v13 = vand.u32 4294901760, %v1524_v12  ;;  %v10892_v23 = vand.u32 4294901760, %v10885_v22 }
 0x3c9   : > { %8735 = vmatpush3.xpose.msra.mxu0 %v1560_v11  ;;  %v1637_v14 = vsub.f32 %v1527_v9, %v1560_v11 }
 0x3ca   : > { %v1596_v15 = vsub.f32 %v1524_v12, %v1595_v13  ;;  %8744 = vmatprep.subr.mxu0 %v10260_v7  ;;  %2439 = vrot.lane.b32.xlu1 %v10873_v10, %s10262_s5  ;;  %v2100_v50 = vsub.f32 %v10885_v22, %v10892_v23 }
 0x3cb   : > { %v1638_v16 = vand.u32 4294901760, %v1637_v14 }
 0x3cc   : > { %v1597_v17 = vand.u32 4294901760, %v1596_v15  ;;  %v2101_v51 = vand.u32 4294901760, %v2100_v50 }
 0x3cd   : > { %v1639_v18 = vsub.f32 %v1637_v14, %v1638_v16 }
 0x3ce   : > { %v1598_v19 = vsub.f32 %v1596_v15, %v1597_v17  ;;  %v2102_v52 = vsub.f32 %v2100_v50, %v2101_v51 }
 0x3cf   : > { %v1640_v20 = vand.u32 4294901760, %v1639_v18 }
 0x3d0   : > { %v1599_v21 = vand.u32 4294901760, %v1598_v19  ;;  %v2103_v53 = vand.u32 4294901760, %v2102_v52 }
 0x3d1   : > { %8740 = vmatpush3.xpose.msra.mxu1 %v1640_v20 }
 0x3d2   : > { %8737 = vmatmul.mubr.f32.vlgmr.msra.gmra.mxu0 %v1599_v21  ;;  %8749 = vmatprep.subr.mxu1 %v10260_v7 }
 0x3d3   : > { %8745 = vmatpush3.xpose.msra.mxu0 %v1637_v14  ;;  %8746 = vmatprep.mubr.msk.f32.mxu0 %vm10261_vm4, %v10260_v7 }
 0x3d4   : > { %8742 = vmatmul.mubr.f32.vlgmr.msra.gmra.mxu1 %v1595_v13  ;;  %8754 = vmatprep.subr.mxu0 %v10260_v7 }
 0x3d5   : > { %8750 = vmatpush3.xpose.msra.mxu1 %v1560_v11  ;;  %8751 = vmatprep.mubr.msk.f32.mxu1 %vm10261_vm4, %v10260_v7 }
 0x3d6   : > { %8747 = vmatmul.mubr.f32.vlgmr.msra.gmra.mxu0 %v1596_v15  ;;  %8759 = vmatprep.subr.mxu1 %v10260_v7 }
 0x3d7   : > { %8755 = vmatpush3.xpose.msra.mxu0 %v1638_v16  ;;  %8756 = vmatprep.mubr.msk.f32.mxu0 %vm10261_vm4, %v10260_v7 }
 0x3d8   : > { %8752 = vmatmul.mubr.f32.vlgmr.msra.gmra.mxu1 %v1597_v17  ;;  %8764 = vmatprep.subr.mxu0 %v10260_v7 }
 0x3d9   : > { %8760 = vmatpush3.xpose.msra.mxu1 %v1560_v11  ;;  %8761 = vmatprep.mubr.msk.f32.mxu1 %vm10261_vm4, %v10260_v7 }
 0x3da   : > { %8757 = vmatmul.mubr.f32.vlgmr.msra.gmra.mxu0 %v1595_v13  ;;  %8769 = vmatprep.subr.mxu1 %v10260_v7 }
 0x3db   : > { %8765 = vmatpush3.msra.mxu0 %v10892_v23  ;;  %8766 = vmatprep.mubr.msk.f32.mxu0 %vm10261_vm4, %v10260_v7 }
 0x3dc   : > { %8762 = vmatmul.mubr.f32.vlgmr.msra.gmra.mxu1 %v1595_v13  ;;  %8774 = vmatprep.subr.mxu0 %v10260_v7 }
 0x3dd   : > { %8771 = vmatprep.mubr.msk.f32.mxu1 %vm10261_vm4, %v10260_v7  ;;  %8770 = vmatpush3.msra.mxu1 %v2103_v53 }
 0x3de   : > { %8779 = vmatprep.subr.mxu1 %v10260_v7 }
 0x438   : > { %v2442_v55 = vpop.permute.xlu1 %2441 }
 0x439   : > { %v2445_v56 = vsel %vm1522_vm3, %v2442_v55, 0 }
 0x43a   : > { %v2478_v57 = vand.u32 4294901760, %v2445_v56 }
 0x43c   : > { %v2555_v58 = vsub.f32 %v2445_v56, %v2478_v57  ;;  %v2440_v61 = vpop.permute.xlu1 %2439 }
 0x43d   : > { %v2443_v1 = vsel %vm1522_vm3, %v2440_v61, 0 }
 0x43e   : > { %v2556_v62 = vand.u32 4294901760, %v2555_v58  ;;  %v2513_v5 = vand.u32 4294901760, %v2443_v1 }
 0x440   : > { %v2557_v3 = vsub.f32 %v2555_v58, %v2556_v62  ;;  %v2514_v9 = vsub.f32 %v2443_v1, %v2513_v5 }
 0x442   : > { %v2558_v8 = vand.u32 4294901760, %v2557_v3  ;;  %v2515_v11 = vand.u32 4294901760, %v2514_v9 }
 0x444   : > { %v2516_v12 = vsub.f32 %v2514_v9, %v2515_v11 }
 0x446   : > { %v2517_v13 = vand.u32 4294901760, %v2516_v12 }
 0x492   : > { %v1601_v24 = vpop.f32.mrf.mxu0 }
 0x494   : > { %v8738_v25 = vpop.f32.mrf.mxu0  ;;  %v1677_v26 = vpop.f32.mrf.mxu1 }
 0x495   : > { %v1678_v27 = vadd.f32 %v1677_v26, %v1601_v24 }
 0x496   : > { %v1751_v28 = vpop.f32.mrf.mxu0  ;;  %v8743_v29 = vpop.f32.mrf.mxu1 }
 0x497   : > { %v1752_v30 = vadd.f32 %v1751_v28, %v1678_v27 }
 0x498   : > { %v8748_v31 = vpop.f32.mrf.mxu0  ;;  %v1825_v32 = vpop.f32.mrf.mxu1 }
 0x499   : > { %v1826_v33 = vadd.f32 %v1825_v32, %v1752_v30 }
 0x49a   : > { %v1899_v34 = vpop.f32.mrf.mxu0  ;;  %v8753_v35 = vpop.f32.mrf.mxu1 }
 0x49b   : > { %v1900_v36 = vadd.f32 %v1899_v34, %v1826_v33 }
 0x49c   : > { %v8758_v37 = vpop.f32.mrf.mxu0  ;;  %v1971_v38 = vpop.f32.mrf.mxu1 }
 0x49d   : > { %v1972_v39 = vadd.f32 %v1971_v38, %v1900_v36 }
 0x49e   : > { %v8763_v40 = vpop.f32.mrf.mxu1 }
 0x49f   : > { %v1975_v42 = vmul.f32 0.35355338, %v1972_v39 }
 0x4a1   : > { %v1977_v43 = vadd.f32 %v1976_v41, %v1975_v42 }
 0x4a3   : > { %v1978_v44 = vsel %vm1522_vm3, %v1977_v43, -inf }
 0x4a4   : > { %1979 = vmax.xlane.f32.xlu0 %v1978_v44 }
 0x52d   : > { %v1980_v45 = vpop.xlane.xlu0 %1979 }
 0x52e   : > { %v1981_v46 = vsub.f32 %v1977_v43, %v1980_v45 }
 0x530   : > { %v1982_v47 = vmul.f32 1.442695, %v1981_v46 }
 0x532   : > { %9686 = vpow2.f32 %v1982_v47 }
 0x53f   : > { %v9687_v48 = vpop.eup %9686 }
 0x540   : > { %v1984_v49 = vsel %vm1522_vm3, %v9687_v48, 0.0 }
 0x541   : > { %1985 = vadd.xlane.f32.xlu0 %v1984_v49  ;;  %v8308_v49 = vld [vmem:[%s10724_s25 + $0x8] sm:$0xff] }
 0x5ca   : > { %v1986_v54 = vpop.xlane.xlu0 %1985 }
 0x5cb   : > { %9688 = vrcp.f32 %v1986_v54 }
 0x5d8   : > { %v9689_v59 = vpop.eup %9688 }
 0x5d9   : > { %v1988_v60 = vmul.f32 %v9689_v59, %v9687_v48 }
 0x5db   : > { %v1990_v63 = vsel %vm1522_vm3, %v1988_v60, 0 }
 0x5dc   : > { %v2058_v0 = vand.u32 4294901760, %v1990_v63 }
 0x5de   : > { %v2059_v2 = vsub.f32 %v1990_v63, %v2058_v0  ;;  %8772 = vmatmul.mubr.f32.vlgmr.msra.gmra.mxu1 %v2058_v0 }
 0x5df   : > { %8780 = vmatpush3.msra.mxu1 %v10892_v23  ;;  %8781 = vmatprep.mubr.msk.f32.mxu1 %vm10261_vm4, %v10260_v7 }
 0x5e0   : > { %v2060_v4 = vand.u32 4294901760, %v2059_v2  ;;  %8789 = vmatprep.subr.mxu1 %v10260_v7 }
 0x5e2   : > { %8782 = vmatmul.mubr.f32.vlgmr.msra.gmra.mxu1 %v2060_v4  ;;  %v2061_v6 = vsub.f32 %v2059_v2, %v2060_v4 }
 0x5e3   : > { %8790 = vmatpush3.msra.mxu1 %v10892_v23  ;;  %8791 = vmatprep.mubr.msk.f32.mxu1 %vm10261_vm4, %v10260_v7 }
 0x5e4   : > { %8799 = vmatprep.subr.mxu1 %v10260_v7  ;;  %v2062_v10 = vand.u32 4294901760, %v2061_v6 }
 0x5e6   : > { %8767 = vmatmul.mubr.f32.vlgmr.msra.gmra.mxu0 %v2062_v10  ;;  %8792 = vmatmul.mubr.f32.vlgmr.msra.gmra.mxu1 %v2058_v0 }
 0x5e7   : > { %8800 = vmatpush3.xpose.msra.mxu1 %v2558_v8  ;;  %8775 = vmatpush3.msra.mxu0 %v2100_v50 }
 0x5e8   : > { %8776 = vmatprep.mubr.msk.f32.mxu0 %vm10261_vm4, %v10260_v7  ;;  %8801 = vmatprep.mubr.msk.f32.mxu1 %vm10261_vm4, %v10260_v7 }
 0x5e9   : > { %8809 = vmatprep.subr.mxu1 %v10260_v7  ;;  %8784 = vmatprep.subr.mxu0 %v10260_v7 }
 0x5ea   : > { %8777 = vmatmul.mubr.f32.vlgmr.msra.gmra.mxu0 %v2059_v2  ;;  %8802 = vmatmul.mubr.f32.vlgmr.msra.gmra.mxu1 %v2513_v5 }
 0x5eb   : > { %8810 = vmatpush3.xpose.msra.mxu1 %v2478_v57  ;;  %8785 = vmatpush3.msra.mxu0 %v2101_v51 }
 0x5ec   : > { %8786 = vmatprep.mubr.msk.f32.mxu0 %vm10261_vm4, %v10260_v7  ;;  %8794 = vmatprep.subr.mxu0 %v10260_v7 }
 0x5ed   : > { %8811 = vmatprep.mubr.msk.f32.mxu1 %vm10261_vm4, %v10260_v7  ;;  %8819 = vmatprep.subr.mxu1 %v10260_v7 }
 0x5ee   : > { %8787 = vmatmul.mubr.f32.vlgmr.msra.gmra.mxu0 %v2058_v0  ;;  %8812 = vmatmul.mubr.f32.vlgmr.msra.gmra.mxu1 %v2515_v11 }
 0x5ef   : > { %8795 = vmatpush3.xpose.msra.mxu0 %v2478_v57  ;;  %8820 = vmatpush3.xpose.msra.mxu1 %v2478_v57 }
 0x5f0   : > { %8796 = vmatprep.mubr.msk.f32.mxu0 %vm10261_vm4, %v10260_v7  ;;  %8804 = vmatprep.subr.mxu0 %v10260_v7 }
 0x5f1   : > { %8821 = vmatprep.mubr.msk.f32.mxu1 %vm10261_vm4, %v10260_v7  ;;  %8829 = vmatprep.subr.mxu1 %v10260_v7 }
 0x5f2   : > { %8797 = vmatmul.mubr.f32.vlgmr.msra.gmra.mxu0 %v2517_v13  ;;  %8822 = vmatmul.mubr.f32.vlgmr.msra.gmra.mxu1 %v2513_v5  ;;  %v3372_v13 = vld [vmem:[%s3370_s2 + $0x8] sm:$0xff] }
 0x5f3   : > { %8805 = vmatpush3.xpose.msra.mxu0 %v2555_v58  ;;  %8806 = vmatprep.mubr.msk.f32.mxu0 %vm10261_vm4, %v10260_v7 }
 0x5f4   : > { %8814 = vmatprep.subr.mxu0 %v10260_v7  ;;  %8831 = vmatprep.mubr.msk.f32.mxu1 %vm10261_vm4, %v10260_v7 }
 0x5f6   : > { %8807 = vmatmul.mubr.f32.vlgmr.msra.gmra.mxu0 %v2514_v9 }
 0x5f7   : > { %8815 = vmatpush3.xpose.msra.mxu0 %v2556_v62  ;;  %8816 = vmatprep.mubr.msk.f32.mxu0 %vm10261_vm4, %v10260_v7 }
 0x5f8   : > { %8824 = vmatprep.subr.mxu0 %v10260_v7 }
 0x5fa   : > { %8817 = vmatmul.mubr.f32.vlgmr.msra.gmra.mxu0 %v2513_v5 }
 0x5fb   : > { %8826 = vmatprep.mubr.msk.f32.mxu0 %vm10261_vm4, %v10260_v7 }
 0x69e   : > { %v2140_v14 = vpop.f32.mrf.mxu1 }
 0x6a0   : > { %v8773_v15 = vpop.f32.mrf.mxu1 }
 0x6a2   : > { %v2288_v16 = vpop.f32.mrf.mxu1 }
 0x6a4   : > { %v8783_v17 = vpop.f32.mrf.mxu1 }
 0x6a5   : > { %v3371_v17 = vld [vmem:[%s3370_s2] sm:$0xff] }
 0x6a6   : > { %v2064_v18 = vpop.f32.mrf.mxu0  ;;  %v2434_v19 = vpop.f32.mrf.mxu1 }
 0x6a7   : > { %v2141_v23 = vadd.f32 %v2140_v14, %v2064_v18  ;;  %v3406_v14 = vand.u32 4294901760, %v3372_v13 }
 0x6a8   : > { %v8768_v20 = vpop.f32.mrf.mxu0  ;;  %v8793_v21 = vpop.f32.mrf.mxu1 }
 0x6a9   : > { %v3484_v18 = vsub.f32 %v3372_v13, %v3406_v14 }
 0x6aa   : > { %v2214_v24 = vpop.f32.mrf.mxu0  ;;  %v2595_v25 = vpop.f32.mrf.mxu1 }
 0x6ab   : > { %v2215_v26 = vadd.f32 %v2214_v24, %v2141_v23  ;;  %v3485_v24 = vand.u32 4294901760, %v3484_v18 }
 0x6ac   : > { %v8778_v27 = vpop.f32.mrf.mxu0  ;;  %v8803_v28 = vpop.f32.mrf.mxu1 }
 0x6ad   : > { %v2289_v29 = vadd.f32 %v2288_v16, %v2215_v26  ;;  %v3486_v28 = vsub.f32 %v3484_v18, %v3485_v24 }
 0x6ae   : > { %v2362_v30 = vpop.f32.mrf.mxu0  ;;  %v2743_v31 = vpop.f32.mrf.mxu1 }
 0x6af   : > { %v2363_v32 = vadd.f32 %v2362_v30, %v2289_v29 }
 0x6b0   : > { %v8788_v33 = vpop.f32.mrf.mxu0  ;;  %v8813_v34 = vpop.f32.mrf.mxu1 }
 0x6b1   : > { %v2435_v35 = vadd.f32 %v2434_v19, %v2363_v32  ;;  %v3409_v19 = vand.u32 4294901760, %v3371_v17  ;;  %v3487_v32 = vand.u32 4294901760, %v3486_v28 }
 0x6b2   : > { %v2519_v36 = vpop.f32.mrf.mxu0  ;;  %v2889_v37 = vpop.f32.mrf.mxu1 }
 0x6b3   : > { %2438 = vst.msk [vmem:[#allocation8] sm:$0xff] %vm1522_vm3, %v2435_v35  ;;  %v2596_v40 = vadd.f32 %v2595_v25, %v2519_v36  ;;  %v3491_v25 = vsub.f32 %v3371_v17, %v3409_v19 }
 0x6b4   : > { %v8798_v38 = vpop.f32.mrf.mxu0  ;;  %v8823_v39 = vpop.f32.mrf.mxu1 }
 0x6b5   : > { %v3492_v29 = vand.u32 4294901760, %v3491_v25 }
 0x6b6   : > { %v2669_v41 = vpop.f32.mrf.mxu0 }
 0x6b7   : > { %v2670_v42 = vadd.f32 %v2669_v41, %v2596_v40  ;;  %v3493_v33 = vsub.f32 %v3491_v25, %v3492_v29 }
 0x6b8   : > { %v8808_v43 = vpop.f32.mrf.mxu0 }
 0x6b9   : > { %v2744_v44 = vadd.f32 %v2743_v31, %v2670_v42  ;;  %v3494_v36 = vand.u32 4294901760, %v3493_v33 }
 0x6ba   : > { %v2817_v45 = vpop.f32.mrf.mxu0 }
 0x6bb   : > { %v2818_v46 = vadd.f32 %v2817_v45, %v2744_v44 }
 0x6bc   : > { %v8818_v47 = vpop.f32.mrf.mxu0 }
 0x6bd   : > { %v2890_v48 = vadd.f32 %v2889_v37, %v2818_v46 }
 0x6bf   : > { %v2893_v50 = vmul.f32 0.35355338, %v2890_v48 }
 0x6c1   : > { %v2896_v51 = vadd.f32 %v8308_v49, %v2893_v50 }
 0x6c3   : > { %v2897_v52 = vsel %vm1522_vm3, %v2896_v51, -inf }
 0x6c4   : > { %2898 = vmax.xlane.f32.xlu0 %v2897_v52 }
 0x6da   : > { %2909 = vrot.lane.b32.xlu0 %v10885_v22, %s10262_s5 }
 0x74d   : > { %v2899_v53 = vpop.xlane.xlu0 %2898 }
 0x74e   : > { %v2900_v54 = vsub.f32 %v2896_v51, %v2899_v53 }
 0x750   : > { %v2901_v55 = vmul.f32 1.442695, %v2900_v54 }
 0x751   : > { %v2910_v58 = vpop.permute.xlu0 %2909 }
 0x752   : > { %9690 = vpow2.f32 %v2901_v55  ;;  %v2946_v59 = vand.u32 4294901760, %v2910_v58 }
 0x754   : > { %v3023_v60 = vsub.f32 %v2910_v58, %v2946_v59  ;;  %8825 = vmatpush3.msra.mxu0 %v2946_v59 }
 0x755   : > { %8834 = vmatprep.subr.mxu0 %v10260_v7 }
 0x756   : > { %v3024_v61 = vand.u32 4294901760, %v3023_v60 }
 0x758   : > { %v3025_v62 = vsub.f32 %v3023_v60, %v3024_v61 }
 0x75a   : > { %v3026_v63 = vand.u32 4294901760, %v3025_v62  ;;  %v3367_v62 = vld [vmem:[#allocation5] sm:$0xff] }
 0x75c   : > { %8830 = vmatpush3.msra.mxu1 %v3026_v63 }
 0x75d   : > { %8839 = vmatprep.subr.mxu1 %v10260_v7 }
 0x75f   : > { %v9691_v56 = vpop.eup %9690 }
 0x760   : > { %v2903_v57 = vsel %vm1522_vm3, %v9691_v56, 0.0 }
 0x761   : > { %2904 = vadd.xlane.f32.xlu1 %v2903_v57 }
 0x7ea   : > { %v2905_v22 = vpop.xlane.xlu1 %2904 }
 0x7eb   : > { %9692 = vrcp.f32 %v2905_v22 }
 0x7f8   : > { %v9693_v0 = vpop.eup %9692 }
 0x7f9   : > { %v2907_v1 = vmul.f32 %v9693_v0, %v9691_v56 }
 0x7fb   : > { %v2913_v2 = vsel %vm1522_vm3, %v2907_v1, 0 }
 0x7fc   : > { %v2981_v3 = vand.u32 4294901760, %v2913_v2 }
 0x7fe   : > { %v2982_v4 = vsub.f32 %v2913_v2, %v2981_v3  ;;  %8832 = vmatmul.mubr.f32.vlgmr.msra.gmra.mxu1 %v2981_v3 }
 0x7ff   : > { %8840 = vmatpush3.msra.mxu1 %v2946_v59  ;;  %8841 = vmatprep.mubr.msk.f32.mxu1 %vm10261_vm4, %v10260_v7 }
 0x800   : > { %8849 = vmatprep.subr.mxu1 %v10260_v7  ;;  %v2983_v5 = vand.u32 4294901760, %v2982_v4 }
 0x802   : > { %8842 = vmatmul.mubr.f32.vlgmr.msra.gmra.mxu1 %v2983_v5  ;;  %v2984_v6 = vsub.f32 %v2982_v4, %v2983_v5 }
 0x803   : > { %8850 = vmatpush3.msra.mxu1 %v2946_v59  ;;  %8851 = vmatprep.mubr.msk.f32.mxu1 %vm10261_vm4, %v10260_v7 }
 0x804   : > { %v2985_v8 = vand.u32 4294901760, %v2984_v6  ;;  %8861 = vmatprep.subr.mxu1 %v10260_v7 }
 0x806   : > { %8827 = vmatmul.mubr.f32.vlgmr.msra.gmra.mxu0 %v2985_v8  ;;  %8852 = vmatmul.mubr.f32.vlgmr.msra.gmra.mxu1 %v2981_v3 }
 0x807   : > { %8835 = vmatpush3.msra.mxu0 %v3023_v60  ;;  %8836 = vmatprep.mubr.msk.f32.mxu0 %vm10261_vm4, %v10260_v7 }
 0x808   : > { %8844 = vmatprep.subr.mxu0 %v10260_v7  ;;  %8865 = vmatprep.mubr.msk.f32.mxu1 %vm10261_vm4, %v10260_v7 }
 0x809   : > { %8862 = vmatpush3.msra.mxu1 %v3487_v32 }
 0x80a   : > { %8837 = vmatmul.mubr.f32.vlgmr.msra.gmra.mxu0 %v2982_v4  ;;  %8863 = vmatprep.subr.mxu1 %v10260_v7 }
 0x80b   : > { %8845 = vmatpush3.msra.mxu0 %v3024_v61  ;;  %8846 = vmatprep.mubr.msk.f32.mxu0 %vm10261_vm4, %v10260_v7 }
 0x80c   : > { %8854 = vmatprep.subr.mxu0 %v10260_v7  ;;  %8864 = vmatpush3.msra.mxu1 %v3494_v36 }
 0x80d   : > { %8875 = vmatprep.subr.mxu1 %v10260_v7 }
 0x80e   : > { %8847 = vmatmul.mubr.f32.vlgmr.msra.gmra.mxu0 %v2981_v3 }
 0x80f   : > { %8858 = vmatprep.mubr.msk.f32.mxu0 %vm10261_vm4, %v10260_v7  ;;  %8855 = vmatpush3.msra.mxu0 %v3406_v14 }
 0x810   : > { %8856 = vmatprep.subr.mxu0 %v10260_v7 }
 0x811   : > { %8857 = vmatpush3.msra.mxu0 %v3409_v19 }
 0x812   : > { %8868 = vmatprep.subr.mxu0 %v10260_v7 }
 0x8be   : > { %v3063_v9 = vpop.f32.mrf.mxu1 }
 0x8c0   : > { %v8833_v10 = vpop.f32.mrf.mxu1 }
 0x8c2   : > { %v3211_v11 = vpop.f32.mrf.mxu1 }
 0x8c4   : > { %v8843_v12 = vpop.f32.mrf.mxu1 }
 0x8c6   : > { %v2987_v15 = vpop.f32.mrf.mxu0  ;;  %v3357_v16 = vpop.f32.mrf.mxu1 }
 0x8c7   : > { %v3064_v23 = vadd.f32 %v3063_v9, %v2987_v15 }
 0x8c8   : > { %v8828_v20 = vpop.f32.mrf.mxu0  ;;  %v8853_v21 = vpop.f32.mrf.mxu1 }
 0x8ca   : > { %v3137_v26 = vpop.f32.mrf.mxu0 }
 0x8cb   : > { %v3138_v27 = vadd.f32 %v3137_v26, %v3064_v23 }
 0x8cc   : > { %v8838_v30 = vpop.f32.mrf.mxu0 }
 0x8cd   : > { %v3212_v31 = vadd.f32 %v3211_v11, %v3138_v27 }
 0x8ce   : > { %v3285_v34 = vpop.f32.mrf.mxu0 }
 0x8cf   : > { %v3286_v35 = vadd.f32 %v3285_v34, %v3212_v31 }
 0x8d0   : > { %v8848_v37 = vpop.f32.mrf.mxu0 }
 0x8d1   : > { %v3358_v38 = vadd.f32 %v3357_v16, %v3286_v35 }
 0x8d3   : > { %3362 = vrot.lane.b32.xlu0 %v3358_v38, %s10263_s13 }
 0x945   : > { %v3363_v39 = vpop.permute.xlu0 %3362 }
 0x946   : > { %3366 = vst.msk [vmem:[#allocation8] sm:$0xff] %vm3365_vm5, %v3363_v39 }
 0x94d   : > { %v3368_v40 = vld [vmem:[#allocation8] sm:$0xff] }
 0x94e   : > { %v3375_v41 = vsel %vm3373_vm6, %v3368_v40, 0 }
 0x94f   : > { %v3444_v42 = vand.u32 4294901760, %v3375_v41 }
 0x951   : > { %v3445_v43 = vsub.f32 %v3375_v41, %v3444_v42  ;;  %8866 = vmatmul.mubr.f32.vlgmr.msra.gmra.mxu1 %v3444_v42 }
 0x952   : > { %8876 = vmatpush3.msra.mxu1 %v3406_v14  ;;  %8879 = vmatprep.mubr.msk.f32.mxu1 %vm10261_vm4, %v10260_v7 }
 0x953   : > { %8877 = vmatprep.subr.mxu1 %v10260_v7  ;;  %v3446_v44 = vand.u32 4294901760, %v3445_v43 }
 0x954   : > { %8878 = vmatpush3.msra.mxu1 %v3409_v19 }
 0x955   : > { %8880 = vmatmul.mubr.f32.vlgmr.msra.gmra.mxu1 %v3446_v44  ;;  %8889 = vmatprep.subr.mxu1 %v10260_v7  ;;  %v3447_v45 = vsub.f32 %v3445_v43, %v3446_v44 }
 0x956   : > { %8890 = vmatpush3.msra.mxu1 %v3406_v14  ;;  %8893 = vmatprep.mubr.msk.f32.mxu1 %vm10261_vm4, %v10260_v7 }
 0x957   : > { %8891 = vmatprep.subr.mxu1 %v10260_v7  ;;  %v3448_v46 = vand.u32 4294901760, %v3447_v45 }
 0x958   : > { %8892 = vmatpush3.msra.mxu1 %v3409_v19 }
 0x959   : > { %8859 = vmatmul.mubr.f32.vlgmr.msra.gmra.mxu0 %v3448_v46  ;;  %8894 = vmatmul.mubr.f32.vlgmr.msra.gmra.mxu1 %v3444_v42 }
 0x95a   : > { %8869 = vmatpush3.msra.mxu0 %v3484_v18  ;;  %8872 = vmatprep.mubr.msk.f32.mxu0 %vm10261_vm4, %v10260_v7 }
 0x95b   : > { %8870 = vmatprep.subr.mxu0 %v10260_v7 }
 0x95c   : > { %8871 = vmatpush3.msra.mxu0 %v3491_v25 }
 0x95d   : > { %8873 = vmatmul.mubr.f32.vlgmr.msra.gmra.mxu0 %v3445_v43  ;;  %8882 = vmatprep.subr.mxu0 %v10260_v7 }
 0x95e   : > { %8883 = vmatpush3.msra.mxu0 %v3485_v24  ;;  %8886 = vmatprep.mubr.msk.f32.mxu0 %vm10261_vm4, %v10260_v7 }
 0x95f   : > { %8884 = vmatprep.subr.mxu0 %v10260_v7 }
 0x960   : > { %8885 = vmatpush3.msra.mxu0 %v3492_v29 }
 0x961   : > { %8887 = vmatmul.mubr.f32.vlgmr.msra.gmra.mxu0 %v3444_v42 }
 0xa11   : > { %v3531_v47 = vpop.f32.mrf.mxu1 }
 0xa13   : > { %v8867_v48 = vpop.f32.mrf.mxu1 }
 0xa15   : > { %v3682_v49 = vpop.f32.mrf.mxu1 }
 0xa17   : > { %v8881_v50 = vpop.f32.mrf.mxu1 }
 0xa19   : > { %v3450_v51 = vpop.f32.mrf.mxu0  ;;  %v3832_v52 = vpop.f32.mrf.mxu1 }
 0xa1a   : > { %v3532_v55 = vadd.f32 %v3531_v47, %v3450_v51 }
 0xa1b   : > { %v8860_v53 = vpop.f32.mrf.mxu0  ;;  %v8895_v54 = vpop.f32.mrf.mxu1 }
 0xa1d   : > { %v3607_v56 = vpop.f32.mrf.mxu0 }
 0xa1e   : > { %v3608_v57 = vadd.f32 %v3607_v56, %v3532_v55 }
 0xa1f   : > { %v8874_v58 = vpop.f32.mrf.mxu0 }
 0xa20   : > { %v3683_v59 = vadd.f32 %v3682_v49, %v3608_v57 }
 0xa21   : > { %v3759_v60 = vpop.f32.mrf.mxu0 }
 0xa22   : > { %v3760_v61 = vadd.f32 %v3759_v60, %v3683_v59 }
 0xa23   : > { %v8888_v63 = vpop.f32.mrf.mxu0 }
 0xa24   : > { %v3833_v7 = vadd.f32 %v3832_v52, %v3760_v61 }
 0xa26   : > { %v3836_v22 = vadd.f32 %v3833_v7, %v3367_v62 }
 0xa28   : > { %3838 = vst.msk [vmem:[#allocation5] sm:$0xff] %vm3837_vm7, %v3836_v22 }
 0xa29 PF: > { %s12092_s21 = sld [smem:[#allocation46_spill]] }
 0xa2f   : > { %p8310_p6 = scmp.ne.s32.totalorder %s12092_s21, 1 }
 0xa30   : > { %s12093_s1 = sld [smem:[#allocation45_spill]] (!%p8310_p6) }
 0xa31   : > { %3842 = sbr.rel (%p8310_p6) target bundleno = 4137 (0x1029), region = 168 }
 0xa36   : > { %p8311_p4 = scmp.ne.s32.totalorder %s12093_s1, 0 }
 0xa37   : > { %s12094_s5 = sld [smem:[#allocation66_spill]] (!%p8311_p4) }
 0xa38   : > { %3846 = sbr.rel (%p8311_p4) target bundleno = 3776 (0xec0), region = 172  ;;  %s12096_s3 = sld [smem:[#allocation74_spill]] (!%p8311_p4) }
 0xa3d   : > { %v3847_v0 = vld [vmem:[%s804_s24] sm:$0xff]  ;;  %v3848_v1 = vld [vmem:[#allocation5] sm:$0xff]  ;;  %vm3860_vm8 = vcmask 261120   ;;  %s12095_s10 = smov %s12094_s5  ;;  %v3892_v12 = vld [vmem:[%s12094_s5 + $0x18] sm:$0xff]  ;;  %v10264_v15 = vmov 0.0   ;;  %vm10265_vm9 = vmmov 0  }
 0xa3e   : > { %v8312_v2 = vld [vmem:[#allocation15] ss:$0 sm:$0xff]  ;;  %v3849_v3 = vadd.f32 %v3848_v1, %v3847_v0  ;;  %v3891_v13 = vld [vmem:[%s12095_s10 + $0x10] sm:$0xff]  ;;  %v3890_v14 = vld [vmem:[%s12095_s10 + $0x8] sm:$0xff]  ;;  %8907 = vmatprep.subr.mxu1 %v10264_v15  ;;  %v11015_v16 = vand.u32 4294901760, %v3892_v12  ;;  %8896 = vmatprep.subr.mxu0 %v10264_v15  ;;  %vm4888_vm10 = vcmask 130048   ;;  %s12097_s18 = smov %s12096_s3 }
 0xa3f   : > { %v11017_v17 = vand.u32 4294901760, %v3891_v13  ;;  %v11019_v18 = vand.u32 4294901760, %v3890_v14  ;;  %v3889_v19 = vld [vmem:[%s12095_s10] sm:$0xff]  ;;  %8915 = vmatprep.mubr.msk.f32.mxu1 %vm10265_vm9, %v10264_v15  ;;  %8904 = vmatprep.mubr.msk.f32.mxu0 %vm10265_vm9, %v10264_v15 }
 0xa40   : > { %v3857_v4 = vadd.f32 %v8312_v2, %v3849_v3  ;;  %v11025_v20 = vand.u32 4294901760, %v3889_v19  ;;  %v11028_v21 = vsub.f32 %v3892_v12, %v11015_v16  ;;  %8897 = vmatpush3.msra.mxu0 %v11015_v16  ;;  %v8313_v42 = vld [vmem:[#allocation17] ss:$0 sm:$0xff]  ;;  %v8314_v44 = vld [vmem:[#allocation18] ss:$0 sm:$0xff]  ;;  %v4391_v55 = vld [vmem:[#allocation21 + $0x10] sm:$0xff] }
 0xa41   : > { %v11031_v23 = vsub.f32 %v3891_v13, %v11017_v17  ;;  %v11034_v24 = vsub.f32 %v3890_v14, %v11019_v18  ;;  %8898 = vmatprep.subr.mxu0 %v10264_v15  ;;  %v4392_v54 = vld [vmem:[#allocation21 + $0x18] sm:$0xff]  ;;  %v11127_v57 = vand.u32 4294901760, %v4391_v55 }
 0xa42   : > { %v3861_v5 = vsel %vm3860_vm8, %v3857_v4, 0.0  ;;  %v11038_v25 = vsub.f32 %v3889_v19, %v11025_v20  ;;  %v4009_v26 = vand.u32 4294901760, %v11028_v21  ;;  %8899 = vmatpush3.msra.mxu0 %v11017_v17  ;;  %v11125_v56 = vand.u32 4294901760, %v4392_v54 }
 0xa43   : > { %3862 = vadd.xlane.f32.xlu0 %v3861_v5  ;;  %v4016_v27 = vand.u32 4294901760, %v11031_v23  ;;  %v4023_v28 = vand.u32 4294901760, %v11034_v24  ;;  %8900 = vmatprep.subr.mxu0 %v10264_v15  ;;  %v11134_v59 = vsub.f32 %v4391_v55, %v11127_v57  ;;  %v4390_v5 = vld [vmem:[#allocation21 + $0x8] sm:$0xff] }
 0xa44   : > { %v4030_v29 = vand.u32 4294901760, %v11038_v25  ;;  %v4010_v30 = vsub.f32 %v11028_v21, %v4009_v26  ;;  %8901 = vmatpush3.msra.mxu0 %v11019_v18  ;;  %v11130_v58 = vsub.f32 %v4392_v54, %v11125_v56 }
 0xa45   : > { %v4017_v31 = vsub.f32 %v11031_v23, %v4016_v27  ;;  %v4024_v32 = vsub.f32 %v11034_v24, %v4023_v28  ;;  %8902 = vmatprep.subr.mxu0 %v10264_v15  ;;  %v4516_v61 = vand.u32 4294901760, %v11134_v59 }
 0xa46   : > { %v4011_v33 = vand.u32 4294901760, %v4010_v30  ;;  %v4031_v35 = vsub.f32 %v11038_v25, %v4030_v29  ;;  %8903 = vmatpush3.msra.mxu0 %v11025_v20  ;;  %v4509_v60 = vand.u32 4294901760, %v11130_v58  ;;  %v4933_v30 = vld [vmem:[#allocation27 + $0x8] sm:$0xff] }
 0xa47   : > { %v4018_v34 = vand.u32 4294901760, %v4017_v31  ;;  %8918 = vmatprep.subr.mxu0 %v10264_v15  ;;  %v4025_v36 = vand.u32 4294901760, %v4024_v32  ;;  %v4517_v63 = vsub.f32 %v11134_v59, %v4516_v61  ;;  %v4932_v32 = vld [vmem:[#allocation27] sm:$0xff] }
 0xa48   : > { %8908 = vmatpush3.msra.mxu1 %v4011_v33  ;;  %v4032_v37 = vand.u32 4294901760, %v4031_v35  ;;  %v4510_v62 = vsub.f32 %v11130_v58, %v4509_v60 }
 0xa49   : > { %8909 = vmatprep.subr.mxu1 %v10264_v15  ;;  %v4518_v22 = vand.u32 4294901760, %v4517_v63 }
 0xa4a   : > { %8910 = vmatpush3.msra.mxu1 %v4018_v34  ;;  %v4511_v7 = vand.u32 4294901760, %v4510_v62  ;;  %v11203_v34 = vand.u32 4294901760, %v4933_v30 }
 0xa4b   : > { %8911 = vmatprep.subr.mxu1 %v10264_v15 }
 0xa4c   : > { %8912 = vmatpush3.msra.mxu1 %v4025_v36  ;;  %v11212_v36 = vand.u32 4294901760, %v4932_v32 }
 0xa4d   : > { %8913 = vmatprep.subr.mxu1 %v10264_v15 }
 0xa4e   : > { %8914 = vmatpush3.msra.mxu1 %v4032_v37 }
 0xa4f   : > { %8929 = vmatprep.subr.mxu1 %v10264_v15 }
 0xacc   : > { %v3863_v6 = vpop.xlane.xlu0 %3862 }
 0xacd   : > { %v3865_v8 = vmul.f32 0.03125, %v3863_v6  ;;  %v11155_v6 = vand.u32 4294901760, %v4390_v5 }
 0xacf   : > { %v3866_v9 = vsub.f32 %v3857_v4, %v3865_v8  ;;  %v4389_v8 = vld [vmem:[#allocation21] sm:$0xff] }
 0xad1   : > { %v3867_v10 = vmul.f32 %v3866_v9, %v3866_v9 }
 0xad3   : > { %v3868_v11 = vsel %vm3860_vm8, %v3867_v10, 0.0  ;;  %v11161_v10 = vand.u32 4294901760, %v4389_v8 }
 0xad4   : > { %3869 = vadd.xlane.f32.xlu0 %v3868_v11  ;;  %v4388_v11 = vld [vmem:[%s813_s12] sm:$0xff]  ;;  %s10266_s12 = smov 112  }
 0xad5   : > { %v11168_v13 = vsub.f32 %v4389_v8, %v11161_v10  ;;  %v4401_v14 = vsel %vm3860_vm8, %v4388_v11, 0  ;;  %v8317_v11 = vld [vmem:[#allocation24] ss:$0 sm:$0xff] }
 0xb5d   : > { %v3870_v38 = vpop.xlane.xlu0 %3869 }
 0xb5e   : > { %v3871_v39 = vmul.f32 0.03125, %v3870_v38  ;;  %v11221_v38 = vsub.f32 %v4933_v30, %v11203_v34 }
 0xb60   : > { %v3872_v40 = vadd.f32 1e-05, %v3871_v39 }
 0xb62   : > { %9694 = vrsqrt.f32 %v3872_v40  ;;  %v11227_v40 = vsub.f32 %v4932_v32, %v11212_v36 }
 0xb6f   : > { %v9695_v41 = vpop.eup %9694 }
 0xb70   : > { %v3874_v43 = vmul.f32 %v9695_v41, %v3866_v9  ;;  %v11158_v9 = vsub.f32 %v4390_v5, %v11155_v6 }
 0xb72   : > { %v3881_v45 = vmul.f32 %v8313_v42, %v3874_v43  ;;  %v4523_v12 = vand.u32 4294901760, %v11158_v9  ;;  %v5066_v42 = vand.u32 4294901760, %v11221_v38 }
 0xb74   : > { %v11071_v46 = vadd.f32 %v8314_v44, %v3881_v45  ;;  %v5073_v44 = vand.u32 4294901760, %v11227_v40 }
 0xb76   : > { %v4905_v47 = vsel %vm3860_vm8, %v11071_v46, 0.0  ;;  %v3901_v48 = vsel %vm3860_vm8, %v11071_v46, 0 }
 0xb77   : > { %4906 = vadd.xlane.f32.xlu1 %v4905_v47  ;;  %v3972_v49 = vand.u32 4294901760, %v3901_v48  ;;  %v5067_v47 = vsub.f32 %v11221_v38, %v5066_v42 }
 0xb79   : > { %v3973_v50 = vsub.f32 %v3901_v48, %v3972_v49  ;;  %8916 = vmatmul.mubr.f32.vlgmr.msra.gmra.mxu1 %v3972_v49 }
 0xb7a   : > { %8930 = vmatpush3.msra.mxu1 %v11015_v16  ;;  %8937 = vmatprep.mubr.msk.f32.mxu1 %vm10265_vm9, %v10264_v15 }
 0xb7b   : > { %8931 = vmatprep.subr.mxu1 %v10264_v15  ;;  %v3974_v51 = vand.u32 4294901760, %v3973_v50 }
 0xb7c   : > { %8932 = vmatpush3.msra.mxu1 %v11017_v17 }
 0xb7d   : > { %8933 = vmatprep.subr.mxu1 %v10264_v15  ;;  %v3975_v52 = vsub.f32 %v3973_v50, %v3974_v51 }
 0xb7e   : > { %8934 = vmatpush3.msra.mxu1 %v11019_v18 }
 0xb7f   : > { %8935 = vmatprep.subr.mxu1 %v10264_v15  ;;  %v3976_v53 = vand.u32 4294901760, %v3975_v52 }
 0xb80   : > { %8936 = vmatpush3.msra.mxu1 %v11025_v20 }
 0xb81   : > { %8938 = vmatmul.mubr.f32.vlgmr.msra.gmra.mxu1 %v3974_v51  ;;  %8951 = vmatprep.subr.mxu1 %v10264_v15 }
 0xb82   : > { %8905 = vmatmul.mubr.f32.vlgmr.msra.gmra.mxu0 %v3976_v53  ;;  %8952 = vmatpush3.msra.mxu1 %v11015_v16  ;;  %v11172_v16 = vand.u32 4294901760, %v4401_v14 }
 0xb83   : > { %8919 = vmatpush3.msra.mxu0 %v11028_v21  ;;  %8953 = vmatprep.subr.mxu1 %v10264_v15 }
 0xb84   : > { %8920 = vmatprep.subr.mxu0 %v10264_v15  ;;  %8954 = vmatpush3.msra.mxu1 %v11017_v17  ;;  %v4524_v17 = vsub.f32 %v11158_v9, %v4523_v12  ;;  %v4473_v19 = vsub.f32 %v4401_v14, %v11172_v16 }
 0xb85   : > { %8921 = vmatpush3.msra.mxu0 %v11031_v23  ;;  %8955 = vmatprep.subr.mxu1 %v10264_v15 }
 0xb86   : > { %8922 = vmatprep.subr.mxu0 %v10264_v15  ;;  %8956 = vmatpush3.msra.mxu1 %v11019_v18  ;;  %v4530_v18 = vand.u32 4294901760, %v11168_v13  ;;  %v4474_v23 = vand.u32 4294901760, %v4473_v19 }
 0xb87   : > { %8923 = vmatpush3.msra.mxu0 %v11034_v24  ;;  %8957 = vmatprep.subr.mxu1 %v10264_v15 }
 0xb88   : > { %8924 = vmatprep.subr.mxu0 %v10264_v15  ;;  %8926 = vmatprep.mubr.msk.f32.mxu0 %vm10265_vm9, %v10264_v15  ;;  %v4531_v21 = vsub.f32 %v11168_v13, %v4530_v18 }
 0xb89   : > { %8925 = vmatpush3.msra.mxu0 %v11038_v25  ;;  %8958 = vmatpush3.msra.mxu1 %v11025_v20  ;;  %v4525_v20 = vand.u32 4294901760, %v4524_v17  ;;  %v4475_v25 = vsub.f32 %v4473_v19, %v4474_v23 }
 0xb8a   : > { %8959 = vmatprep.mubr.msk.f32.mxu1 %vm10265_vm9, %v10264_v15  ;;  %8927 = vmatmul.mubr.f32.vlgmr.msra.gmra.mxu0 %v3973_v50  ;;  %v4532_v24 = vand.u32 4294901760, %v4531_v21  ;;  %v5068_v50 = vand.u32 4294901760, %v5067_v47 }
 0xb8b   : > { %8940 = vmatprep.subr.mxu0 %v10264_v15  ;;  %8960 = vmatmul.mubr.f32.vlgmr.msra.gmra.mxu1 %v3972_v49 }
 0xb8c   : > { %8941 = vmatpush3.msra.mxu0 %v4009_v26  ;;  %8948 = vmatprep.mubr.msk.f32.mxu0 %vm10265_vm9, %v10264_v15  ;;  %v4935_v26 = vld [vmem:[#allocation27 + $0x18] sm:$0xff] }
 0xb8d   : > { %8942 = vmatprep.subr.mxu0 %v10264_v15  ;;  %8973 = vmatprep.subr.mxu1 %v10264_v15 }
 0xb8e   : > { %8943 = vmatpush3.msra.mxu0 %v4016_v27  ;;  %8981 = vmatprep.mubr.msk.f32.mxu1 %vm10265_vm9, %v10264_v15  ;;  %v4476_v27 = vand.u32 4294901760, %v4475_v25  ;;  %v8316_v25 = vld [vmem:[#allocation23] ss:$0 sm:$0xff] }
 0xb8f   : > { %8944 = vmatprep.subr.mxu0 %v10264_v15  ;;  %8974 = vmatpush3.msra.mxu1 %v4511_v7 }
 0xb90   : > { %8945 = vmatpush3.msra.mxu0 %v4023_v28  ;;  %8975 = vmatprep.subr.mxu1 %v10264_v15  ;;  %v4934_v28 = vld [vmem:[#allocation27 + $0x10] sm:$0xff] }
 0xb91   : > { %8946 = vmatprep.subr.mxu0 %v10264_v15  ;;  %8976 = vmatpush3.msra.mxu1 %v4518_v22  ;;  %v11194_v31 = vand.u32 4294901760, %v4934_v28 }
 0xb92   : > { %8947 = vmatpush3.msra.mxu0 %v4030_v29  ;;  %8977 = vmatprep.subr.mxu1 %v10264_v15  ;;  %v11189_v29 = vand.u32 4294901760, %v4935_v26 }
 0xb93   : > { %8949 = vmatmul.mubr.f32.vlgmr.msra.gmra.mxu0 %v3972_v49  ;;  %8962 = vmatprep.subr.mxu0 %v10264_v15  ;;  %v11210_v35 = vsub.f32 %v4934_v28, %v11194_v31  ;;  %v5074_v49 = vsub.f32 %v11227_v40, %v5073_v44 }
 0xb94   : > { %8970 = vmatprep.mubr.msk.f32.mxu0 %vm10265_vm9, %v10264_v15  ;;  %8963 = vmatpush3.msra.mxu0 %v11125_v56  ;;  %v11201_v33 = vsub.f32 %v4935_v26, %v11189_v29 }
 0xb95   : > { %8964 = vmatprep.subr.mxu0 %v10264_v15  ;;  %8978 = vmatpush3.msra.mxu1 %v4525_v20  ;;  %v5059_v39 = vand.u32 4294901760, %v11210_v35  ;;  %v5075_v51 = vand.u32 4294901760, %v5074_v49  ;;  %v5453_v49 = vld [vmem:[%s12097_s18 + $0x68] sm:$0xff] }
 0xb96   : > { %8965 = vmatpush3.msra.mxu0 %v11127_v57  ;;  %8979 = vmatprep.subr.mxu1 %v10264_v15  ;;  %v5052_v37 = vand.u32 4294901760, %v11201_v33 }
 0xb97   : > { %8966 = vmatprep.subr.mxu0 %v10264_v15  ;;  %8980 = vmatpush3.msra.mxu1 %v4532_v24  ;;  %v5060_v43 = vsub.f32 %v11210_v35, %v5059_v39 }
 0xb98   : > { %8967 = vmatpush3.msra.mxu0 %v11155_v6  ;;  %8995 = vmatprep.subr.mxu1 %v10264_v15  ;;  %v5053_v41 = vsub.f32 %v11201_v33, %v5052_v37 }
 0xb99   : > { %8968 = vmatprep.subr.mxu0 %v10264_v15  ;;  %8982 = vmatmul.mubr.f32.vlgmr.msra.gmra.mxu1 %v11172_v16  ;;  %v5061_v48 = vand.u32 4294901760, %v5060_v43  ;;  %v5455_v43 = vld [vmem:[%s12096_s3 + $0x78] sm:$0xff]  ;;  %s12108_s3 = sld [smem:[#allocation75_spill]] }
 0xb9a   : > { %8969 = vmatpush3.msra.mxu0 %v11161_v10  ;;  %8996 = vmatpush3.msra.mxu1 %v11125_v56  ;;  %v5054_v45 = vand.u32 4294901760, %v5053_v41 }
 0xb9b   : > { %8984 = vmatprep.subr.mxu0 %v10264_v15  ;;  %9003 = vmatprep.mubr.msk.f32.mxu1 %vm10265_vm9, %v10264_v15 }
 0xb9c   : > { %8971 = vmatmul.mubr.f32.vlgmr.msra.gmra.mxu0 %v4476_v27  ;;  %8997 = vmatprep.subr.mxu1 %v10264_v15 }
 0xb9d   : > { %8985 = vmatpush3.msra.mxu0 %v11130_v58  ;;  %8998 = vmatpush3.msra.mxu1 %v11127_v57  ;;  %v8315_v58 = vld [vmem:[#allocation20] ss:$0 sm:$0xff] }
 0xb9e   : > { %8986 = vmatprep.subr.mxu0 %v10264_v15  ;;  %8999 = vmatprep.subr.mxu1 %v10264_v15 }
 0xb9f   : > { %8987 = vmatpush3.msra.mxu0 %v11134_v59  ;;  %9000 = vmatpush3.msra.mxu1 %v11155_v6 }
 0xba0   : > { %8988 = vmatprep.subr.mxu0 %v10264_v15  ;;  %9001 = vmatprep.subr.mxu1 %v10264_v15 }
 0xba1   : > { %8989 = vmatpush3.msra.mxu0 %v11158_v9  ;;  %9002 = vmatpush3.msra.mxu1 %v11161_v10 }
 0xba2   : > { %8990 = vmatprep.subr.mxu0 %v10264_v15  ;;  %9017 = vmatprep.subr.mxu1 %v10264_v15 }
 0xba3   : > { %8991 = vmatpush3.msra.mxu0 %v11168_v13  ;;  %8992 = vmatprep.mubr.msk.f32.mxu0 %vm10265_vm9, %v10264_v15  ;;  %v8318_v13 = vld [vmem:[#allocation26] ss:$0 sm:$0xff] }
 0xba4   : > { %9004 = vmatmul.mubr.f32.vlgmr.msra.gmra.mxu1 %v4474_v23  ;;  %9006 = vmatprep.subr.mxu0 %v10264_v15 }
 0xba5   : > { %9018 = vmatpush3.msra.mxu1 %v11125_v56  ;;  %8993 = vmatmul.mubr.f32.vlgmr.msra.gmra.mxu0 %v4473_v19 }
 0xba6   : > { %9007 = vmatpush3.msra.mxu0 %v4509_v60  ;;  %9019 = vmatprep.subr.mxu1 %v10264_v15 }
 0xba7   : > { %9008 = vmatprep.subr.mxu0 %v10264_v15  ;;  %9020 = vmatpush3.msra.mxu1 %v11127_v57 }
 0xba8   : > { %9009 = vmatpush3.msra.mxu0 %v4516_v61  ;;  %9021 = vmatprep.subr.mxu1 %v10264_v15 }
 0xba9   : > { %9010 = vmatprep.subr.mxu0 %v10264_v15  ;;  %9022 = vmatpush3.msra.mxu1 %v11155_v6 }
 0xbaa   : > { %9011 = vmatpush3.msra.mxu0 %v4523_v12  ;;  %9023 = vmatprep.subr.mxu1 %v10264_v15 }
 0xbab   : > { %9012 = vmatprep.subr.mxu0 %v10264_v15  ;;  %9024 = vmatpush3.msra.mxu1 %v11161_v10 }
 0xbac   : > { %9013 = vmatpush3.msra.mxu0 %v4530_v18  ;;  %9014 = vmatprep.mubr.msk.f32.mxu0 %vm10265_vm9, %v10264_v15 }
 0xbad   : > { %9025 = vmatprep.mubr.msk.f32.mxu1 %vm10265_vm9, %v10264_v15  ;;  %9039 = vmatprep.subr.mxu1 %v10264_v15 }
 0xbae   : > { %9015 = vmatmul.mubr.f32.vlgmr.msra.gmra.mxu0 %v11172_v16  ;;  %9026 = vmatmul.mubr.f32.vlgmr.msra.gmra.mxu1 %v11172_v16 }
 0xbaf   : > { %9040 = vmatpush3.msra.mxu1 %v5054_v45  ;;  %9028 = vmatprep.subr.mxu0 %v10264_v15  ;;  %v5454_v45 = vld [vmem:[%s12097_s18 + $0x70] sm:$0xff] }
 0xbb0   : > { %9041 = vmatprep.subr.mxu1 %v10264_v15  ;;  %9047 = vmatprep.mubr.msk.f32.mxu1 %vm10265_vm9, %v10264_v15 }
 0xbb1   : > { %9042 = vmatpush3.msra.mxu1 %v5061_v48  ;;  %9029 = vmatpush3.msra.mxu0 %v11189_v29  ;;  %v11350_v48 = vand.u32 4294901760, %v5454_v45 }
 0xbb2   : > { %9043 = vmatprep.subr.mxu1 %v10264_v15  ;;  %9030 = vmatprep.subr.mxu0 %v10264_v15 }
 0xbb3   : > { %9044 = vmatpush3.msra.mxu1 %v5068_v50  ;;  %9031 = vmatpush3.msra.mxu0 %v11194_v31 }
 0xbb4   : > { %9045 = vmatprep.subr.mxu1 %v10264_v15  ;;  %9032 = vmatprep.subr.mxu0 %v10264_v15 }
 0xbb5   : > { %9046 = vmatpush3.msra.mxu1 %v5075_v51  ;;  %9033 = vmatpush3.msra.mxu0 %v11203_v34  ;;  %v11359_v51 = vsub.f32 %v5454_v45, %v11350_v48  ;;  %v5440_v45 = vld [vmem:[%s12097_s18] sm:$0xff] }
 0xbb6   : > { %9061 = vmatprep.subr.mxu1 %v10264_v15  ;;  %9034 = vmatprep.subr.mxu0 %v10264_v15 }
 0xbb7   : > { %9035 = vmatpush3.msra.mxu0 %v11212_v36  ;;  %9036 = vmatprep.mubr.msk.f32.mxu0 %vm10265_vm9, %v10264_v15 }
 0xbb8   : > { %9050 = vmatprep.subr.mxu0 %v10264_v15 }
 0xc00   : > { %v4907_v0 = vpop.xlane.xlu1 %4906 }
 0xc01   : > { %v4908_v1 = vmul.f32 0.03125, %v4907_v0 }
 0xc03   : > { %v11150_v2 = vsub.f32 %v11071_v46, %v4908_v1 }
 0xc05   : > { %v4910_v3 = vmul.f32 %v11150_v2, %v11150_v2 }
 0xc07   : > { %v4911_v4 = vsel %vm3860_vm8, %v4910_v3, 0.0 }
 0xc08   : > { %4912 = vadd.xlane.f32.xlu1 %v4911_v4 }
 0xc39   : > { %v4069_v52 = vpop.f32.mrf.mxu1 }
 0xc3b   : > { %v8917_v53 = vpop.f32.mrf.mxu1 }
 0xc3c   : > { %v5452_v53 = vld [vmem:[%s12097_s18 + $0x60] sm:$0xff] }
 0xc41   : > { %v4226_v54 = vpop.f32.mrf.mxu1 }
 0xc42   : > { %v3978_v55 = vpop.f32.mrf.mxu0 }
 0xc43   : > { %v8939_v56 = vpop.f32.mrf.mxu1  ;;  %v3979_v59 = vadd.f32 %v8315_v58, %v3978_v55  ;;  %v5557_v55 = vand.u32 4294901760, %v11359_v51  ;;  %v5451_v58 = vld [vmem:[%s12097_s18 + $0x58] sm:$0xff] }
 0xc44   : > { %v8906_v57 = vpop.f32.mrf.mxu0 }
 0xc45   : > { %v4070_v62 = vadd.f32 %v4069_v52, %v3979_v59  ;;  %v11361_v52 = vand.u32 4294901760, %v5453_v49  ;;  %v11375_v57 = vand.u32 4294901760, %v5452_v53 }
 0xc47   : > { %v11373_v56 = vsub.f32 %v5453_v49, %v11361_v52 }
 0xc4a   : > { %v4149_v60 = vpop.f32.mrf.mxu0 }
 0xc4b   : > { %v4384_v61 = vpop.f32.mrf.mxu1  ;;  %v4150_v22 = vadd.f32 %v4149_v60, %v4070_v62  ;;  %v5558_v60 = vsub.f32 %v11359_v51, %v5557_v55  ;;  %v11387_v62 = vsub.f32 %v5452_v53, %v11375_v57 }
 0xc4c   : > { %v8928_v63 = vpop.f32.mrf.mxu0 }
 0xc4d   : > { %v8961_v7 = vpop.f32.mrf.mxu1  ;;  %v4227_v0 = vadd.f32 %v4226_v54, %v4150_v22  ;;  %v11390_v63 = vand.u32 4294901760, %v5451_v58  ;;  %v5559_v22 = vand.u32 4294901760, %v5558_v60 }
 0xc4e   : > { %v5450_v7 = vld [vmem:[%s12097_s18 + $0x50] sm:$0xff] }
 0xc53   : > { %v4309_v1 = vpop.f32.mrf.mxu0 }
 0xc54   : > { %v4310_v3 = vadd.f32 %v4309_v1, %v4227_v0  ;;  %v5571_v1 = vand.u32 4294901760, %v11387_v62 }
 0xc55   : > { %v8950_v4 = vpop.f32.mrf.mxu0 }
 0xc56   : > { %v4385_v5 = vadd.f32 %v4384_v61, %v4310_v3  ;;  %v5564_v61 = vand.u32 4294901760, %v11373_v56  ;;  %v11400_v3 = vand.u32 4294901760, %v5450_v7  ;;  %v11404_v4 = vsub.f32 %v5451_v58, %v11390_v63 }
 0xc58   : > { %4889 = vst.msk [vmem:[#allocation6] sm:$0xff] %vm4888_vm10, %v4385_v5  ;;  %4892 = vrot.lane.b32.xlu0 %v4385_v5, %s10266_s12  ;;  %v5565_v0 = vsub.f32 %v11373_v56, %v5564_v61  ;;  %v5449_v5 = vld [vmem:[%s12097_s18 + $0x48] sm:$0xff] }
 0xc59   : > { %v4569_v24 = vpop.f32.mrf.mxu1 }
 0xc5b   : > { %v8983_v27 = vpop.f32.mrf.mxu1 }
 0xc5c   : > { %v4478_v26 = vpop.f32.mrf.mxu0 }
 0xc5e   : > { %v8972_v28 = vpop.f32.mrf.mxu0 }
 0xc65   : > { %v4649_v32 = vpop.f32.mrf.mxu0 }
 0xc91   : > { %v4913_v6 = vpop.xlane.xlu1 %4912 }
 0xc92   : > { %v4914_v8 = vmul.f32 0.03125, %v4913_v6  ;;  %v5566_v6 = vand.u32 4294901760, %v5565_v0 }
 0xc94   : > { %v4915_v9 = vadd.f32 1e-05, %v4914_v8  ;;  %v5572_v8 = vsub.f32 %v11387_v62, %v5571_v1 }
 0xc96   : > { %9696 = vrsqrt.f32 %v4915_v9  ;;  %v11414_v9 = vsub.f32 %v5450_v7, %v11400_v3 }
 0xca3   : > { %v9697_v10 = vpop.eup %9696 }
 0xca4   : > { %v4917_v12 = vmul.f32 %v9697_v10, %v11150_v2  ;;  %v11416_v10 = vand.u32 4294901760, %v5449_v5 }
 0xca6   : > { %v4924_v14 = vmul.f32 %v8317_v11, %v4917_v12  ;;  %v5578_v11 = vand.u32 4294901760, %v11404_v4  ;;  %v5448_v12 = vld [vmem:[%s12097_s18 + $0x40] sm:$0xff] }
 0xca8   : > { %v4931_v16 = vadd.f32 %v8318_v13, %v4924_v14  ;;  %v5573_v13 = vand.u32 4294901760, %v5572_v8  ;;  %v5585_v14 = vand.u32 4294901760, %v11414_v9  ;;  %v11529_v8 = vand.u32 4294901760, %v5440_v45 }
 0xcaa   : > { %v4944_v17 = vsel %vm3860_vm8, %v4931_v16, 0  ;;  %v11427_v16 = vsub.f32 %v5449_v5, %v11416_v10 }
 0xcab   : > { %v5015_v18 = vand.u32 4294901760, %v4944_v17 }
 0xcad   : > { %v5016_v19 = vsub.f32 %v4944_v17, %v5015_v18  ;;  %9048 = vmatmul.mubr.f32.vlgmr.msra.gmra.mxu1 %v5015_v18  ;;  %v11429_v17 = vand.u32 4294901760, %v5448_v12 }
 0xcae   : > { %9062 = vmatpush3.msra.mxu1 %v11189_v29  ;;  %9069 = vmatprep.mubr.msk.f32.mxu1 %vm10265_vm9, %v10264_v15 }
 0xcaf   : > { %9063 = vmatprep.subr.mxu1 %v10264_v15  ;;  %v5017_v20 = vand.u32 4294901760, %v5016_v19 }
 0xcb0   : > { %9064 = vmatpush3.msra.mxu1 %v11194_v31 }
 0xcb1   : > { %9065 = vmatprep.subr.mxu1 %v10264_v15  ;;  %v5018_v2 = vsub.f32 %v5016_v19, %v5017_v20 }
 0xcb2   : > { %9066 = vmatpush3.msra.mxu1 %v11203_v34 }
 0xcb3   : > { %9067 = vmatprep.subr.mxu1 %v10264_v15  ;;  %v5019_v21 = vand.u32 4294901760, %v5018_v2  ;;  %v11999_v2 = vand.u32 4294901760, %v11427_v16 }
 0xcb4   : > { %9068 = vmatpush3.msra.mxu1 %v11212_v36 }
 0xcb5   : > { %9070 = vmatmul.mubr.f32.vlgmr.msra.gmra.mxu1 %v5017_v20  ;;  %9083 = vmatprep.subr.mxu1 %v10264_v15  ;;  %v5586_v20 = vsub.f32 %v11414_v9, %v5585_v14  ;;  %v5593_v27 = vsub.f32 %v11427_v16, %v11999_v2 }
 0xcb6   : > { %9037 = vmatmul.mubr.f32.vlgmr.msra.gmra.mxu0 %v5019_v21  ;;  %9084 = vmatpush3.msra.mxu1 %v11189_v29  ;;  %v4479_v29 = vadd.f32 %v8316_v25, %v4478_v26  ;;  %v11445_v21 = vsub.f32 %v5448_v12, %v11429_v17  ;;  %v5446_v25 = vld [vmem:[%s12097_s18 + $0x30] sm:$0xff] }
 0xcb7   : > { %9051 = vmatpush3.msra.mxu0 %v11201_v33  ;;  %9085 = vmatprep.subr.mxu1 %v10264_v15  ;;  %v5587_v26 = vand.u32 4294901760, %v5586_v20 }
 0xcb8   : > { %9052 = vmatprep.subr.mxu0 %v10264_v15  ;;  %9086 = vmatpush3.msra.mxu1 %v11194_v31  ;;  %v4570_v30 = vadd.f32 %v4569_v24, %v4479_v29  ;;  %v4726_v31 = vpop.f32.mrf.mxu1  ;;  %v11998_v28 = vand.u32 4294901760, %v11445_v21 }
 0xcb9   : > { %9053 = vmatpush3.msra.mxu0 %v11210_v35  ;;  %9087 = vmatprep.subr.mxu1 %v10264_v15  ;;  %v8994_v35 = vpop.f32.mrf.mxu0 }
 0xcba   : > { %9054 = vmatprep.subr.mxu0 %v10264_v15  ;;  %9088 = vmatpush3.msra.mxu1 %v11203_v34  ;;  %v9005_v33 = vpop.f32.mrf.mxu1  ;;  %v4650_v34 = vadd.f32 %v4649_v32, %v4570_v30  ;;  %v11463_v30 = vand.u32 4294901760, %v5446_v25  ;;  %v5594_v32 = vand.u32 4294901760, %v5593_v27 }
 0xcbb   : > { %9055 = vmatpush3.msra.mxu0 %v11221_v38  ;;  %9089 = vmatprep.subr.mxu1 %v10264_v15  ;;  %v5600_v33 = vsub.f32 %v11445_v21, %v11998_v28 }
 0xcbc   : > { %9056 = vmatprep.subr.mxu0 %v10264_v15  ;;  %9058 = vmatprep.mubr.msk.f32.mxu0 %vm10265_vm9, %v10264_v15  ;;  %v4884_v38 = vpop.f32.mrf.mxu1 }
 0xcbd   : > { %9057 = vmatpush3.msra.mxu0 %v11227_v40  ;;  %9090 = vmatpush3.msra.mxu1 %v11212_v36  ;;  %v4727_v36 = vadd.f32 %v4726_v31, %v4650_v34  ;;  %v5445_v31 = vld [vmem:[%s12097_s18 + $0x28] sm:$0xff]  ;;  %v5601_v49 = vand.u32 4294901760, %v5600_v33 }
 0xcbe   : > { %9091 = vmatprep.mubr.msk.f32.mxu1 %vm10265_vm9, %v10264_v15  ;;  %9059 = vmatmul.mubr.f32.vlgmr.msra.gmra.mxu0 %v5016_v19  ;;  %v9027_v40 = vpop.f32.mrf.mxu1  ;;  %v5447_v19 = vld [vmem:[%s12097_s18 + $0x38] sm:$0xff]  ;;  %v11474_v35 = vand.u32 4294901760, %v5445_v31 }
 0xcbf   : > { %9072 = vmatprep.subr.mxu0 %v10264_v15  ;;  %9092 = vmatmul.mubr.f32.vlgmr.msra.gmra.mxu1 %v5015_v18 }
 0xcc0   : > { %9073 = vmatpush3.msra.mxu0 %v5052_v37  ;;  %9080 = vmatprep.mubr.msk.f32.mxu0 %vm10265_vm9, %v10264_v15  ;;  %v4809_v37 = vpop.f32.mrf.mxu0 }
 0xcc1   : > { %9074 = vmatprep.subr.mxu0 %v10264_v15  ;;  %9129 = vmatprep.subr.mxu1 %v10264_v15 }
 0xcc2   : > { %9075 = vmatpush3.msra.mxu0 %v5059_v39  ;;  %9161 = vmatprep.mubr.msk.f32.mxu1 %vm10265_vm9, %v10264_v15  ;;  %v4810_v39 = vadd.f32 %v4809_v37, %v4727_v36  ;;  %v9016_v41 = vpop.f32.mrf.mxu0  ;;  %v5444_v36 = vld [vmem:[%s12097_s18 + $0x20] sm:$0xff]  ;;  %v5443_v37 = vld [vmem:[%s12097_s18 + $0x18] sm:$0xff] }
 0xcc3   : > { %9076 = vmatprep.subr.mxu0 %v10264_v15  ;;  %v11489_v40 = vand.u32 4294901760, %v5444_v36  ;;  %v11491_v41 = vand.u32 4294901760, %v5443_v37 }
 0xcc4   : > { %9077 = vmatpush3.msra.mxu0 %v5066_v42  ;;  %v4885_v42 = vadd.f32 %v4884_v38, %v4810_v39  ;;  %v5442_v38 = vld [vmem:[%s12097_s18 + $0x10] sm:$0xff]  ;;  %v11487_v39 = vsub.f32 %v5446_v25, %v11463_v30 }
 0xcc5   : > { %9078 = vmatprep.subr.mxu0 %v10264_v15  ;;  %v11514_v60 = vsub.f32 %v5444_v36, %v11489_v40  ;;  %v11517_v7 = vsub.f32 %v5443_v37, %v11491_v41 }
 0xcc6   : > { %9079 = vmatpush3.msra.mxu0 %v5073_v44  ;;  %4890 = vst.msk [vmem:[#allocation7] sm:$0xff] %vm4888_vm10, %v4885_v42  ;;  %4898 = vrot.lane.b32.xlu1 %v4885_v42, %s10266_s12  ;;  %v11342_v44 = vand.u32 4294901760, %v5455_v43  ;;  %v11494_v42 = vand.u32 4294901760, %v5442_v38 }
 0xcc7   : > { %9081 = vmatmul.mubr.f32.vlgmr.msra.gmra.mxu0 %v5015_v18  ;;  %9094 = vmatprep.subr.mxu0 %v10264_v15  ;;  %v5579_v18 = vsub.f32 %v11404_v4, %v5578_v11 }
 0xcc8   : > { %9126 = vmatprep.mubr.msk.f32.mxu0 %vm10265_vm9, %v10264_v15  ;;  %v11348_v47 = vsub.f32 %v5455_v43, %v11342_v44  ;;  %9095 = vmatpush3.msra.mxu0 %v11342_v44  ;;  %v5441_v43 = vld [vmem:[%s12097_s18 + $0x8] sm:$0xff] }
 0xcc9   : > { %9096 = vmatprep.subr.mxu0 %v10264_v15  ;;  %v5580_v24 = vand.u32 4294901760, %v5579_v18  ;;  %v11510_v58 = vand.u32 4294901760, %v5441_v43  ;;  %v11993_v18 = vand.u32 4294901760, %v11517_v7 }
 0xcca   : > { %v4893_v23 = vpop.permute.xlu0 %4892  ;;  %v5550_v50 = vand.u32 4294901760, %v11348_v47  ;;  %9097 = vmatpush3.msra.mxu0 %v11350_v48 }
 0xccb   : > { %4896 = vst.msk [vmem:[#allocation6 + $0x8] sm:$0xff] %vm4888_vm10, %v4893_v23  ;;  %9098 = vmatprep.subr.mxu0 %v10264_v15  ;;  %v11447_v23 = vand.u32 4294901760, %v5447_v19  ;;  %v5635_v27 = vsub.f32 %v11517_v7, %v11993_v18 }
 0xccc   : > { %v5551_v54 = vsub.f32 %v11348_v47, %v5550_v50  ;;  %9099 = vmatpush3.msra.mxu0 %v11361_v52 }
 0xccd   : > { %9100 = vmatprep.subr.mxu0 %v10264_v15  ;;  %v11460_v29 = vsub.f32 %v5447_v19, %v11447_v23 }
 0xcce   : > { %v5552_v59 = vand.u32 4294901760, %v5551_v54  ;;  %9101 = vmatpush3.msra.mxu0 %v11375_v57  ;;  %v11507_v54 = vsub.f32 %v5445_v31, %v11474_v35 }
 0xccf   : > { %9102 = vmatprep.subr.mxu0 %v10264_v15  ;;  %v11997_v34 = vand.u32 4294901760, %v11460_v29 }
 0xcd0   : > { %9130 = vmatpush3.msra.mxu1 %v5552_v59  ;;  %9103 = vmatpush3.msra.mxu0 %v11390_v63  ;;  %v11996_v59 = vand.u32 4294901760, %v11487_v39  ;;  %v11995_v5 = vand.u32 4294901760, %v11507_v54 }
 0xcd1   : > { %9131 = vmatprep.subr.mxu1 %v10264_v15  ;;  %9104 = vmatprep.subr.mxu0 %v10264_v15  ;;  %v5607_v53 = vsub.f32 %v11460_v29, %v11997_v34 }
 0xcd2   : > { %9132 = vmatpush3.msra.mxu1 %v5559_v22  ;;  %9105 = vmatpush3.msra.mxu0 %v11400_v3  ;;  %v11520_v22 = vsub.f32 %v5442_v38, %v11494_v42  ;;  %v5614_v12 = vsub.f32 %v11487_v39, %v11996_v59  ;;  %v5621_v20 = vsub.f32 %v11507_v54, %v11995_v5  ;;  %v5636_v38 = vand.u32 4294901760, %v5635_v27 }
 0xcd3   : > { %9133 = vmatprep.subr.mxu1 %v10264_v15  ;;  %9106 = vmatprep.subr.mxu0 %v10264_v15  ;;  %v5608_v0 = vand.u32 4294901760, %v5607_v53 }
 0xcd4   : > { %9134 = vmatpush3.msra.mxu1 %v5566_v6  ;;  %9107 = vmatpush3.msra.mxu0 %v11416_v10  ;;  %v11526_v6 = vsub.f32 %v5441_v43, %v11510_v58  ;;  %v11992_v19 = vand.u32 4294901760, %v11520_v22  ;;  %v5615_v25 = vand.u32 4294901760, %v5614_v12 }
 0xcd5   : > { %9135 = vmatprep.subr.mxu1 %v10264_v15  ;;  %9108 = vmatprep.subr.mxu0 %v10264_v15 }
 0xcd6   : > { %9136 = vmatpush3.msra.mxu1 %v5573_v13  ;;  %9109 = vmatpush3.msra.mxu0 %v11429_v17  ;;  %v11994_v13 = vand.u32 4294901760, %v11514_v60  ;;  %v11991_v31 = vand.u32 4294901760, %v11526_v6  ;;  %v5642_v36 = vsub.f32 %v11520_v22, %v11992_v19 }
 0xcd7   : > { %9137 = vmatprep.subr.mxu1 %v10264_v15  ;;  %9110 = vmatprep.subr.mxu0 %v10264_v15 }
 0xcd8   : > { %9138 = vmatpush3.msra.mxu1 %v5580_v24  ;;  %9111 = vmatpush3.msra.mxu0 %v11447_v23  ;;  %v11543_v24 = vsub.f32 %v5440_v45, %v11529_v8  ;;  %v5649_v43 = vsub.f32 %v11526_v6, %v11991_v31  ;;  %v5643_v45 = vand.u32 4294901760, %v5642_v36  ;;  %v8319_v36 = vld [vmem:[#allocation29] ss:$0 sm:$0xff] }
 0xcd9   : > { %9139 = vmatprep.subr.mxu1 %v10264_v15  ;;  %9112 = vmatprep.subr.mxu0 %v10264_v15 }
 0xcda   : > { %9140 = vmatpush3.msra.mxu1 %v5587_v26  ;;  %9113 = vmatpush3.msra.mxu0 %v11463_v30  ;;  %v5628_v26 = vsub.f32 %v11514_v60, %v11994_v13  ;;  %v11990_v37 = vand.u32 4294901760, %v11543_v24  ;;  %v5650_v53 = vand.u32 4294901760, %v5649_v43 }
 0xcdb   : > { %9141 = vmatprep.subr.mxu1 %v10264_v15  ;;  %9114 = vmatprep.subr.mxu0 %v10264_v15 }
 0xcdc   : > { %9142 = vmatpush3.msra.mxu1 %v5594_v32  ;;  %9115 = vmatpush3.msra.mxu0 %v11474_v35  ;;  %v5622_v32 = vand.u32 4294901760, %v5621_v20  ;;  %v5629_v33 = vand.u32 4294901760, %v5628_v26 }
 0xcdd   : > { %9143 = vmatprep.subr.mxu1 %v10264_v15  ;;  %9116 = vmatprep.subr.mxu0 %v10264_v15 }
 0xcde   : > { %9144 = vmatpush3.msra.mxu1 %v5601_v49  ;;  %9117 = vmatpush3.msra.mxu0 %v11489_v40  ;;  %v5656_v49 = vsub.f32 %v11543_v24, %v11990_v37 }
 0xcdf   : > { %9145 = vmatprep.subr.mxu1 %v10264_v15  ;;  %9118 = vmatprep.subr.mxu0 %v10264_v15 }
 0xce0   : > { %9146 = vmatpush3.msra.mxu1 %v5608_v0  ;;  %9119 = vmatpush3.msra.mxu0 %v11491_v41  ;;  %v5657_v0 = vand.u32 4294901760, %v5656_v49 }
 0xce1   : > { %9147 = vmatprep.subr.mxu1 %v10264_v15  ;;  %9120 = vmatprep.subr.mxu0 %v10264_v15 }
 0xce2   : > { %9148 = vmatpush3.msra.mxu1 %v5615_v25  ;;  %9121 = vmatpush3.msra.mxu0 %v11494_v42 }
 0xce3   : > { %9149 = vmatprep.subr.mxu1 %v10264_v15  ;;  %9122 = vmatprep.subr.mxu0 %v10264_v15 }
 0xce4   : > { %9150 = vmatpush3.msra.mxu1 %v5622_v32  ;;  %9123 = vmatpush3.msra.mxu0 %v11510_v58 }
 0xce5   : > { %9151 = vmatprep.subr.mxu1 %v10264_v15  ;;  %9124 = vmatprep.subr.mxu0 %v10264_v15 }
 0xce6   : > { %9152 = vmatpush3.msra.mxu1 %v5629_v33  ;;  %9125 = vmatpush3.msra.mxu0 %v11529_v8 }
 0xce7   : > { %9153 = vmatprep.subr.mxu1 %v10264_v15  ;;  %9164 = vmatprep.subr.mxu0 %v10264_v15 }
 0xce8   : > { %9154 = vmatpush3.msra.mxu1 %v5636_v38 }
 0xce9   : > { %9155 = vmatprep.subr.mxu1 %v10264_v15 }
 0xcea   : > { %9156 = vmatpush3.msra.mxu1 %v5643_v45 }
 0xceb   : > { %9157 = vmatprep.subr.mxu1 %v10264_v15 }
 0xcec   : > { %9158 = vmatpush3.msra.mxu1 %v5650_v53 }
 0xced   : > { %9159 = vmatprep.subr.mxu1 %v10264_v15 }
 0xcee   : > { %9160 = vmatpush3.msra.mxu1 %v5657_v0 }
 0xcef   : > { %9199 = vmatprep.subr.mxu1 %v10264_v15 }
 0xd38   : > { %v4899_v12 = vpop.permute.xlu1 %4898 }
 0xd39   : > { %4902 = vst.msk [vmem:[#allocation7 + $0x8] sm:$0xff] %vm4888_vm10, %v4899_v12 }
 0xd6d   : > { %v5112_v20 = vpop.f32.mrf.mxu1 }
 0xd6f   : > { %v9049_v25 = vpop.f32.mrf.mxu1 }
 0xd75   : > { %v5269_v26 = vpop.f32.mrf.mxu1 }
 0xd76   : > { %v5021_v27 = vpop.f32.mrf.mxu0 }
 0xd77   : > { %v9071_v32 = vpop.f32.mrf.mxu1  ;;  %v5022_v38 = vadd.f32 %v8319_v36, %v5021_v27 }
 0xd78   : > { %v9038_v33 = vpop.f32.mrf.mxu0 }
 0xd79   : > { %v5113_v49 = vadd.f32 %v5112_v20, %v5022_v38 }
 0xd7e   : > { %v5192_v43 = vpop.f32.mrf.mxu0 }
 0xd7f   : > { %v5427_v45 = vpop.f32.mrf.mxu1  ;;  %v5193_v31 = vadd.f32 %v5192_v43, %v5113_v49 }
 0xd80   : > { %v9060_v53 = vpop.f32.mrf.mxu0 }
 0xd81   : > { %v9093_v37 = vpop.f32.mrf.mxu1  ;;  %v5270_v0 = vadd.f32 %v5269_v26, %v5193_v31 }
 0xd87   : > { %v5352_v19 = vpop.f32.mrf.mxu0 }
 0xd88   : > { %v5353_v18 = vadd.f32 %v5352_v19, %v5270_v0 }
 0xd89   : > { %v9082_v13 = vpop.f32.mrf.mxu0 }
 0xd8a   : > { %v5428_v5 = vadd.f32 %v5427_v45, %v5353_v18 }
 0xd8c   : > { %v5431_v12 = vmul.f32 %v5428_v5, %v5428_v5 }
 0xd8e   : > { %v5432_v59 = vmul.f32 %v5431_v12, %v5428_v5 }
 0xd90   : > { %v5433_v25 = vmul.f32 0.044715, %v5432_v59 }
 0xd92   : > { %v5434_v34 = vadd.f32 %v5433_v25, %v5428_v5 }
 0xd94   : > { %v5435_v28 = vmul.f32 0.7978846, %v5434_v34 }
 0xd96   : > { %9698 = vtanh.f32 %v5435_v28 }
 0xda3   : > { %v9699_v32 = vpop.eup %9698 }
 0xda4   : > { %v5437_v33 = vadd.f32 1.0, %v9699_v32 }
 0xda6   : > { %v5438_v27 = vmul.f32 0.5, %v5437_v33 }
 0xda8   : > { %v5439_v36 = vmul.f32 %v5438_v27, %v5428_v5 }
 0xdaa   : > { %v11580_v2 = vand.u32 4294901760, %v5439_v36 }
 0xdac   : > { %v11583_v37 = vsub.f32 %v5439_v36, %v11580_v2  ;;  %9162 = vmatmul.mubr.f32.vlgmr.msra.gmra.mxu1 %v11580_v2 }
 0xdad   : > { %9200 = vmatpush3.msra.mxu1 %v11342_v44  ;;  %9231 = vmatprep.mubr.msk.f32.mxu1 %vm10265_vm9, %v10264_v15 }
 0xdae   : > { %9201 = vmatprep.subr.mxu1 %v10264_v15  ;;  %v5539_v28 = vand.u32 4294901760, %v11583_v37 }
 0xdaf   : > { %9202 = vmatpush3.msra.mxu1 %v11350_v48 }
 0xdb0   : > { %9203 = vmatprep.subr.mxu1 %v10264_v15  ;;  %v5540_v34 = vsub.f32 %v11583_v37, %v5539_v28 }
 0xdb1   : > { %9204 = vmatpush3.msra.mxu1 %v11361_v52 }
 0xdb2   : > { %9205 = vmatprep.subr.mxu1 %v10264_v15  ;;  %v5541_v59 = vand.u32 4294901760, %v5540_v34 }
 0xdb3   : > { %9206 = vmatpush3.msra.mxu1 %v11375_v57 }
 0xdb4   : > { %9207 = vmatprep.subr.mxu1 %v10264_v15  ;;  %9127 = vmatmul.mubr.f32.vlgmr.msra.gmra.mxu0 %v5541_v59 }
 0xdb5   : > { %9165 = vmatpush3.msra.mxu0 %v11348_v47  ;;  %9208 = vmatpush3.msra.mxu1 %v11390_v63  ;;  %v12099_v47 = vand.u32 4294901760, %v11445_v21 }
 0xdb6   : > { %9166 = vmatprep.subr.mxu0 %v10264_v15  ;;  %9209 = vmatprep.subr.mxu1 %v10264_v15 }
 0xdb7   : > { %9167 = vmatpush3.msra.mxu0 %v11359_v51  ;;  %9210 = vmatpush3.msra.mxu1 %v11400_v3  ;;  %v12102_v51 = vand.u32 4294901760, %v11507_v54 }
 0xdb8   : > { %9168 = vmatprep.subr.mxu0 %v10264_v15  ;;  %9211 = vmatprep.subr.mxu1 %v10264_v15 }
 0xdb9   : > { %9169 = vmatpush3.msra.mxu0 %v11373_v56  ;;  %9212 = vmatpush3.msra.mxu1 %v11416_v10  ;;  %v12105_v56 = vand.u32 4294901760, %v11520_v22 }
 0xdba   : > { %9170 = vmatprep.subr.mxu0 %v10264_v15  ;;  %9213 = vmatprep.subr.mxu1 %v10264_v15 }
 0xdbb   : > { %9171 = vmatpush3.msra.mxu0 %v11387_v62  ;;  %9214 = vmatpush3.msra.mxu1 %v11429_v17 }
 0xdbc   : > { %9172 = vmatprep.subr.mxu0 %v10264_v15  ;;  %9215 = vmatprep.subr.mxu1 %v10264_v15 }
 0xdbd   : > { %9173 = vmatpush3.msra.mxu0 %v11404_v4  ;;  %9216 = vmatpush3.msra.mxu1 %v11447_v23 }
 0xdbe   : > { %9174 = vmatprep.subr.mxu0 %v10264_v15  ;;  %9217 = vmatprep.subr.mxu1 %v10264_v15 }
 0xdbf   : > { %9175 = vmatpush3.msra.mxu0 %v11414_v9  ;;  %9218 = vmatpush3.msra.mxu1 %v11463_v30 }
 0xdc0   : > { %9176 = vmatprep.subr.mxu0 %v10264_v15  ;;  %9219 = vmatprep.subr.mxu1 %v10264_v15 }
 0xdc1   : > { %9177 = vmatpush3.msra.mxu0 %v11427_v16  ;;  %9220 = vmatpush3.msra.mxu1 %v11474_v35 }
 0xdc2   : > { %9178 = vmatprep.subr.mxu0 %v10264_v15  ;;  %9221 = vmatprep.subr.mxu1 %v10264_v15 }
 0xdc3   : > { %9179 = vmatpush3.msra.mxu0 %v11445_v21  ;;  %9222 = vmatpush3.msra.mxu1 %v11489_v40 }
 0xdc4   : > { %9180 = vmatprep.subr.mxu0 %v10264_v15  ;;  %9223 = vmatprep.subr.mxu1 %v10264_v15 }
 0xdc5   : > { %9181 = vmatpush3.msra.mxu0 %v11460_v29  ;;  %9224 = vmatpush3.msra.mxu1 %v11491_v41 }
 0xdc6   : > { %9182 = vmatprep.subr.mxu0 %v10264_v15  ;;  %9225 = vmatprep.subr.mxu1 %v10264_v15 }
 0xdc7   : > { %9183 = vmatpush3.msra.mxu0 %v11487_v39  ;;  %9226 = vmatpush3.msra.mxu1 %v11494_v42 }
 0xdc8   : > { %9184 = vmatprep.subr.mxu0 %v10264_v15  ;;  %9227 = vmatprep.subr.mxu1 %v10264_v15 }
 0xdc9   : > { %9185 = vmatpush3.msra.mxu0 %v11507_v54  ;;  %9228 = vmatpush3.msra.mxu1 %v11510_v58 }
 0xdca   : > { %9186 = vmatprep.subr.mxu0 %v10264_v15  ;;  %9229 = vmatprep.subr.mxu1 %v10264_v15 }
 0xdcb   : > { %9187 = vmatpush3.msra.mxu0 %v11514_v60  ;;  %9230 = vmatpush3.msra.mxu1 %v11529_v8 }
 0xdcc   : > { %9188 = vmatprep.subr.mxu0 %v10264_v15  ;;  %9232 = vmatmul.mubr.f32.vlgmr.msra.gmra.mxu1 %v5539_v28 }
 0xdcd   : > { %9269 = vmatprep.subr.mxu1 %v10264_v15  ;;  %9189 = vmatpush3.msra.mxu0 %v11517_v7 }
 0xdce   : > { %9270 = vmatpush3.msra.mxu1 %v11342_v44  ;;  %9190 = vmatprep.subr.mxu0 %v10264_v15  ;;  %v12098_v44 = vand.u32 4294901760, %v11427_v16 }
 0xdcf   : > { %9271 = vmatprep.subr.mxu1 %v10264_v15  ;;  %9191 = vmatpush3.msra.mxu0 %v11520_v22 }
 0xdd0   : > { %9272 = vmatpush3.msra.mxu1 %v11350_v48  ;;  %9192 = vmatprep.subr.mxu0 %v10264_v15  ;;  %v12100_v48 = vand.u32 4294901760, %v11460_v29 }
 0xdd1   : > { %9273 = vmatprep.subr.mxu1 %v10264_v15  ;;  %9193 = vmatpush3.msra.mxu0 %v11526_v6 }
 0xdd2   : > { %9274 = vmatpush3.msra.mxu1 %v11361_v52  ;;  %9194 = vmatprep.subr.mxu0 %v10264_v15  ;;  %v12103_v52 = vand.u32 4294901760, %v11514_v60 }
 0xdd3   : > { %9275 = vmatprep.subr.mxu1 %v10264_v15  ;;  %9195 = vmatpush3.msra.mxu0 %v11543_v24 }
 0xdd4   : > { %9196 = vmatprep.mubr.msk.f32.mxu0 %vm10265_vm9, %v10264_v15  ;;  %9276 = vmatpush3.msra.mxu1 %v11375_v57  ;;  %v12106_v57 = vand.u32 4294901760, %v11526_v6 }
 0xdd5   : > { %9197 = vmatmul.mubr.f32.vlgmr.msra.gmra.mxu0 %v11583_v37  ;;  %9234 = vmatprep.subr.mxu0 %v10264_v15 }
 0xdd6   : > { %9277 = vmatprep.subr.mxu1 %v10264_v15  ;;  %9235 = vmatpush3.msra.mxu0 %v5550_v50  ;;  %v12101_v50 = vand.u32 4294901760, %v11487_v39 }
 0xdd7   : > { %9278 = vmatpush3.msra.mxu1 %v11390_v63  ;;  %9236 = vmatprep.subr.mxu0 %v10264_v15 }
 0xdd8   : > { %9279 = vmatprep.subr.mxu1 %v10264_v15  ;;  %9237 = vmatpush3.msra.mxu0 %v5557_v55  ;;  %v12104_v55 = vand.u32 4294901760, %v11517_v7 }
 0xdd9   : > { %9280 = vmatpush3.msra.mxu1 %v11400_v3  ;;  %9238 = vmatprep.subr.mxu0 %v10264_v15 }
 0xdda   : > { %9281 = vmatprep.subr.mxu1 %v10264_v15  ;;  %9239 = vmatpush3.msra.mxu0 %v5564_v61  ;;  %v12107_v61 = vand.u32 4294901760, %v11543_v24 }
 0xddb   : > { %9282 = vmatpush3.msra.mxu1 %v11416_v10  ;;  %9240 = vmatprep.subr.mxu0 %v10264_v15 }
 0xddc   : > { %9283 = vmatprep.subr.mxu1 %v10264_v15  ;;  %9241 = vmatpush3.msra.mxu0 %v5571_v1 }
 0xddd   : > { %9284 = vmatpush3.msra.mxu1 %v11429_v17  ;;  %9242 = vmatprep.subr.mxu0 %v10264_v15 }
 0xdde   : > { %9285 = vmatprep.subr.mxu1 %v10264_v15  ;;  %9243 = vmatpush3.msra.mxu0 %v5578_v11 }
 0xddf   : > { %9286 = vmatpush3.msra.mxu1 %v11447_v23  ;;  %9244 = vmatprep.subr.mxu0 %v10264_v15 }
 0xde0   : > { %9287 = vmatprep.subr.mxu1 %v10264_v15  ;;  %9245 = vmatpush3.msra.mxu0 %v5585_v14 }
 0xde1   : > { %9288 = vmatpush3.msra.mxu1 %v11463_v30  ;;  %9246 = vmatprep.subr.mxu0 %v10264_v15 }
 0xde2   : > { %9289 = vmatprep.subr.mxu1 %v10264_v15  ;;  %9247 = vmatpush3.msra.mxu0 %v12098_v44 }
 0xde3   : > { %9290 = vmatpush3.msra.mxu1 %v11474_v35  ;;  %9248 = vmatprep.subr.mxu0 %v10264_v15 }
 0xde4   : > { %9291 = vmatprep.subr.mxu1 %v10264_v15  ;;  %9249 = vmatpush3.msra.mxu0 %v12099_v47 }
 0xde5   : > { %9292 = vmatpush3.msra.mxu1 %v11489_v40  ;;  %9250 = vmatprep.subr.mxu0 %v10264_v15 }
 0xde6   : > { %9293 = vmatprep.subr.mxu1 %v10264_v15  ;;  %9251 = vmatpush3.msra.mxu0 %v12100_v48 }
 0xde7   : > { %9294 = vmatpush3.msra.mxu1 %v11491_v41  ;;  %9252 = vmatprep.subr.mxu0 %v10264_v15 }
 0xde8   : > { %9295 = vmatprep.subr.mxu1 %v10264_v15  ;;  %9253 = vmatpush3.msra.mxu0 %v12101_v50 }
 0xde9   : > { %9296 = vmatpush3.msra.mxu1 %v11494_v42  ;;  %9254 = vmatprep.subr.mxu0 %v10264_v15 }
 0xdea   : > { %9297 = vmatprep.subr.mxu1 %v10264_v15  ;;  %9255 = vmatpush3.msra.mxu0 %v12102_v51 }
 0xdeb   : > { %9298 = vmatpush3.msra.mxu1 %v11510_v58  ;;  %9256 = vmatprep.subr.mxu0 %v10264_v15 }
 0xdec   : > { %9299 = vmatprep.subr.mxu1 %v10264_v15  ;;  %9257 = vmatpush3.msra.mxu0 %v12103_v52 }
 0xded   : > { %9300 = vmatpush3.msra.mxu1 %v11529_v8  ;;  %9301 = vmatprep.mubr.msk.f32.mxu1 %vm10265_vm9, %v10264_v15 }
 0xdee   : > { %9258 = vmatprep.subr.mxu0 %v10264_v15  ;;  %9302 = vmatmul.mubr.f32.vlgmr.msra.gmra.mxu1 %v11580_v2 }
 0xdef   : > { %9259 = vmatpush3.msra.mxu0 %v12104_v55  ;;  %9266 = vmatprep.mubr.msk.f32.mxu0 %vm10265_vm9, %v10264_v15 }
 0xdf0   : > { %9260 = vmatprep.subr.mxu0 %v10264_v15 }
 0xdf1   : > { %9261 = vmatpush3.msra.mxu0 %v12105_v56 }
 0xdf2   : > { %9262 = vmatprep.subr.mxu0 %v10264_v15 }
 0xdf3   : > { %9263 = vmatpush3.msra.mxu0 %v12106_v57 }
 0xdf4   : > { %9264 = vmatprep.subr.mxu0 %v10264_v15 }
 0xdf5   : > { %9265 = vmatpush3.msra.mxu0 %v12107_v61 }
 0xdf6   : > { %9267 = vmatmul.mubr.f32.vlgmr.msra.gmra.mxu0 %v11580_v2  ;;  %v8320_v2 = vld [vmem:[%s12108_s3] ss:$0 sm:$0xff] }
 0xe6c   : > { %v5694_v62 = vpop.f32.mrf.mxu1 }
 0xe6e   : > { %v9163_v63 = vpop.f32.mrf.mxu1 }
 0xe74   : > { %v5543_v1 = vpop.f32.mrf.mxu0 }
 0xe75   : > { %v5695_v16 = vadd.f32 %v5694_v62, %v5543_v1 }
 0xe76   : > { %v9128_v3 = vpop.f32.mrf.mxu0 }
 0xe8c   : > { %v5887_v4 = vpop.f32.mrf.mxu1 }
 0xe8e   : > { %v9233_v9 = vpop.f32.mrf.mxu1 }
 0xe95   : > { %v5798_v10 = vpop.f32.mrf.mxu0 }
 0xe96   : > { %v5799_v21 = vadd.f32 %v5798_v10, %v5695_v16 }
 0xe97   : > { %v9198_v11 = vpop.f32.mrf.mxu0 }
 0xe98   : > { %v5888_v23 = vadd.f32 %v5887_v4, %v5799_v21 }
 0xeae   : > { %v6093_v14 = vpop.f32.mrf.mxu1 }
 0xeb0   : > { %v9303_v17 = vpop.f32.mrf.mxu1 }
 0xeb6   : > { %v6006_v15 = vpop.f32.mrf.mxu0 }
 0xeb7   : > { %v6007_v29 = vadd.f32 %v6006_v15, %v5888_v23 }
 0xeb8   : > { %v9268_v30 = vpop.f32.mrf.mxu0 }
 0xeb9   : > { %v6094_v35 = vadd.f32 %v6093_v14, %v6007_v29 }
 0xebb   : > { %v6097_v39 = vadd.f32 %v6094_v35, %v11071_v46 }
 0xebd   : > { %v6105_v40 = vadd.f32 %v8320_v2, %v6097_v39 }
 0xebf   : > { %6106 = vst.msk [vmem:[%s929_s9] sm:$0xff] %vm3860_vm8, %v6105_v40 }
 0xec0 PF: > { %s12109_s28 = sld [smem:[#allocation45_spill]]  ;;  %vm6116_vm11 = vcmask 64512   ;;  %v10267_v41 = vmov 0.0   ;;  %vm10268_vm12 = vmmov 0   ;;  %s10269_s7 = smov 120  }
 0xec1   : > { %9304 = vmatprep.subr.mxu0 %v10267_v41  ;;  %9309 = vmatprep.subr.mxu1 %v10267_v41 }
 0xec2   : > { %9306 = vmatprep.mubr.msk.f32.mxu0 %vm10268_vm12, %v10267_v41  ;;  %9311 = vmatprep.mubr.msk.f32.mxu1 %vm10268_vm12, %v10267_v41 }
 0xec6   : > { %s8321_s5 = sshll.u32 %s12109_s28, 3 }
 0xec7   : > { %s6110_s24 = scalar_lea.vmem [#allocation3], %s8321_s5  ;;  %s6108_s20 = scalar_lea.vmem [#allocation2], %s8321_s5 }
 0xec8   : > { %v6111_v42 = vld [vmem:[%s6110_s24] sm:$0xff]  ;;  %s6114_s2 = scalar_lea.vmem [#allocation7], %s8321_s5  ;;  %s6112_s13 = scalar_lea.vmem [#allocation6], %s8321_s5 }
 0xec9   : > { %v6109_v54 = vld [vmem:[%s6108_s20] sm:$0xff]  ;;  %7029 = vrot.lane.b32.xlu0 %v6111_v42, %s10269_s7  ;;  %v6121_v46 = vsel %vm6116_vm11, %v6111_v42, 0 }
 0xeca   : > { %v6118_v58 = vsel %vm6116_vm11, %v6109_v54, 0  ;;  %v6115_v60 = vld [vmem:[%s6114_s2] sm:$0xff]  ;;  %v6154_v22 = vand.u32 4294901760, %v6121_v46 }
 0xecb   : > { %v6113_v7 = vld [vmem:[%s6112_s13] sm:$0xff]  ;;  %v6189_v5 = vand.u32 4294901760, %v6118_v58  ;;  %7484 = vrot.lane.b32.xlu1 %v6115_v60, %s10269_s7  ;;  %v6574_v6 = vsel %vm6116_vm11, %v6115_v60, 0 }
 0xecc   : > { %v6571_v8 = vsel %vm6116_vm11, %v6113_v7, 0  ;;  %v6231_v13 = vsub.f32 %v6121_v46, %v6154_v22  ;;  %v6607_v19 = vand.u32 4294901760, %v6574_v6  ;;  %9305 = vmatpush3.xpose.msra.mxu0 %v6154_v22 }
 0xecd   : > { %v6190_v18 = vsub.f32 %v6118_v58, %v6189_v5  ;;  %v11759_v24 = vand.u32 4294901760, %v6571_v8  ;;  %7027 = vrot.lane.b32.xlu0 %v6109_v54, %s10269_s7  ;;  %9314 = vmatprep.subr.mxu0 %v10267_v41 }
 0xece   : > { %v6232_v31 = vand.u32 4294901760, %v6231_v13  ;;  %v6684_v26 = vsub.f32 %v6574_v6, %v6607_v19 }
 0xecf   : > { %7482 = vrot.lane.b32.xlu1 %v6113_v7, %s10269_s7  ;;  %v6191_v20 = vand.u32 4294901760, %v6190_v18  ;;  %v6643_v38 = vsub.f32 %v6571_v8, %v11759_v24 }
 0xed0   : > { %v6233_v43 = vsub.f32 %v6231_v13, %v6232_v31  ;;  %v6685_v0 = vand.u32 4294901760, %v6684_v26 }
 0xed1   : > { %v6192_v45 = vsub.f32 %v6190_v18, %v6191_v20  ;;  %v6644_v12 = vand.u32 4294901760, %v6643_v38 }
 0xed2   : > { %v6234_v49 = vand.u32 4294901760, %v6233_v43  ;;  %v6686_v25 = vsub.f32 %v6684_v26, %v6685_v0 }
 0xed3   : > { %v6193_v53 = vand.u32 4294901760, %v6192_v45  ;;  %v6645_v32 = vsub.f32 %v6643_v38, %v6644_v12 }
 0xed4   : > { %9310 = vmatpush3.xpose.msra.mxu1 %v6234_v49  ;;  %v6687_v33 = vand.u32 4294901760, %v6686_v25 }
 0xed5   : > { %9307 = vmatmul.mubr.f32.vlgmr.msra.gmra.mxu0 %v6193_v53  ;;  %9319 = vmatprep.subr.mxu1 %v10267_v41  ;;  %v6646_v27 = vand.u32 4294901760, %v6645_v32  ;;  %v7023_v53 = vld [vmem:[%s10724_s25] sm:$0xff] }
 0xed6   : > { %9315 = vmatpush3.xpose.msra.mxu0 %v6231_v13  ;;  %9316 = vmatprep.mubr.msk.f32.mxu0 %vm10268_vm12, %v10267_v41 }
 0xed7   : > { %9324 = vmatprep.subr.mxu0 %v10267_v41  ;;  %9312 = vmatmul.mubr.f32.vlgmr.msra.gmra.mxu1 %v6189_v5 }
 0xed8   : > { %9320 = vmatpush3.xpose.msra.mxu1 %v6154_v22  ;;  %9321 = vmatprep.mubr.msk.f32.mxu1 %vm10268_vm12, %v10267_v41 }
 0xed9   : > { %9317 = vmatmul.mubr.f32.vlgmr.msra.gmra.mxu0 %v6190_v18  ;;  %9329 = vmatprep.subr.mxu1 %v10267_v41 }
 0xeda   : > { %9325 = vmatpush3.xpose.msra.mxu0 %v6232_v31  ;;  %9326 = vmatprep.mubr.msk.f32.mxu0 %vm10268_vm12, %v10267_v41 }
 0xedb   : > { %9322 = vmatmul.mubr.f32.vlgmr.msra.gmra.mxu1 %v6191_v20  ;;  %9334 = vmatprep.subr.mxu0 %v10267_v41 }
 0xedc   : > { %9330 = vmatpush3.xpose.msra.mxu1 %v6154_v22  ;;  %9331 = vmatprep.mubr.msk.f32.mxu1 %vm10268_vm12, %v10267_v41 }
 0xedd   : > { %9327 = vmatmul.mubr.f32.vlgmr.msra.gmra.mxu0 %v6189_v5  ;;  %9339 = vmatprep.subr.mxu1 %v10267_v41 }
 0xede   : > { %9335 = vmatpush3.xpose.msra.mxu0 %v6607_v19  ;;  %9336 = vmatprep.mubr.msk.f32.mxu0 %vm10268_vm12, %v10267_v41 }
 0xedf   : > { %9332 = vmatmul.mubr.f32.vlgmr.msra.gmra.mxu1 %v6189_v5  ;;  %9344 = vmatprep.subr.mxu0 %v10267_v41 }
 0xee0   : > { %9340 = vmatpush3.xpose.msra.mxu1 %v6687_v33  ;;  %9341 = vmatprep.mubr.msk.f32.mxu1 %vm10268_vm12, %v10267_v41 }
 0xee1   : > { %9337 = vmatmul.mubr.f32.vlgmr.msra.gmra.mxu0 %v6646_v27  ;;  %9349 = vmatprep.subr.mxu1 %v10267_v41 }
 0xee2   : > { %9345 = vmatpush3.xpose.msra.mxu0 %v6684_v26  ;;  %9346 = vmatprep.mubr.msk.f32.mxu0 %vm10268_vm12, %v10267_v41 }
 0xee3   : > { %9342 = vmatmul.mubr.f32.vlgmr.msra.gmra.mxu1 %v11759_v24  ;;  %9354 = vmatprep.subr.mxu0 %v10267_v41 }
 0xee4   : > { %9350 = vmatpush3.xpose.msra.mxu1 %v6607_v19  ;;  %9351 = vmatprep.mubr.msk.f32.mxu1 %vm10268_vm12, %v10267_v41 }
 0xee5   : > { %9347 = vmatmul.mubr.f32.vlgmr.msra.gmra.mxu0 %v6643_v38  ;;  %9359 = vmatprep.subr.mxu1 %v10267_v41 }
 0xee6   : > { %9355 = vmatpush3.xpose.msra.mxu0 %v6685_v0  ;;  %9356 = vmatprep.mubr.msk.f32.mxu0 %vm10268_vm12, %v10267_v41 }
 0xee7   : > { %9352 = vmatmul.mubr.f32.vlgmr.msra.gmra.mxu1 %v6644_v12  ;;  %9364 = vmatprep.subr.mxu0 %v10267_v41 }
 0xee8   : > { %9360 = vmatpush3.xpose.msra.mxu1 %v6607_v19  ;;  %9361 = vmatprep.mubr.msk.f32.mxu1 %vm10268_vm12, %v10267_v41 }
 0xee9   : > { %9357 = vmatmul.mubr.f32.vlgmr.msra.gmra.mxu0 %v11759_v24  ;;  %9369 = vmatprep.subr.mxu1 %v10267_v41 }
 0xeea   : > { %9366 = vmatprep.mubr.msk.f32.mxu0 %vm10268_vm12, %v10267_v41 }
 0xeeb   : > { %9362 = vmatmul.mubr.f32.vlgmr.msra.gmra.mxu1 %v11759_v24 }
 0xeec   : > { %9371 = vmatprep.mubr.msk.f32.mxu1 %vm10268_vm12, %v10267_v41 }
 0xf3b   : > { %v7030_v36 = vpop.permute.xlu0 %7029 }
 0xf3c   : > { %v7033_v37 = vsel %vm6116_vm11, %v7030_v36, 0 }
 0xf3d   : > { %v7485_v28 = vpop.permute.xlu1 %7484  ;;  %v7066_v34 = vand.u32 4294901760, %v7033_v37 }
 0xf3e   : > { %v7488_v59 = vsel %vm6116_vm11, %v7485_v28, 0 }
 0xf3f   : > { %v7143_v44 = vsub.f32 %v7033_v37, %v7066_v34  ;;  %v7028_v47 = vpop.permute.xlu0 %7027  ;;  %9365 = vmatpush3.xpose.msra.mxu0 %v7066_v34  ;;  %v7521_v55 = vand.u32 4294901760, %v7488_v59 }
 0xf40   : > { %v7031_v48 = vsel %vm6116_vm11, %v7028_v47, 0  ;;  %9374 = vmatprep.subr.mxu0 %v10267_v41 }
 0xf41   : > { %v7483_v50 = vpop.permute.xlu1 %7482  ;;  %v7144_v51 = vand.u32 4294901760, %v7143_v44  ;;  %v7101_v52 = vand.u32 4294901760, %v7031_v48  ;;  %v7598_v1 = vsub.f32 %v7488_v59, %v7521_v55 }
 0xf42   : > { %v7486_v56 = vsel %vm6116_vm11, %v7483_v50, 0 }
 0xf43   : > { %v7145_v57 = vsub.f32 %v7143_v44, %v7144_v51  ;;  %v7102_v61 = vsub.f32 %v7031_v48, %v7101_v52  ;;  %v7556_v3 = vand.u32 4294901760, %v7486_v56  ;;  %v7599_v10 = vand.u32 4294901760, %v7598_v1 }
 0xf45   : > { %v7146_v62 = vand.u32 4294901760, %v7145_v57  ;;  %v7103_v63 = vand.u32 4294901760, %v7102_v61  ;;  %v7557_v11 = vsub.f32 %v7486_v56, %v7556_v3  ;;  %v7600_v14 = vsub.f32 %v7598_v1, %v7599_v10 }
 0xf47   : > { %v7104_v4 = vsub.f32 %v7102_v61, %v7103_v63  ;;  %9370 = vmatpush3.xpose.msra.mxu1 %v7146_v62  ;;  %v7558_v16 = vand.u32 4294901760, %v7557_v11  ;;  %v7601_v17 = vand.u32 4294901760, %v7600_v14 }
 0xf48   : > { %9379 = vmatprep.subr.mxu1 %v10267_v41 }
 0xf49   : > { %v7105_v9 = vand.u32 4294901760, %v7104_v4  ;;  %v7559_v21 = vsub.f32 %v7557_v11, %v7558_v16 }
 0xf4a   : > { %9372 = vmatmul.mubr.f32.vlgmr.msra.gmra.mxu1 %v7101_v52 }
 0xf4b   : > { %9367 = vmatmul.mubr.f32.vlgmr.msra.gmra.mxu0 %v7105_v9  ;;  %9380 = vmatpush3.xpose.msra.mxu1 %v7066_v34  ;;  %v7560_v23 = vand.u32 4294901760, %v7559_v21 }
 0xf4c   : > { %9375 = vmatpush3.xpose.msra.mxu0 %v7143_v44  ;;  %9381 = vmatprep.mubr.msk.f32.mxu1 %vm10268_vm12, %v10267_v41 }
 0xf4d   : > { %9376 = vmatprep.mubr.msk.f32.mxu0 %vm10268_vm12, %v10267_v41  ;;  %9384 = vmatprep.subr.mxu0 %v10267_v41 }
 0xf4e   : > { %9382 = vmatmul.mubr.f32.vlgmr.msra.gmra.mxu1 %v7103_v63  ;;  %9389 = vmatprep.subr.mxu1 %v10267_v41 }
 0xf4f   : > { %9377 = vmatmul.mubr.f32.vlgmr.msra.gmra.mxu0 %v7102_v61  ;;  %9390 = vmatpush3.xpose.msra.mxu1 %v7066_v34 }
 0xf50   : > { %9385 = vmatpush3.xpose.msra.mxu0 %v7144_v51  ;;  %9391 = vmatprep.mubr.msk.f32.mxu1 %vm10268_vm12, %v10267_v41 }
 0xf51   : > { %9386 = vmatprep.mubr.msk.f32.mxu0 %vm10268_vm12, %v10267_v41  ;;  %9394 = vmatprep.subr.mxu0 %v10267_v41 }
 0xf52   : > { %9392 = vmatmul.mubr.f32.vlgmr.msra.gmra.mxu1 %v7101_v52  ;;  %9399 = vmatprep.subr.mxu1 %v10267_v41 }
 0xf53   : > { %9387 = vmatmul.mubr.f32.vlgmr.msra.gmra.mxu0 %v7101_v52  ;;  %9400 = vmatpush3.xpose.msra.mxu1 %v7601_v17 }
 0xf54   : > { %9395 = vmatpush3.xpose.msra.mxu0 %v7521_v55  ;;  %9401 = vmatprep.mubr.msk.f32.mxu1 %vm10268_vm12, %v10267_v41 }
 0xf55   : > { %9396 = vmatprep.mubr.msk.f32.mxu0 %vm10268_vm12, %v10267_v41  ;;  %9404 = vmatprep.subr.mxu0 %v10267_v41 }
 0xf56   : > { %9402 = vmatmul.mubr.f32.vlgmr.msra.gmra.mxu1 %v7556_v3  ;;  %9409 = vmatprep.subr.mxu1 %v10267_v41 }
 0xf57   : > { %9397 = vmatmul.mubr.f32.vlgmr.msra.gmra.mxu0 %v7560_v23  ;;  %9410 = vmatpush3.xpose.msra.mxu1 %v7521_v55 }
 0xf58   : > { %9405 = vmatpush3.xpose.msra.mxu0 %v7598_v1  ;;  %9411 = vmatprep.mubr.msk.f32.mxu1 %vm10268_vm12, %v10267_v41 }
 0xf59   : > { %9406 = vmatprep.mubr.msk.f32.mxu0 %vm10268_vm12, %v10267_v41  ;;  %9414 = vmatprep.subr.mxu0 %v10267_v41 }
 0xf5a   : > { %9412 = vmatmul.mubr.f32.vlgmr.msra.gmra.mxu1 %v7558_v16  ;;  %9419 = vmatprep.subr.mxu1 %v10267_v41 }
 0xf5b   : > { %9407 = vmatmul.mubr.f32.vlgmr.msra.gmra.mxu0 %v7557_v11  ;;  %9420 = vmatpush3.xpose.msra.mxu1 %v7521_v55 }
 0xf5c   : > { %9415 = vmatpush3.xpose.msra.mxu0 %v7599_v10  ;;  %9421 = vmatprep.mubr.msk.f32.mxu1 %vm10268_vm12, %v10267_v41 }
 0xf5d   : > { %9416 = vmatprep.mubr.msk.f32.mxu0 %vm10268_vm12, %v10267_v41 }
 0xf5e   : > { %9422 = vmatmul.mubr.f32.vlgmr.msra.gmra.mxu1 %v7556_v3 }
 0xf5f   : > { %9417 = vmatmul.mubr.f32.vlgmr.msra.gmra.mxu0 %v7556_v3 }
 0xf95   : > { %v6195_v15 = vpop.f32.mrf.mxu0 }
 0xf97   : > { %v9308_v29 = vpop.f32.mrf.mxu0  ;;  %v6271_v30 = vpop.f32.mrf.mxu1 }
 0xf98   : > { %v6272_v35 = vadd.f32 %v6271_v30, %v6195_v15 }
 0xf99   : > { %v6345_v2 = vpop.f32.mrf.mxu0  ;;  %v9313_v39 = vpop.f32.mrf.mxu1 }
 0xf9a   : > { %v6346_v40 = vadd.f32 %v6345_v2, %v6272_v35 }
 0xf9b   : > { %v9318_v42 = vpop.f32.mrf.mxu0  ;;  %v6419_v54 = vpop.f32.mrf.mxu1 }
 0xf9c   : > { %v6420_v46 = vadd.f32 %v6419_v54, %v6346_v40  ;;  %v8322_v54 = vld [vmem:[%s10724_s25 + $0x8] sm:$0xff] }
 0xf9d   : > { %v6493_v58 = vpop.f32.mrf.mxu0  ;;  %v9323_v60 = vpop.f32.mrf.mxu1 }
 0xf9e   : > { %v6494_v5 = vadd.f32 %v6493_v58, %v6420_v46 }
 0xf9f   : > { %v9328_v7 = vpop.f32.mrf.mxu0  ;;  %v6565_v22 = vpop.f32.mrf.mxu1 }
 0xfa0   : > { %v6566_v18 = vadd.f32 %v6565_v22, %v6494_v5 }
 0xfa1   : > { %v6648_v6 = vpop.f32.mrf.mxu0  ;;  %v9333_v41 = vpop.f32.mrf.mxu1 }
 0xfa2   : > { %v6569_v43 = vmul.f32 0.35355338, %v6566_v18 }
 0xfa3   : > { %v9338_v8 = vpop.f32.mrf.mxu0  ;;  %v6724_v13 = vpop.f32.mrf.mxu1 }
 0xfa4   : > { %v6725_v19 = vadd.f32 %v6724_v13, %v6648_v6  ;;  %v7024_v33 = vadd.f32 %v7023_v53, %v6569_v43 }
 0xfa5   : > { %v6798_v24 = vpop.f32.mrf.mxu0  ;;  %v9343_v31 = vpop.f32.mrf.mxu1 }
 0xfa6   : > { %v6799_v20 = vadd.f32 %v6798_v24, %v6725_v19 }
 0xfa7   : > { %v9348_v26 = vpop.f32.mrf.mxu0  ;;  %v6872_v38 = vpop.f32.mrf.mxu1 }
 0xfa8   : > { %v6873_v45 = vadd.f32 %v6872_v38, %v6799_v20 }
 0xfa9   : > { %v6946_v49 = vpop.f32.mrf.mxu0  ;;  %v9353_v0 = vpop.f32.mrf.mxu1 }
 0xfaa   : > { %v6947_v12 = vadd.f32 %v6946_v49, %v6873_v45 }
 0xfab   : > { %v9358_v25 = vpop.f32.mrf.mxu0  ;;  %v7018_v32 = vpop.f32.mrf.mxu1 }
 0xfac   : > { %v7019_v27 = vadd.f32 %v7018_v32, %v6947_v12 }
 0xfad   : > { %v9363_v36 = vpop.f32.mrf.mxu1 }
 0xfae   : > { %v7022_v37 = vmul.f32 0.35355338, %v7019_v27 }
 0xfb0   : > { %v7025_v28 = vadd.f32 %v7024_v33, %v7022_v37 }
 0xfb2   : > { %7026 = vst.msk [vmem:[%s10727_s6] sm:$0xff] %vm6116_vm11, %v7025_v28 }
0x100a   : > { %v7183_v34 = vpop.f32.mrf.mxu1 }
0x100b   : > { %v7107_v59 = vpop.f32.mrf.mxu0 }
0x100c   : > { %v9373_v44 = vpop.f32.mrf.mxu1  ;;  %v7184_v48 = vadd.f32 %v7183_v34, %v7107_v59 }
0x100d   : > { %v9368_v47 = vpop.f32.mrf.mxu0 }
0x100e   : > { %v7331_v50 = vpop.f32.mrf.mxu1 }
0x100f   : > { %v7257_v51 = vpop.f32.mrf.mxu0 }
0x1010   : > { %v7258_v52 = vadd.f32 %v7257_v51, %v7184_v48  ;;  %v9383_v55 = vpop.f32.mrf.mxu1 }
0x1011   : > { %v9378_v56 = vpop.f32.mrf.mxu0 }
0x1012   : > { %v7477_v57 = vpop.f32.mrf.mxu1  ;;  %v7332_v62 = vadd.f32 %v7331_v50, %v7258_v52 }
0x1013   : > { %v7405_v61 = vpop.f32.mrf.mxu0 }
0x1014   : > { %v9393_v63 = vpop.f32.mrf.mxu1  ;;  %v7406_v9 = vadd.f32 %v7405_v61, %v7332_v62 }
0x1015   : > { %v9388_v1 = vpop.f32.mrf.mxu0 }
0x1016   : > { %v7638_v3 = vpop.f32.mrf.mxu1  ;;  %v7478_v21 = vadd.f32 %v7477_v57, %v7406_v9 }
0x1017   : > { %v7562_v4 = vpop.f32.mrf.mxu0 }
0x1018   : > { %v9403_v10 = vpop.f32.mrf.mxu1  ;;  %v7639_v14 = vadd.f32 %v7638_v3, %v7562_v4  ;;  %v7481_v39 = vmul.f32 0.35355338, %v7478_v21 }
0x1019   : > { %v9398_v11 = vpop.f32.mrf.mxu0 }
0x101a   : > { %v7786_v16 = vpop.f32.mrf.mxu1  ;;  %v7939_v60 = vadd.f32 %v8322_v54, %v7481_v39 }
0x101b   : > { %v7712_v17 = vpop.f32.mrf.mxu0 }
0x101c   : > { %v7713_v23 = vadd.f32 %v7712_v17, %v7639_v14  ;;  %v9413_v15 = vpop.f32.mrf.mxu1 }
0x101d   : > { %v9408_v29 = vpop.f32.mrf.mxu0 }
0x101e   : > { %v7932_v30 = vpop.f32.mrf.mxu1  ;;  %v7787_v35 = vadd.f32 %v7786_v16, %v7713_v23 }
0x101f   : > { %v7860_v2 = vpop.f32.mrf.mxu0 }
0x1020   : > { %v7861_v40 = vadd.f32 %v7860_v2, %v7787_v35  ;;  %v9423_v42 = vpop.f32.mrf.mxu1 }
0x1021   : > { %v9418_v46 = vpop.f32.mrf.mxu0 }
0x1022   : > { %v7933_v58 = vadd.f32 %v7932_v30, %v7861_v40 }
0x1024   : > { %v7936_v7 = vmul.f32 0.35355338, %v7933_v58 }
0x1026   : > { %v7940_v22 = vadd.f32 %v7939_v60, %v7936_v7 }
0x1028   : > { %8323 = vst.msk [vmem:[%s10727_s6 + $0x8] sm:$0xff] %vm6116_vm11, %v7940_v22 }
0x1029 PF: > { %s12110_s12 = sld [smem:[#allocation47_spill]]  ;;  %s7962_s24 = sshll.u32 %s929_s9, 4  ;;  %s7963_s24 = int_to_ptr.vmem [resolvable:$true] %s7962_s24 }
0x102a   : > { %s12111_s28 = sld [smem:[#allocation76_spill]]  ;;  %s7944_s25 = scalar_lea.sflag [#allocation11], %s10674_s11 }
0x102b   : > { %s10042_s7 = scalar_lea.vmem %s7963_s24, 128  ;;  %s10270_s2 = smov [#allocation30]  }
0x102c   : > { %p10043_p0 = scmp.ne.s32.totalorder %s7963_s24, %s10042_s7  ;;  %s10046_s13 = sshll.u32 %s10270_s2, 4  ;;  %s10047_s13 = int_to_ptr.vmem [resolvable:$false] %s10046_s13 }
0x102d   : > { %s10048_s22 = scalar_lea.vmem %s10047_s13, 256  ;;  %p10049_p5 = scmp.lt.s32.totalorder %s7963_s24, %s10047_s13 }
0x102e   : > { %p10044_p1 = pnand %p10043_p0, %p10598_p7  ;;  %p10050_p2 = scmp.lt.s32.totalorder %s10048_s22, %s10042_s7 }
0x102f   : > { %s8326_s21 = sshll.u32 %s12110_s12, 7 }
0x1030   : > { %s12112_s20 = smov %s12111_s28  ;;  %s7960_s5 = scalar_lea.hbm %s12111_s28, %s8326_s21 }
0x1031   : > { %p10045_p12 = pneg %p10044_p1  ;;  %p10051_p13 = por %p10050_p2, %p10049_p5 }
0x1033   : > { %p10052_p8 = pnand %p10051_p13, %p10045_p12 }
0x1035   : > { %10055 = shalt.err (!%p10052_p8)
}
0x1036   : > { %s10056_s1 = scalar_lea.hbm %s7960_s5, 128  ;;  %s10060_s9 = scalar_lea.hbm %s12112_s20, 256 }
0x1037   : > { %p10057_p9 = scmp.ne.s32.totalorder %s7960_s5, %s10056_s1  ;;  %p10061_p4 = scmp.lt.s32.totalorder %s7960_s5, %s12112_s20 }
0x1038   : > { %p10062_p0 = scmp.lt.s32.totalorder %s10060_s9, %s10056_s1 }
0x1039   : > { %p10058_p11 = pnand %p10057_p9, %p10598_p7 }
0x103a   : > { %p10063_p1 = por %p10062_p0, %p10061_p4 }
0x103b   : > { %p10059_p6 = pneg %p10058_p11 }
0x103d   : > { %p10064_p10 = pnand %p10063_p1, %p10059_p6 }
0x103f   : > { %10067 = shalt.err (!%p10064_p10)
}
0x1040   : > { %s12113_s22 = sld [smem:[#allocation46_spill]]  ;;  %s8328_s13 = sshll.u32 %s12110_s12, 2 }
0x1041   : > { %s12114_s28 = sld [smem:[#allocation45_spill]]  ;;  %s7978_s11 = sshll.u32 %s10727_s6, 4  ;;  %s11864_s11 = int_to_ptr.vmem [resolvable:$true] %s7978_s11 }
0x1042   : > { %s12115_s7 = sld [smem:[#allocation44_spill]]  ;;  %s10271_s6 = smov [#allocation31]  }
0x1043   : > { %9472 = dma.vmem_to_hbm [thread:$0]  (%p10598_p7), %s7963_s24, 128, %s7960_s5, %s7944_s25  }
0x1044   : > { %s12116_s3 = sld [smem:[#allocation77_spill]]  ;;  %s10068_s5 = scalar_lea.vmem %s11864_s11, 256 }
0x1045   : > { %p10069_p7 = scmp.ne.s32.totalorder %s11864_s11, %s10068_s5  ;;  %s10072_s12 = sshll.u32 %s10271_s6, 4  ;;  %s10073_s12 = int_to_ptr.vmem [resolvable:$false] %s10072_s12 }
0x1046   : > { %s10074_s24 = scalar_lea.vmem %s10073_s12, 512  ;;  %p10075_p5 = scmp.lt.s32.totalorder %s11864_s11, %s10073_s12 }
0x1047   : > { %s7969_s2 = smul.u32 %s12114_s28, %s12113_s22  ;;  %p10070_p10 = pnand %p10069_p7, %p10625_p3 }
0x1048   : > { %s12118_s18 = sand.u32 1, %s12115_s7   ;;  %p10076_p2 = scmp.lt.s32.totalorder %s10074_s24, %s10068_s5 }
0x1049   : > { %s8327_s8 = sshll.u32 %s7969_s2, 1  ;;  %s11873_s20 = scalar_lea.sflag [#allocation32], %s12118_s18 }
0x104a   : > { %s7975_s1 = sadd.s32 %s8328_s13, %s8327_s8  ;;  %s12117_s10 = smov %s12116_s3 }
0x104b   : > { %s8329_s9 = sshll.u32 %s7975_s1, 7  ;;  %p10071_p12 = pneg %p10070_p10 }
0x104c   : > { %s11869_s17 = scalar_lea.hbm %s12116_s3, %s8329_s9  ;;  %p10077_p13 = por %p10076_p2, %p10075_p5 }
0x104e   : > { %p10078_p8 = pnand %p10077_p13, %p10071_p12 }
0x1050   : > { %10081 = shalt.err (!%p10078_p8)
}
0x1051   : > { %s10082_s18 = scalar_lea.hbm %s11869_s17, 256  ;;  %s10086_s28 = scalar_lea.hbm %s12117_s10, 1024 }
0x1052   : > { %p10083_p9 = scmp.ne.s32.totalorder %s11869_s17, %s10082_s18  ;;  %p10087_p4 = scmp.lt.s32.totalorder %s11869_s17, %s12117_s10 }
0x1053   : > { %p10088_p0 = scmp.lt.s32.totalorder %s10086_s28, %s10082_s18 }
0x1054   : > { %p10084_p11 = pnand %p10083_p9, %p10625_p3 }
0x1055   : > { %p10089_p1 = por %p10088_p0, %p10087_p4 }
0x1056   : > { %p10085_p6 = pneg %p10084_p11 }
0x1058   : > { %p10090_p7 = pnand %p10089_p1, %p10085_p6 }
0x105a   : > { %10093 = shalt.err (!%p10090_p7)
}
0x105b   : > { %s10272_s13 = smov 128   ;;  %s10273_s8 = smov 8  }
0x105c   : > { %9473 = dma.vmem_to_hbm [thread:$0]  (%p10625_p3), %s11864_s11, 256, %s11869_s17, %s11873_s20, %s10272_s13, %s10272_s13, %s10273_s8  }
0x105d PF: > { %p9547_p10 = scmp.ge.s32.totalorder %s10236_s26, 2  ;;  %s7993_s1 = sand.u32 1, %s10200_s30  }
0x105e   : > { %p12119_p12 = scmp.ne.s32.totalorder %s12060_s19, 0  ;;  %s7994_s9 = scalar_lea.sflag [#allocation11], %s7993_s1 }
0x1060   : > { %p9518_p5 = pnand %p9547_p10, %p12119_p12 }
0x1062   : > { %p9519_p2 = pneg %p9518_p5 }
0x1064   : > { %10179 = dma.done.wait (%p9519_p2), %s7994_s9, 128  }
0x1065   : > { %10181 = vsyncadd (%p9519_p2), %s7994_s9, 4294967168  ;;  %s12120_s21 = sld [smem:[#allocation43_spill]]  ;;  %p12121_p13 = scmp.ne.s32.totalorder %s12063_s27, 0 }
0x1067   : > { %p9521_p8 = pnand %p9547_p10, %p12121_p13 }
0x1069   : > { %p9522_p9 = pneg %p9521_p8 }
0x106b   : > { %s8002_s23 = sand.u32 1, %s12120_s21  }
0x106c   : > { %s8003_s14 = scalar_lea.sflag [#allocation32], %s8002_s23 }
0x106d   : > { %10183 = dma.done.wait (%p9522_p9), %s8003_s14, 256  }
0x106e   : > { %10185 = vsyncadd (%p9522_p9), %s8003_s14, 4294967040  ;;  %s50_s26 = sadd.s32 1, %s10236_s26   ;;  %s12123_s3 = sld [smem:[#allocation44_spill]] }
0x106f   : > { %p11904_p3 = scmp.ge.s32.totalorder %s50_s26, 10   ;;  %s12124_s23 = sld [smem:[#allocation48_spill]] }
0x1070   : > { %s12125_s1 = sld [smem:[#allocation49_spill]]  ;;  %s12130_s28 = smov %s10196_s29 }
0x1071   : > { %s12126_s5 = sld [smem:[#allocation50_spill]]  ;;  %s12131_s29 = smov %s10633_s16 }
0x1072   : > { %s12127_s24 = sld [smem:[#allocation52_spill]]  ;;  %s12132_s30 = smov %s10204_s4 }
0x1073   : > { %s12128_s6 = sld [smem:[#allocation53_spill]]  ;;  %s12133_s4 = smov %s10208_s0 }
0x1074   : > { %s12129_s25 = sld [smem:[#allocation54_spill]]  ;;  %s12134_s0 = smov %s10630_s15 }
0x1075   :  { %49 = sbr.rel (!%p11904_p3) target bundleno = 43 (0x2b), region = 258 }
0x107a   :  { %8008 = vsyncpa [#allocation10], 1 }
0x107b   :  { %8010 = vsyncpa [#allocation10 + $0x1], 1 }
0x107c   :  { %8011 = vsyncpa [#allocation13], 1 }
0x107d   :  { %8013 = vsyncpa [#allocation13 + $0x1], 1 }
0x107e   :  { %8014 = vsyncpa [#allocation16], 1 }
0x107f   :  { %8015 = vsyncpa [#allocation19], 1 }
0x1080   :  { %8016 = vsyncpa [#allocation22], 1 }
0x1081   :  { %8017 = vsyncpa [#allocation25], 1 }
0x1082   :  { %8018 = vsyncpa [#allocation28], 1 }
0x1083   :  { %8019 = vsyncpa [#allocation11], 1 }
0x1084   :  { %8021 = vsyncpa [#allocation11 + $0x1], 1 }
0x1085   :  { %8022 = vsyncpa [#allocation32], 1 }
0x1086   :  { %8024 = vsyncpa [#allocation32 + $0x1], 1 }

</bundles_post_ra>
